<compile_context>
chip_gen: v7x
topology: tpu7x:2x2x1
jax: 0.10.0
libtpu: 0.0.40
codegen_flags: <defaults>
</compile_context>

<pallas_src>
import jax
import jax.numpy as jnp
from jax.experimental import pallas as pl
from jax.experimental.pallas import tpu as pltpu

NUM_CLASSES = 3
IN_CH = 3
H = W = 256                      # 1-channel mask => H*W must equal 2**16
FC_IN = H * W                    # 65536 == 2**16 (nn.Linear in_features)
TK = 32_768                      # H*W lanes per grid step  -> grid = (2,)
RSUB = 64                        # rows (sublane dim) processed per inner chunk


# ---------------------------------------------------------------------------
# Fused kernel: mask stand-in + flatten + Linear(2**16, N) + Softmax
#   mw_ref   : (C,)                 SMEM  mask 1x1-conv weights
#   mb_ref   : (1,)                 SMEM  mask bias
#   fb_ref   : (N,)                 SMEM  fc bias
#   x_ref    : (B, C, rows, 128)    VMEM  sublane/lane-dense input slab (f32)
#   wfc_ref  : (N, rows, 128)       VMEM  fc weight slab (bf16, natural layout)
#   o_ref    : (B, N)               VMEM  softmax probabilities (last step)
#   acc_ref  : (B*N*8, 128)         VMEM  persistent per-lane f32 accumulator
#   logit_ref: (B, N)               VMEM  tiny scratch for finalize logits
# ---------------------------------------------------------------------------
def fused_kernel(mw_ref, mb_ref, fb_ref, x_ref, wfc_ref, o_ref,
                 acc_ref, logit_ref):
    k = pl.program_id(0)

    @pl.when(k == 0)
    def _init():
        acc_ref[...] = jnp.zeros_like(acc_ref)

    B = x_ref.shape[0]
    C = x_ref.shape[1]
    rows = x_ref.shape[2]
    N = wfc_ref.shape[0]
    rs = min(RSUB, rows)

    mb = mb_ref[0]

    # Per step: only VPU/EUP work (mask) + VALU muls/adds (fc partial sums).
    # No cross-lane reductions, no (1,1) masked RMWs inside the hot loop.
    for r0 in range(0, rows, rs):
        for b in range(B):
            # mask stand-in: 1x1 conv C->1 + sigmoid on a (rs, 128) slab.
            z = mw_ref[0] * x_ref[b, 0, r0:r0 + rs, :] + mb
            for c in range(1, C):
                z = z + mw_ref[c] * x_ref[b, c, r0:r0 + rs, :]
            m = jax.nn.sigmoid(z)                              # (rs, 128) f32

            for n in range(N):
                w = wfc_ref[n, r0:r0 + rs, :].astype(jnp.float32)
                prod = m * w                                   # (rs, 128)
                # Fold rs rows into an (8,128) per-lane partial sum: pure
                # vreg-wise adds (VALU), cross-lane sum is deferred to finalize.
                psum = prod[0:8, :]
                for r in range(8, rs, 8):
                    psum = psum + prod[r:r + 8, :]
                a0 = (b * N + n) * 8
                acc_ref[a0:a0 + 8, :] += psum

    @pl.when(k == pl.num_programs(0) - 1)
    def _finalize():
        # One-time cross-lane/sublane reductions (B*N = 6 tiny XLU reduces),
        # bias from SMEM scalars, then numerically stable softmax.
        for b in range(B):
            for n in range(N):
                a0 = (b * N + n) * 8
                blk = acc_ref[a0:a0 + 8, :]                    # (8, 128)
                s = jnp.sum(blk, axis=1, keepdims=True)        # (8, 1)
                s = jnp.sum(s, axis=0, keepdims=True)          # (1, 1)
                logit_ref[b:b + 1, n:n + 1] = s + fb_ref[n]
        logits = logit_ref[...]                                # (B, N)
        mx = jnp.max(logits, axis=1, keepdims=True)
        e = jnp.exp(logits - mx)
        o_ref[...] = (e / jnp.sum(e, axis=1, keepdims=True)).astype(o_ref.dtype)


def _fused_forward(x, mask_w, mask_b, fc_w, fc_b, *, tk=TK):
    B, C, Hh, Ww = x.shape
    HW = Hh * Ww
    N = fc_w.shape[0]
    assert fc_w.shape[1] == HW, "fc in_features must equal H*W (1-channel mask)"
    tk = min(tk, HW)
    assert HW % tk == 0 and tk % 128 == 0
    rows_total = HW // 128
    rows_step = tk // 128
    assert rows_step % 8 == 0 and rows_step % min(RSUB, rows_step) == 0

    # Free reshapes of the contiguous trailing H*W axis: sublane/lane dense.
    x4 = x.reshape(B, C, rows_total, 128)            # (B, C, HW/128, 128) f32
    w3 = fc_w.reshape(N, rows_total, 128)            # (N, HW/128, 128) bf16

    return pl.pallas_call(
        fused_kernel,
        out_shape=jax.ShapeDtypeStruct((B, N), jnp.float32),
        grid_spec=pltpu.PrefetchScalarGridSpec(
            num_scalar_prefetch=0,
            grid=(HW // tk,),
            in_specs=[
                pl.BlockSpec(memory_space=pltpu.MemorySpace.SMEM),  # mask_w (C,)
                pl.BlockSpec(memory_space=pltpu.MemorySpace.SMEM),  # mask_b (1,)
                pl.BlockSpec(memory_space=pltpu.MemorySpace.SMEM),  # fc_b   (N,)
                pl.BlockSpec((B, C, rows_step, 128), lambda k: (0, 0, k, 0)),
                pl.BlockSpec((N, rows_step, 128), lambda k: (0, k, 0)),
            ],
            out_specs=pl.BlockSpec((B, N), lambda k: (0, 0)),
            scratch_shapes=[
                pltpu.VMEM((B * N * 8, 128), jnp.float32),  # per-lane acc
                pltpu.VMEM((B, N), jnp.float32),            # finalize logits
            ],
        ),
        compiler_params=pltpu.CompilerParams(
            dimension_semantics=("arbitrary",),   # single H*W reduction axis
        ),
    )(mask_w, mask_b, fc_b, x4, w3)


@jax.jit
def unet_classifier_forward(x, params):
    return _fused_forward(x, params["mask_w"], params["mask_b"],
                          params["fc_w"], params["fc_b"])


def init_params(key):
    k1, k2, k3 = jax.random.split(key, 3)
    return {
        # synthetic 1x1-conv mask stand-in: C -> 1 (scalars, kept in SMEM)
        "mask_w": jax.random.normal(k1, (IN_CH,), jnp.float32) * 0.5,
        "mask_b": jnp.zeros((1,), jnp.float32),
        # fc: Linear(2**16, num_classes), PyTorch layout [out, in].
        # Stored bf16 (halves the HBM weight stream); accumulation stays f32.
        "fc_w": (jax.random.normal(k2, (NUM_CLASSES, FC_IN), jnp.float32)
                 * 0.01).astype(jnp.bfloat16),
        "fc_b": jax.random.normal(k3, (NUM_CLASSES,), jnp.float32) * 0.01,
    }


if __name__ == "__main__":
    key = jax.random.PRNGKey(0)
    kx, kp = jax.random.split(key)
    B = 2
    # NCHW input; H=W=256 is forced by the module's fc input dim of 2**16.
    x = jax.random.normal(kx, (B, IN_CH, H, W), jnp.float32)
    params = init_params(kp)

    probs = unet_classifier_forward(x, params)
    probs = jax.block_until_ready(probs)

    # Pure-JAX reference of the same forward (stand-in mask -> fc -> softmax),
    # using the same bf16-stored weights upcast to f32 (as the kernel does).
    mw, mb = params["mask_w"], params["mask_b"]
    m_ref = jax.nn.sigmoid(
        mw[0] * x[:, 0] + mw[1] * x[:, 1] + mw[2] * x[:, 2] + mb[0])
    w_f32 = params["fc_w"].astype(jnp.float32)
    logits_ref = jnp.einsum(
        "bk,nk->bn", m_ref.reshape(B, -1), w_f32,
        precision=jax.lax.Precision.HIGHEST) + params["fc_b"]
    probs_ref = jax.nn.softmax(logits_ref, axis=1)

    assert probs.shape == (B, NUM_CLASSES)
    assert jnp.allclose(jnp.sum(probs, axis=1), 1.0, atol=1e-5)
    assert jnp.allclose(probs, probs_ref, atol=1e-3)
    print("KERNEL_OK")
</pallas_src>

<mosaic_0001>
module attributes {stable_mosaic.version = 11 : i64} {
  func.func @fused_kernel(%arg0: i32, %arg1: memref<3xf32, #tpu.memory_space<smem>>, %arg2: memref<1xf32, #tpu.memory_space<smem>>, %arg3: memref<3xf32, #tpu.memory_space<smem>>, %arg4: memref<2x3x256x128xf32, #tpu.memory_space<vmem>>, %arg5: memref<3x256x128xbf16, #tpu.memory_space<vmem>>, %arg6: memref<2x3xf32, #tpu.memory_space<vmem>>, %arg7: memref<48x128xf32, #tpu.memory_space<vmem>>, %arg8: memref<2x3xf32, #tpu.memory_space<vmem>>) attributes {dimension_semantics = [#tpu.dimension_semantics<arbitrary>], iteration_bounds = array<i64: 2>, scalar_prefetch = 0 : i64, scratch_operands = 2 : i64, tpu.core_type = #tpu.core_type<tc>, window_params = [{transform_indices = @transform_0, window_bounds = array<i64: 3>}, {transform_indices = @transform_1, window_bounds = array<i64: 1>}, {transform_indices = @transform_2, window_bounds = array<i64: 3>}, {transform_indices = @transform_3, window_bounds = array<i64: 2, 3, 256, 128>}, {transform_indices = @transform_4, window_bounds = array<i64: 3, 256, 128>}, {pipeline_mode = #tpu.pipeline_mode<synchronous>, transform_indices = @transform_5, window_bounds = array<i64: 2, 3>}]} {
    %c0_i32 = arith.constant 0 : i32
    %0 = arith.cmpi eq, %arg0, %c0_i32 : i32
    %1 = arith.extui %0 : i1 to i32
    %c0_i32_0 = arith.constant 0 : i32
    %2 = arith.cmpi ne, %1, %c0_i32_0 : i32
    scf.if %2 {
      %cst_287 = arith.constant 0.000000e+00 : f32
      %727 = vector.broadcast %cst_287 : f32 to vector<48x128xf32>
      %c0_288 = arith.constant 0 : index
      %c0_289 = arith.constant 0 : index
      %728 = vector.load %arg7[%c0_288, %c0_289] : memref<48x128xf32, #tpu.memory_space<vmem>>, vector<48x128xf32>
      tpu.vector_store %arg7[%c0_288, %c0_289], %727 {strides = array<i32>} : memref<48x128xf32, #tpu.memory_space<vmem>>, vector<48x128xf32>,
    } else {
    }
    %c0 = arith.constant 0 : index
    %3 = memref.load %arg2[%c0] : memref<1xf32, #tpu.memory_space<smem>>
    %c0_1 = arith.constant 0 : index
    %4 = memref.load %arg1[%c0_1] : memref<3xf32, #tpu.memory_space<smem>>
    %c0_2 = arith.constant 0 : index
    %c0_3 = arith.constant 0 : index
    %c0_4 = arith.constant 0 : index
    %c0_5 = arith.constant 0 : index
    %5 = vector.load %arg4[%c0_2, %c0_3, %c0_4, %c0_5] : memref<2x3x256x128xf32, #tpu.memory_space<vmem>>, vector<1x1x64x128xf32>
    %6 = vector.shape_cast %5 : vector<1x1x64x128xf32> to vector<64x128xf32>
    %7 = vector.broadcast %4 : f32 to vector<64x128xf32>
    %8 = arith.mulf %7, %6 : vector<64x128xf32>
    %9 = vector.broadcast %3 : f32 to vector<64x128xf32>
    %10 = arith.addf %8, %9 : vector<64x128xf32>
    %c1 = arith.constant 1 : index
    %11 = memref.load %arg1[%c1] : memref<3xf32, #tpu.memory_space<smem>>
    %c0_6 = arith.constant 0 : index
    %c1_7 = arith.constant 1 : index
    %c0_8 = arith.constant 0 : index
    %c0_9 = arith.constant 0 : index
    %12 = vector.load %arg4[%c0_6, %c1_7, %c0_8, %c0_9] : memref<2x3x256x128xf32, #tpu.memory_space<vmem>>, vector<1x1x64x128xf32>
    %13 = vector.shape_cast %12 : vector<1x1x64x128xf32> to vector<64x128xf32>
    %14 = vector.broadcast %11 : f32 to vector<64x128xf32>
    %15 = arith.mulf %14, %13 : vector<64x128xf32>
    %16 = arith.addf %10, %15 : vector<64x128xf32>
    %c2 = arith.constant 2 : index
    %17 = memref.load %arg1[%c2] : memref<3xf32, #tpu.memory_space<smem>>
    %c0_10 = arith.constant 0 : index
    %c2_11 = arith.constant 2 : index
    %c0_12 = arith.constant 0 : index
    %c0_13 = arith.constant 0 : index
    %18 = vector.load %arg4[%c0_10, %c2_11, %c0_12, %c0_13] : memref<2x3x256x128xf32, #tpu.memory_space<vmem>>, vector<1x1x64x128xf32>
    %19 = vector.shape_cast %18 : vector<1x1x64x128xf32> to vector<64x128xf32>
    %20 = vector.broadcast %17 : f32 to vector<64x128xf32>
    %21 = arith.mulf %20, %19 : vector<64x128xf32>
    %22 = arith.addf %16, %21 : vector<64x128xf32>
    %23 = arith.negf %22 : vector<64x128xf32>
    %24 = math.exp %23 : vector<64x128xf32>
    %cst = arith.constant 1.000000e+00 : f32
    %25 = vector.broadcast %cst : f32 to vector<64x128xf32>
    %26 = arith.addf %25, %24 : vector<64x128xf32>
    %27 = arith.divf %25, %26 : vector<64x128xf32>
    %c0_14 = arith.constant 0 : index
    %c0_15 = arith.constant 0 : index
    %c0_16 = arith.constant 0 : index
    %28 = vector.load %arg5[%c0_14, %c0_15, %c0_16] : memref<3x256x128xbf16, #tpu.memory_space<vmem>>, vector<1x64x128xbf16>
    %29 = vector.shape_cast %28 : vector<1x64x128xbf16> to vector<64x128xbf16>
    %30 = arith.extf %29 : vector<64x128xbf16> to vector<64x128xf32>
    %31 = arith.mulf %27, %30 : vector<64x128xf32>
    %32 = vector.extract_strided_slice %31 {offsets = [0, 0], sizes = [8, 128], strides = [1, 1]} : vector<64x128xf32> to vector<8x128xf32>
    %33 = vector.extract_strided_slice %31 {offsets = [8, 0], sizes = [8, 128], strides = [1, 1]} : vector<64x128xf32> to vector<8x128xf32>
    %34 = arith.addf %32, %33 : vector<8x128xf32>
    %35 = vector.extract_strided_slice %31 {offsets = [16, 0], sizes = [8, 128], strides = [1, 1]} : vector<64x128xf32> to vector<8x128xf32>
    %36 = arith.addf %34, %35 : vector<8x128xf32>
    %37 = vector.extract_strided_slice %31 {offsets = [24, 0], sizes = [8, 128], strides = [1, 1]} : vector<64x128xf32> to vector<8x128xf32>
    %38 = arith.addf %36, %37 : vector<8x128xf32>
    %39 = vector.extract_strided_slice %31 {offsets = [32, 0], sizes = [8, 128], strides = [1, 1]} : vector<64x128xf32> to vector<8x128xf32>
    %40 = arith.addf %38, %39 : vector<8x128xf32>
    %41 = vector.extract_strided_slice %31 {offsets = [40, 0], sizes = [8, 128], strides = [1, 1]} : vector<64x128xf32> to vector<8x128xf32>
    %42 = arith.addf %40, %41 : vector<8x128xf32>
    %43 = vector.extract_strided_slice %31 {offsets = [48, 0], sizes = [8, 128], strides = [1, 1]} : vector<64x128xf32> to vector<8x128xf32>
    %44 = arith.addf %42, %43 : vector<8x128xf32>
    %45 = vector.extract_strided_slice %31 {offsets = [56, 0], sizes = [8, 128], strides = [1, 1]} : vector<64x128xf32> to vector<8x128xf32>
    %46 = arith.addf %44, %45 : vector<8x128xf32>
    %c0_17 = arith.constant 0 : index
    %c0_18 = arith.constant 0 : index
    %47 = vector.load %arg7[%c0_17, %c0_18] : memref<48x128xf32, #tpu.memory_space<vmem>>, vector<8x128xf32>
    %48 = arith.addf %47, %46 : vector<8x128xf32>
    %c0_19 = arith.constant 0 : index
    %c0_20 = arith.constant 0 : index
    %49 = vector.load %arg7[%c0_19, %c0_20] : memref<48x128xf32, #tpu.memory_space<vmem>>, vector<8x128xf32>
    tpu.vector_store %arg7[%c0_19, %c0_20], %48 {strides = array<i32>} : memref<48x128xf32, #tpu.memory_space<vmem>>, vector<8x128xf32>,
    %c1_21 = arith.constant 1 : index
    %c0_22 = arith.constant 0 : index
    %c0_23 = arith.constant 0 : index
    %50 = vector.load %arg5[%c1_21, %c0_22, %c0_23] : memref<3x256x128xbf16, #tpu.memory_space<vmem>>, vector<1x64x128xbf16>
    %51 = vector.shape_cast %50 : vector<1x64x128xbf16> to vector<64x128xbf16>
    %52 = arith.extf %51 : vector<64x128xbf16> to vector<64x128xf32>
    %53 = arith.mulf %27, %52 : vector<64x128xf32>
    %54 = vector.extract_strided_slice %53 {offsets = [0, 0], sizes = [8, 128], strides = [1, 1]} : vector<64x128xf32> to vector<8x128xf32>
    %55 = vector.extract_strided_slice %53 {offsets = [8, 0], sizes = [8, 128], strides = [1, 1]} : vector<64x128xf32> to vector<8x128xf32>
    %56 = arith.addf %54, %55 : vector<8x128xf32>
    %57 = vector.extract_strided_slice %53 {offsets = [16, 0], sizes = [8, 128], strides = [1, 1]} : vector<64x128xf32> to vector<8x128xf32>
    %58 = arith.addf %56, %57 : vector<8x128xf32>
    %59 = vector.extract_strided_slice %53 {offsets = [24, 0], sizes = [8, 128], strides = [1, 1]} : vector<64x128xf32> to vector<8x128xf32>
    %60 = arith.addf %58, %59 : vector<8x128xf32>
    %61 = vector.extract_strided_slice %53 {offsets = [32, 0], sizes = [8, 128], strides = [1, 1]} : vector<64x128xf32> to vector<8x128xf32>
    %62 = arith.addf %60, %61 : vector<8x128xf32>
    %63 = vector.extract_strided_slice %53 {offsets = [40, 0], sizes = [8, 128], strides = [1, 1]} : vector<64x128xf32> to vector<8x128xf32>
    %64 = arith.addf %62, %63 : vector<8x128xf32>
    %65 = vector.extract_strided_slice %53 {offsets = [48, 0], sizes = [8, 128], strides = [1, 1]} : vector<64x128xf32> to vector<8x128xf32>
    %66 = arith.addf %64, %65 : vector<8x128xf32>
    %67 = vector.extract_strided_slice %53 {offsets = [56, 0], sizes = [8, 128], strides = [1, 1]} : vector<64x128xf32> to vector<8x128xf32>
    %68 = arith.addf %66, %67 : vector<8x128xf32>
    %c8 = arith.constant 8 : index
    %c0_24 = arith.constant 0 : index
    %69 = vector.load %arg7[%c8, %c0_24] : memref<48x128xf32, #tpu.memory_space<vmem>>, vector<8x128xf32>
    %70 = arith.addf %69, %68 : vector<8x128xf32>
    %c8_25 = arith.constant 8 : index
    %c0_26 = arith.constant 0 : index
    %71 = vector.load %arg7[%c8_25, %c0_26] : memref<48x128xf32, #tpu.memory_space<vmem>>, vector<8x128xf32>
    tpu.vector_store %arg7[%c8_25, %c0_26], %70 {strides = array<i32>} : memref<48x128xf32, #tpu.memory_space<vmem>>, vector<8x128xf32>,
    %c2_27 = arith.constant 2 : index
    %c0_28 = arith.constant 0 : index
    %c0_29 = arith.constant 0 : index
    %72 = vector.load %arg5[%c2_27, %c0_28, %c0_29] : memref<3x256x128xbf16, #tpu.memory_space<vmem>>, vector<1x64x128xbf16>
    %73 = vector.shape_cast %72 : vector<1x64x128xbf16> to vector<64x128xbf16>
    %74 = arith.extf %73 : vector<64x128xbf16> to vector<64x128xf32>
    %75 = arith.mulf %27, %74 : vector<64x128xf32>
    %76 = vector.extract_strided_slice %75 {offsets = [0, 0], sizes = [8, 128], strides = [1, 1]} : vector<64x128xf32> to vector<8x128xf32>
    %77 = vector.extract_strided_slice %75 {offsets = [8, 0], sizes = [8, 128], strides = [1, 1]} : vector<64x128xf32> to vector<8x128xf32>
    %78 = arith.addf %76, %77 : vector<8x128xf32>
    %79 = vector.extract_strided_slice %75 {offsets = [16, 0], sizes = [8, 128], strides = [1, 1]} : vector<64x128xf32> to vector<8x128xf32>
    %80 = arith.addf %78, %79 : vector<8x128xf32>
    %81 = vector.extract_strided_slice %75 {offsets = [24, 0], sizes = [8, 128], strides = [1, 1]} : vector<64x128xf32> to vector<8x128xf32>
    %82 = arith.addf %80, %81 : vector<8x128xf32>
    %83 = vector.extract_strided_slice %75 {offsets = [32, 0], sizes = [8, 128], strides = [1, 1]} : vector<64x128xf32> to vector<8x128xf32>
    %84 = arith.addf %82, %83 : vector<8x128xf32>
    %85 = vector.extract_strided_slice %75 {offsets = [40, 0], sizes = [8, 128], strides = [1, 1]} : vector<64x128xf32> to vector<8x128xf32>
    %86 = arith.addf %84, %85 : vector<8x128xf32>
    %87 = vector.extract_strided_slice %75 {offsets = [48, 0], sizes = [8, 128], strides = [1, 1]} : vector<64x128xf32> to vector<8x128xf32>
    %88 = arith.addf %86, %87 : vector<8x128xf32>
    %89 = vector.extract_strided_slice %75 {offsets = [56, 0], sizes = [8, 128], strides = [1, 1]} : vector<64x128xf32> to vector<8x128xf32>
    %90 = arith.addf %88, %89 : vector<8x128xf32>
    %c16 = arith.constant 16 : index
    %c0_30 = arith.constant 0 : index
    %91 = vector.load %arg7[%c16, %c0_30] : memref<48x128xf32, #tpu.memory_space<vmem>>, vector<8x128xf32>
    %92 = arith.addf %91, %90 : vector<8x128xf32>
    %c16_31 = arith.constant 16 : index
    %c0_32 = arith.constant 0 : index
    %93 = vector.load %arg7[%c16_31, %c0_32] : memref<48x128xf32, #tpu.memory_space<vmem>>, vector<8x128xf32>
    tpu.vector_store %arg7[%c16_31, %c0_32], %92 {strides = array<i32>} : memref<48x128xf32, #tpu.memory_space<vmem>>, vector<8x128xf32>,
    %c0_33 = arith.constant 0 : index
    %94 = memref.load %arg1[%c0_33] : memref<3xf32, #tpu.memory_space<smem>>
    %c1_34 = arith.constant 1 : index
    %c0_35 = arith.constant 0 : index
    %c0_36 = arith.constant 0 : index
    %c0_37 = arith.constant 0 : index
    %95 = vector.load %arg4[%c1_34, %c0_35, %c0_36, %c0_37] : memref<2x3x256x128xf32, #tpu.memory_space<vmem>>, vector<1x1x64x128xf32>
    %96 = vector.shape_cast %95 : vector<1x1x64x128xf32> to vector<64x128xf32>
    %97 = vector.broadcast %94 : f32 to vector<64x128xf32>
    %98 = arith.mulf %97, %96 : vector<64x128xf32>
    %99 = vector.broadcast %3 : f32 to vector<64x128xf32>
    %100 = arith.addf %98, %99 : vector<64x128xf32>
    %c1_38 = arith.constant 1 : index
    %101 = memref.load %arg1[%c1_38] : memref<3xf32, #tpu.memory_space<smem>>
    %c1_39 = arith.constant 1 : index
    %c1_40 = arith.constant 1 : index
    %c0_41 = arith.constant 0 : index
    %c0_42 = arith.constant 0 : index
    %102 = vector.load %arg4[%c1_39, %c1_40, %c0_41, %c0_42] : memref<2x3x256x128xf32, #tpu.memory_space<vmem>>, vector<1x1x64x128xf32>
    %103 = vector.shape_cast %102 : vector<1x1x64x128xf32> to vector<64x128xf32>
    %104 = vector.broadcast %101 : f32 to vector<64x128xf32>
    %105 = arith.mulf %104, %103 : vector<64x128xf32>
    %106 = arith.addf %100, %105 : vector<64x128xf32>
    %c2_43 = arith.constant 2 : index
    %107 = memref.load %arg1[%c2_43] : memref<3xf32, #tpu.memory_space<smem>>
    %c1_44 = arith.constant 1 : index
    %c2_45 = arith.constant 2 : index
    %c0_46 = arith.constant 0 : index
    %c0_47 = arith.constant 0 : index
    %108 = vector.load %arg4[%c1_44, %c2_45, %c0_46, %c0_47] : memref<2x3x256x128xf32, #tpu.memory_space<vmem>>, vector<1x1x64x128xf32>
    %109 = vector.shape_cast %108 : vector<1x1x64x128xf32> to vector<64x128xf32>
    %110 = vector.broadcast %107 : f32 to vector<64x128xf32>
    %111 = arith.mulf %110, %109 : vector<64x128xf32>
    %112 = arith.addf %106, %111 : vector<64x128xf32>
    %113 = arith.negf %112 : vector<64x128xf32>
    %114 = math.exp %113 : vector<64x128xf32>
    %cst_48 = arith.constant 1.000000e+00 : f32
    %115 = vector.broadcast %cst_48 : f32 to vector<64x128xf32>
    %116 = arith.addf %115, %114 : vector<64x128xf32>
    %117 = arith.divf %115, %116 : vector<64x128xf32>
    %c0_49 = arith.constant 0 : index
    %c0_50 = arith.constant 0 : index
    %c0_51 = arith.constant 0 : index
    %118 = vector.load %arg5[%c0_49, %c0_50, %c0_51] : memref<3x256x128xbf16, #tpu.memory_space<vmem>>, vector<1x64x128xbf16>
    %119 = vector.shape_cast %118 : vector<1x64x128xbf16> to vector<64x128xbf16>
    %120 = arith.extf %119 : vector<64x128xbf16> to vector<64x128xf32>
    %121 = arith.mulf %117, %120 : vector<64x128xf32>
    %122 = vector.extract_strided_slice %121 {offsets = [0, 0], sizes = [8, 128], strides = [1, 1]} : vector<64x128xf32> to vector<8x128xf32>
    %123 = vector.extract_strided_slice %121 {offsets = [8, 0], sizes = [8, 128], strides = [1, 1]} : vector<64x128xf32> to vector<8x128xf32>
    %124 = arith.addf %122, %123 : vector<8x128xf32>
    %125 = vector.extract_strided_slice %121 {offsets = [16, 0], sizes = [8, 128], strides = [1, 1]} : vector<64x128xf32> to vector<8x128xf32>
    %126 = arith.addf %124, %125 : vector<8x128xf32>
    %127 = vector.extract_strided_slice %121 {offsets = [24, 0], sizes = [8, 128], strides = [1, 1]} : vector<64x128xf32> to vector<8x128xf32>
    %128 = arith.addf %126, %127 : vector<8x128xf32>
    %129 = vector.extract_strided_slice %121 {offsets = [32, 0], sizes = [8, 128], strides = [1, 1]} : vector<64x128xf32> to vector<8x128xf32>
    %130 = arith.addf %128, %129 : vector<8x128xf32>
    %131 = vector.extract_strided_slice %121 {offsets = [40, 0], sizes = [8, 128], strides = [1, 1]} : vector<64x128xf32> to vector<8x128xf32>
    %132 = arith.addf %130, %131 : vector<8x128xf32>
    %133 = vector.extract_strided_slice %121 {offsets = [48, 0], sizes = [8, 128], strides = [1, 1]} : vector<64x128xf32> to vector<8x128xf32>
    %134 = arith.addf %132, %133 : vector<8x128xf32>
    %135 = vector.extract_strided_slice %121 {offsets = [56, 0], sizes = [8, 128], strides = [1, 1]} : vector<64x128xf32> to vector<8x128xf32>
    %136 = arith.addf %134, %135 : vector<8x128xf32>
    %c24 = arith.constant 24 : index
    %c0_52 = arith.constant 0 : index
    %137 = vector.load %arg7[%c24, %c0_52] : memref<48x128xf32, #tpu.memory_space<vmem>>, vector<8x128xf32>
    %138 = arith.addf %137, %136 : vector<8x128xf32>
    %c24_53 = arith.constant 24 : index
    %c0_54 = arith.constant 0 : index
    %139 = vector.load %arg7[%c24_53, %c0_54] : memref<48x128xf32, #tpu.memory_space<vmem>>, vector<8x128xf32>
    tpu.vector_store %arg7[%c24_53, %c0_54], %138 {strides = array<i32>} : memref<48x128xf32, #tpu.memory_space<vmem>>, vector<8x128xf32>,
    %c1_55 = arith.constant 1 : index
    %c0_56 = arith.constant 0 : index
    %c0_57 = arith.constant 0 : index
    %140 = vector.load %arg5[%c1_55, %c0_56, %c0_57] : memref<3x256x128xbf16, #tpu.memory_space<vmem>>, vector<1x64x128xbf16>
    %141 = vector.shape_cast %140 : vector<1x64x128xbf16> to vector<64x128xbf16>
    %142 = arith.extf %141 : vector<64x128xbf16> to vector<64x128xf32>
    %143 = arith.mulf %117, %142 : vector<64x128xf32>
    %144 = vector.extract_strided_slice %143 {offsets = [0, 0], sizes = [8, 128], strides = [1, 1]} : vector<64x128xf32> to vector<8x128xf32>
    %145 = vector.extract_strided_slice %143 {offsets = [8, 0], sizes = [8, 128], strides = [1, 1]} : vector<64x128xf32> to vector<8x128xf32>
    %146 = arith.addf %144, %145 : vector<8x128xf32>
    %147 = vector.extract_strided_slice %143 {offsets = [16, 0], sizes = [8, 128], strides = [1, 1]} : vector<64x128xf32> to vector<8x128xf32>
    %148 = arith.addf %146, %147 : vector<8x128xf32>
    %149 = vector.extract_strided_slice %143 {offsets = [24, 0], sizes = [8, 128], strides = [1, 1]} : vector<64x128xf32> to vector<8x128xf32>
    %150 = arith.addf %148, %149 : vector<8x128xf32>
    %151 = vector.extract_strided_slice %143 {offsets = [32, 0], sizes = [8, 128], strides = [1, 1]} : vector<64x128xf32> to vector<8x128xf32>
    %152 = arith.addf %150, %151 : vector<8x128xf32>
    %153 = vector.extract_strided_slice %143 {offsets = [40, 0], sizes = [8, 128], strides = [1, 1]} : vector<64x128xf32> to vector<8x128xf32>
    %154 = arith.addf %152, %153 : vector<8x128xf32>
    %155 = vector.extract_strided_slice %143 {offsets = [48, 0], sizes = [8, 128], strides = [1, 1]} : vector<64x128xf32> to vector<8x128xf32>
    %156 = arith.addf %154, %155 : vector<8x128xf32>
    %157 = vector.extract_strided_slice %143 {offsets = [56, 0], sizes = [8, 128], strides = [1, 1]} : vector<64x128xf32> to vector<8x128xf32>
    %158 = arith.addf %156, %157 : vector<8x128xf32>
    %c32 = arith.constant 32 : index
    %c0_58 = arith.constant 0 : index
    %159 = vector.load %arg7[%c32, %c0_58] : memref<48x128xf32, #tpu.memory_space<vmem>>, vector<8x128xf32>
    %160 = arith.addf %159, %158 : vector<8x128xf32>
    %c32_59 = arith.constant 32 : index
    %c0_60 = arith.constant 0 : index
    %161 = vector.load %arg7[%c32_59, %c0_60] : memref<48x128xf32, #tpu.memory_space<vmem>>, vector<8x128xf32>
    tpu.vector_store %arg7[%c32_59, %c0_60], %160 {strides = array<i32>} : memref<48x128xf32, #tpu.memory_space<vmem>>, vector<8x128xf32>,
    %c2_61 = arith.constant 2 : index
    %c0_62 = arith.constant 0 : index
    %c0_63 = arith.constant 0 : index
    %162 = vector.load %arg5[%c2_61, %c0_62, %c0_63] : memref<3x256x128xbf16, #tpu.memory_space<vmem>>, vector<1x64x128xbf16>
    %163 = vector.shape_cast %162 : vector<1x64x128xbf16> to vector<64x128xbf16>
    %164 = arith.extf %163 : vector<64x128xbf16> to vector<64x128xf32>
    %165 = arith.mulf %117, %164 : vector<64x128xf32>
    %166 = vector.extract_strided_slice %165 {offsets = [0, 0], sizes = [8, 128], strides = [1, 1]} : vector<64x128xf32> to vector<8x128xf32>
    %167 = vector.extract_strided_slice %165 {offsets = [8, 0], sizes = [8, 128], strides = [1, 1]} : vector<64x128xf32> to vector<8x128xf32>
    %168 = arith.addf %166, %167 : vector<8x128xf32>
    %169 = vector.extract_strided_slice %165 {offsets = [16, 0], sizes = [8, 128], strides = [1, 1]} : vector<64x128xf32> to vector<8x128xf32>
    %170 = arith.addf %168, %169 : vector<8x128xf32>
    %171 = vector.extract_strided_slice %165 {offsets = [24, 0], sizes = [8, 128], strides = [1, 1]} : vector<64x128xf32> to vector<8x128xf32>
    %172 = arith.addf %170, %171 : vector<8x128xf32>
    %173 = vector.extract_strided_slice %165 {offsets = [32, 0], sizes = [8, 128], strides = [1, 1]} : vector<64x128xf32> to vector<8x128xf32>
    %174 = arith.addf %172, %173 : vector<8x128xf32>
    %175 = vector.extract_strided_slice %165 {offsets = [40, 0], sizes = [8, 128], strides = [1, 1]} : vector<64x128xf32> to vector<8x128xf32>
    %176 = arith.addf %174, %175 : vector<8x128xf32>
    %177 = vector.extract_strided_slice %165 {offsets = [48, 0], sizes = [8, 128], strides = [1, 1]} : vector<64x128xf32> to vector<8x128xf32>
    %178 = arith.addf %176, %177 : vector<8x128xf32>
    %179 = vector.extract_strided_slice %165 {offsets = [56, 0], sizes = [8, 128], strides = [1, 1]} : vector<64x128xf32> to vector<8x128xf32>
    %180 = arith.addf %178, %179 : vector<8x128xf32>
    %c40 = arith.constant 40 : index
    %c0_64 = arith.constant 0 : index
    %181 = vector.load %arg7[%c40, %c0_64] : memref<48x128xf32, #tpu.memory_space<vmem>>, vector<8x128xf32>
    %182 = arith.addf %181, %180 : vector<8x128xf32>
    %c40_65 = arith.constant 40 : index
    %c0_66 = arith.constant 0 : index
    %183 = vector.load %arg7[%c40_65, %c0_66] : memref<48x128xf32, #tpu.memory_space<vmem>>, vector<8x128xf32>
    tpu.vector_store %arg7[%c40_65, %c0_66], %182 {strides = array<i32>} : memref<48x128xf32, #tpu.memory_space<vmem>>, vector<8x128xf32>,
    %c0_67 = arith.constant 0 : index
    %184 = memref.load %arg1[%c0_67] : memref<3xf32, #tpu.memory_space<smem>>
    %c0_68 = arith.constant 0 : index
    %c0_69 = arith.constant 0 : index
    %c64 = arith.constant 64 : index
    %c0_70 = arith.constant 0 : index
    %185 = vector.load %arg4[%c0_68, %c0_69, %c64, %c0_70] : memref<2x3x256x128xf32, #tpu.memory_space<vmem>>, vector<1x1x64x128xf32>
    %186 = vector.shape_cast %185 : vector<1x1x64x128xf32> to vector<64x128xf32>
    %187 = vector.broadcast %184 : f32 to vector<64x128xf32>
    %188 = arith.mulf %187, %186 : vector<64x128xf32>
    %189 = vector.broadcast %3 : f32 to vector<64x128xf32>
    %190 = arith.addf %188, %189 : vector<64x128xf32>
    %c1_71 = arith.constant 1 : index
    %191 = memref.load %arg1[%c1_71] : memref<3xf32, #tpu.memory_space<smem>>
    %c0_72 = arith.constant 0 : index
    %c1_73 = arith.constant 1 : index
    %c64_74 = arith.constant 64 : index
    %c0_75 = arith.constant 0 : index
    %192 = vector.load %arg4[%c0_72, %c1_73, %c64_74, %c0_75] : memref<2x3x256x128xf32, #tpu.memory_space<vmem>>, vector<1x1x64x128xf32>
    %193 = vector.shape_cast %192 : vector<1x1x64x128xf32> to vector<64x128xf32>
    %194 = vector.broadcast %191 : f32 to vector<64x128xf32>
    %195 = arith.mulf %194, %193 : vector<64x128xf32>
    %196 = arith.addf %190, %195 : vector<64x128xf32>
    %c2_76 = arith.constant 2 : index
    %197 = memref.load %arg1[%c2_76] : memref<3xf32, #tpu.memory_space<smem>>
    %c0_77 = arith.constant 0 : index
    %c2_78 = arith.constant 2 : index
    %c64_79 = arith.constant 64 : index
    %c0_80 = arith.constant 0 : index
    %198 = vector.load %arg4[%c0_77, %c2_78, %c64_79, %c0_80] : memref<2x3x256x128xf32, #tpu.memory_space<vmem>>, vector<1x1x64x128xf32>
    %199 = vector.shape_cast %198 : vector<1x1x64x128xf32> to vector<64x128xf32>
    %200 = vector.broadcast %197 : f32 to vector<64x128xf32>
    %201 = arith.mulf %200, %199 : vector<64x128xf32>
    %202 = arith.addf %196, %201 : vector<64x128xf32>
    %203 = arith.negf %202 : vector<64x128xf32>
    %204 = math.exp %203 : vector<64x128xf32>
    %cst_81 = arith.constant 1.000000e+00 : f32
    %205 = vector.broadcast %cst_81 : f32 to vector<64x128xf32>
    %206 = arith.addf %205, %204 : vector<64x128xf32>
    %207 = arith.divf %205, %206 : vector<64x128xf32>
    %c0_82 = arith.constant 0 : index
    %c64_83 = arith.constant 64 : index
    %c0_84 = arith.constant 0 : index
    %208 = vector.load %arg5[%c0_82, %c64_83, %c0_84] : memref<3x256x128xbf16, #tpu.memory_space<vmem>>, vector<1x64x128xbf16>
    %209 = vector.shape_cast %208 : vector<1x64x128xbf16> to vector<64x128xbf16>
    %210 = arith.extf %209 : vector<64x128xbf16> to vector<64x128xf32>
    %211 = arith.mulf %207, %210 : vector<64x128xf32>
    %212 = vector.extract_strided_slice %211 {offsets = [0, 0], sizes = [8, 128], strides = [1, 1]} : vector<64x128xf32> to vector<8x128xf32>
    %213 = vector.extract_strided_slice %211 {offsets = [8, 0], sizes = [8, 128], strides = [1, 1]} : vector<64x128xf32> to vector<8x128xf32>
    %214 = arith.addf %212, %213 : vector<8x128xf32>
    %215 = vector.extract_strided_slice %211 {offsets = [16, 0], sizes = [8, 128], strides = [1, 1]} : vector<64x128xf32> to vector<8x128xf32>
    %216 = arith.addf %214, %215 : vector<8x128xf32>
    %217 = vector.extract_strided_slice %211 {offsets = [24, 0], sizes = [8, 128], strides = [1, 1]} : vector<64x128xf32> to vector<8x128xf32>
    %218 = arith.addf %216, %217 : vector<8x128xf32>
    %219 = vector.extract_strided_slice %211 {offsets = [32, 0], sizes = [8, 128], strides = [1, 1]} : vector<64x128xf32> to vector<8x128xf32>
    %220 = arith.addf %218, %219 : vector<8x128xf32>
    %221 = vector.extract_strided_slice %211 {offsets = [40, 0], sizes = [8, 128], strides = [1, 1]} : vector<64x128xf32> to vector<8x128xf32>
    %222 = arith.addf %220, %221 : vector<8x128xf32>
    %223 = vector.extract_strided_slice %211 {offsets = [48, 0], sizes = [8, 128], strides = [1, 1]} : vector<64x128xf32> to vector<8x128xf32>
    %224 = arith.addf %222, %223 : vector<8x128xf32>
    %225 = vector.extract_strided_slice %211 {offsets = [56, 0], sizes = [8, 128], strides = [1, 1]} : vector<64x128xf32> to vector<8x128xf32>
    %226 = arith.addf %224, %225 : vector<8x128xf32>
    %c0_85 = arith.constant 0 : index
    %c0_86 = arith.constant 0 : index
    %227 = vector.load %arg7[%c0_85, %c0_86] : memref<48x128xf32, #tpu.memory_space<vmem>>, vector<8x128xf32>
    %228 = arith.addf %227, %226 : vector<8x128xf32>
    %c0_87 = arith.constant 0 : index
    %c0_88 = arith.constant 0 : index
    %229 = vector.load %arg7[%c0_87, %c0_88] : memref<48x128xf32, #tpu.memory_space<vmem>>, vector<8x128xf32>
    tpu.vector_store %arg7[%c0_87, %c0_88], %228 {strides = array<i32>} : memref<48x128xf32, #tpu.memory_space<vmem>>, vector<8x128xf32>,
    %c1_89 = arith.constant 1 : index
    %c64_90 = arith.constant 64 : index
    %c0_91 = arith.constant 0 : index
    %230 = vector.load %arg5[%c1_89, %c64_90, %c0_91] : memref<3x256x128xbf16, #tpu.memory_space<vmem>>, vector<1x64x128xbf16>
    %231 = vector.shape_cast %230 : vector<1x64x128xbf16> to vector<64x128xbf16>
    %232 = arith.extf %231 : vector<64x128xbf16> to vector<64x128xf32>
    %233 = arith.mulf %207, %232 : vector<64x128xf32>
    %234 = vector.extract_strided_slice %233 {offsets = [0, 0], sizes = [8, 128], strides = [1, 1]} : vector<64x128xf32> to vector<8x128xf32>
    %235 = vector.extract_strided_slice %233 {offsets = [8, 0], sizes = [8, 128], strides = [1, 1]} : vector<64x128xf32> to vector<8x128xf32>
    %236 = arith.addf %234, %235 : vector<8x128xf32>
    %237 = vector.extract_strided_slice %233 {offsets = [16, 0], sizes = [8, 128], strides = [1, 1]} : vector<64x128xf32> to vector<8x128xf32>
    %238 = arith.addf %236, %237 : vector<8x128xf32>
    %239 = vector.extract_strided_slice %233 {offsets = [24, 0], sizes = [8, 128], strides = [1, 1]} : vector<64x128xf32> to vector<8x128xf32>
    %240 = arith.addf %238, %239 : vector<8x128xf32>
    %241 = vector.extract_strided_slice %233 {offsets = [32, 0], sizes = [8, 128], strides = [1, 1]} : vector<64x128xf32> to vector<8x128xf32>
    %242 = arith.addf %240, %241 : vector<8x128xf32>
    %243 = vector.extract_strided_slice %233 {offsets = [40, 0], sizes = [8, 128], strides = [1, 1]} : vector<64x128xf32> to vector<8x128xf32>
    %244 = arith.addf %242, %243 : vector<8x128xf32>
    %245 = vector.extract_strided_slice %233 {offsets = [48, 0], sizes = [8, 128], strides = [1, 1]} : vector<64x128xf32> to vector<8x128xf32>
    %246 = arith.addf %244, %245 : vector<8x128xf32>
    %247 = vector.extract_strided_slice %233 {offsets = [56, 0], sizes = [8, 128], strides = [1, 1]} : vector<64x128xf32> to vector<8x128xf32>
    %248 = arith.addf %246, %247 : vector<8x128xf32>
    %c8_92 = arith.constant 8 : index
    %c0_93 = arith.constant 0 : index
    %249 = vector.load %arg7[%c8_92, %c0_93] : memref<48x128xf32, #tpu.memory_space<vmem>>, vector<8x128xf32>
    %250 = arith.addf %249, %248 : vector<8x128xf32>
    %c8_94 = arith.constant 8 : index
    %c0_95 = arith.constant 0 : index
    %251 = vector.load %arg7[%c8_94, %c0_95] : memref<48x128xf32, #tpu.memory_space<vmem>>, vector<8x128xf32>
    tpu.vector_store %arg7[%c8_94, %c0_95], %250 {strides = array<i32>} : memref<48x128xf32, #tpu.memory_space<vmem>>, vector<8x128xf32>,
    %c2_96 = arith.constant 2 : index
    %c64_97 = arith.constant 64 : index
    %c0_98 = arith.constant 0 : index
    %252 = vector.load %arg5[%c2_96, %c64_97, %c0_98] : memref<3x256x128xbf16, #tpu.memory_space<vmem>>, vector<1x64x128xbf16>
    %253 = vector.shape_cast %252 : vector<1x64x128xbf16> to vector<64x128xbf16>
    %254 = arith.extf %253 : vector<64x128xbf16> to vector<64x128xf32>
    %255 = arith.mulf %207, %254 : vector<64x128xf32>
    %256 = vector.extract_strided_slice %255 {offsets = [0, 0], sizes = [8, 128], strides = [1, 1]} : vector<64x128xf32> to vector<8x128xf32>
    %257 = vector.extract_strided_slice %255 {offsets = [8, 0], sizes = [8, 128], strides = [1, 1]} : vector<64x128xf32> to vector<8x128xf32>
    %258 = arith.addf %256, %257 : vector<8x128xf32>
    %259 = vector.extract_strided_slice %255 {offsets = [16, 0], sizes = [8, 128], strides = [1, 1]} : vector<64x128xf32> to vector<8x128xf32>
    %260 = arith.addf %258, %259 : vector<8x128xf32>
    %261 = vector.extract_strided_slice %255 {offsets = [24, 0], sizes = [8, 128], strides = [1, 1]} : vector<64x128xf32> to vector<8x128xf32>
    %262 = arith.addf %260, %261 : vector<8x128xf32>
    %263 = vector.extract_strided_slice %255 {offsets = [32, 0], sizes = [8, 128], strides = [1, 1]} : vector<64x128xf32> to vector<8x128xf32>
    %264 = arith.addf %262, %263 : vector<8x128xf32>
    %265 = vector.extract_strided_slice %255 {offsets = [40, 0], sizes = [8, 128], strides = [1, 1]} : vector<64x128xf32> to vector<8x128xf32>
    %266 = arith.addf %264, %265 : vector<8x128xf32>
    %267 = vector.extract_strided_slice %255 {offsets = [48, 0], sizes = [8, 128], strides = [1, 1]} : vector<64x128xf32> to vector<8x128xf32>
    %268 = arith.addf %266, %267 : vector<8x128xf32>
    %269 = vector.extract_strided_slice %255 {offsets = [56, 0], sizes = [8, 128], strides = [1, 1]} : vector<64x128xf32> to vector<8x128xf32>
    %270 = arith.addf %268, %269 : vector<8x128xf32>
    %c16_99 = arith.constant 16 : index
    %c0_100 = arith.constant 0 : index
    %271 = vector.load %arg7[%c16_99, %c0_100] : memref<48x128xf32, #tpu.memory_space<vmem>>, vector<8x128xf32>
    %272 = arith.addf %271, %270 : vector<8x128xf32>
    %c16_101 = arith.constant 16 : index
    %c0_102 = arith.constant 0 : index
    %273 = vector.load %arg7[%c16_101, %c0_102] : memref<48x128xf32, #tpu.memory_space<vmem>>, vector<8x128xf32>
    tpu.vector_store %arg7[%c16_101, %c0_102], %272 {strides = array<i32>} : memref<48x128xf32, #tpu.memory_space<vmem>>, vector<8x128xf32>,
    %c0_103 = arith.constant 0 : index
    %274 = memref.load %arg1[%c0_103] : memref<3xf32, #tpu.memory_space<smem>>
    %c1_104 = arith.constant 1 : index
    %c0_105 = arith.constant 0 : index
    %c64_106 = arith.constant 64 : index
    %c0_107 = arith.constant 0 : index
    %275 = vector.load %arg4[%c1_104, %c0_105, %c64_106, %c0_107] : memref<2x3x256x128xf32, #tpu.memory_space<vmem>>, vector<1x1x64x128xf32>
    %276 = vector.shape_cast %275 : vector<1x1x64x128xf32> to vector<64x128xf32>
    %277 = vector.broadcast %274 : f32 to vector<64x128xf32>
    %278 = arith.mulf %277, %276 : vector<64x128xf32>
    %279 = vector.broadcast %3 : f32 to vector<64x128xf32>
    %280 = arith.addf %278, %279 : vector<64x128xf32>
    %c1_108 = arith.constant 1 : index
    %281 = memref.load %arg1[%c1_108] : memref<3xf32, #tpu.memory_space<smem>>
    %c1_109 = arith.constant 1 : index
    %c1_110 = arith.constant 1 : index
    %c64_111 = arith.constant 64 : index
    %c0_112 = arith.constant 0 : index
    %282 = vector.load %arg4[%c1_109, %c1_110, %c64_111, %c0_112] : memref<2x3x256x128xf32, #tpu.memory_space<vmem>>, vector<1x1x64x128xf32>
    %283 = vector.shape_cast %282 : vector<1x1x64x128xf32> to vector<64x128xf32>
    %284 = vector.broadcast %281 : f32 to vector<64x128xf32>
    %285 = arith.mulf %284, %283 : vector<64x128xf32>
    %286 = arith.addf %280, %285 : vector<64x128xf32>
    %c2_113 = arith.constant 2 : index
    %287 = memref.load %arg1[%c2_113] : memref<3xf32, #tpu.memory_space<smem>>
    %c1_114 = arith.constant 1 : index
    %c2_115 = arith.constant 2 : index
    %c64_116 = arith.constant 64 : index
    %c0_117 = arith.constant 0 : index
    %288 = vector.load %arg4[%c1_114, %c2_115, %c64_116, %c0_117] : memref<2x3x256x128xf32, #tpu.memory_space<vmem>>, vector<1x1x64x128xf32>
    %289 = vector.shape_cast %288 : vector<1x1x64x128xf32> to vector<64x128xf32>
    %290 = vector.broadcast %287 : f32 to vector<64x128xf32>
    %291 = arith.mulf %290, %289 : vector<64x128xf32>
    %292 = arith.addf %286, %291 : vector<64x128xf32>
    %293 = arith.negf %292 : vector<64x128xf32>
    %294 = math.exp %293 : vector<64x128xf32>
    %cst_118 = arith.constant 1.000000e+00 : f32
    %295 = vector.broadcast %cst_118 : f32 to vector<64x128xf32>
    %296 = arith.addf %295, %294 : vector<64x128xf32>
    %297 = arith.divf %295, %296 : vector<64x128xf32>
    %c0_119 = arith.constant 0 : index
    %c64_120 = arith.constant 64 : index
    %c0_121 = arith.constant 0 : index
    %298 = vector.load %arg5[%c0_119, %c64_120, %c0_121] : memref<3x256x128xbf16, #tpu.memory_space<vmem>>, vector<1x64x128xbf16>
    %299 = vector.shape_cast %298 : vector<1x64x128xbf16> to vector<64x128xbf16>
    %300 = arith.extf %299 : vector<64x128xbf16> to vector<64x128xf32>
    %301 = arith.mulf %297, %300 : vector<64x128xf32>
    %302 = vector.extract_strided_slice %301 {offsets = [0, 0], sizes = [8, 128], strides = [1, 1]} : vector<64x128xf32> to vector<8x128xf32>
    %303 = vector.extract_strided_slice %301 {offsets = [8, 0], sizes = [8, 128], strides = [1, 1]} : vector<64x128xf32> to vector<8x128xf32>
    %304 = arith.addf %302, %303 : vector<8x128xf32>
    %305 = vector.extract_strided_slice %301 {offsets = [16, 0], sizes = [8, 128], strides = [1, 1]} : vector<64x128xf32> to vector<8x128xf32>
    %306 = arith.addf %304, %305 : vector<8x128xf32>
    %307 = vector.extract_strided_slice %301 {offsets = [24, 0], sizes = [8, 128], strides = [1, 1]} : vector<64x128xf32> to vector<8x128xf32>
    %308 = arith.addf %306, %307 : vector<8x128xf32>
    %309 = vector.extract_strided_slice %301 {offsets = [32, 0], sizes = [8, 128], strides = [1, 1]} : vector<64x128xf32> to vector<8x128xf32>
    %310 = arith.addf %308, %309 : vector<8x128xf32>
    %311 = vector.extract_strided_slice %301 {offsets = [40, 0], sizes = [8, 128], strides = [1, 1]} : vector<64x128xf32> to vector<8x128xf32>
    %312 = arith.addf %310, %311 : vector<8x128xf32>
    %313 = vector.extract_strided_slice %301 {offsets = [48, 0], sizes = [8, 128], strides = [1, 1]} : vector<64x128xf32> to vector<8x128xf32>
    %314 = arith.addf %312, %313 : vector<8x128xf32>
    %315 = vector.extract_strided_slice %301 {offsets = [56, 0], sizes = [8, 128], strides = [1, 1]} : vector<64x128xf32> to vector<8x128xf32>
    %316 = arith.addf %314, %315 : vector<8x128xf32>
    %c24_122 = arith.constant 24 : index
    %c0_123 = arith.constant 0 : index
    %317 = vector.load %arg7[%c24_122, %c0_123] : memref<48x128xf32, #tpu.memory_space<vmem>>, vector<8x128xf32>
    %318 = arith.addf %317, %316 : vector<8x128xf32>
    %c24_124 = arith.constant 24 : index
    %c0_125 = arith.constant 0 : index
    %319 = vector.load %arg7[%c24_124, %c0_125] : memref<48x128xf32, #tpu.memory_space<vmem>>, vector<8x128xf32>
    tpu.vector_store %arg7[%c24_124, %c0_125], %318 {strides = array<i32>} : memref<48x128xf32, #tpu.memory_space<vmem>>, vector<8x128xf32>,
    %c1_126 = arith.constant 1 : index
    %c64_127 = arith.constant 64 : index
    %c0_128 = arith.constant 0 : index
    %320 = vector.load %arg5[%c1_126, %c64_127, %c0_128] : memref<3x256x128xbf16, #tpu.memory_space<vmem>>, vector<1x64x128xbf16>
    %321 = vector.shape_cast %320 : vector<1x64x128xbf16> to vector<64x128xbf16>
    %322 = arith.extf %321 : vector<64x128xbf16> to vector<64x128xf32>
    %323 = arith.mulf %297, %322 : vector<64x128xf32>
    %324 = vector.extract_strided_slice %323 {offsets = [0, 0], sizes = [8, 128], strides = [1, 1]} : vector<64x128xf32> to vector<8x128xf32>
    %325 = vector.extract_strided_slice %323 {offsets = [8, 0], sizes = [8, 128], strides = [1, 1]} : vector<64x128xf32> to vector<8x128xf32>
    %326 = arith.addf %324, %325 : vector<8x128xf32>
    %327 = vector.extract_strided_slice %323 {offsets = [16, 0], sizes = [8, 128], strides = [1, 1]} : vector<64x128xf32> to vector<8x128xf32>
    %328 = arith.addf %326, %327 : vector<8x128xf32>
    %329 = vector.extract_strided_slice %323 {offsets = [24, 0], sizes = [8, 128], strides = [1, 1]} : vector<64x128xf32> to vector<8x128xf32>
    %330 = arith.addf %328, %329 : vector<8x128xf32>
    %331 = vector.extract_strided_slice %323 {offsets = [32, 0], sizes = [8, 128], strides = [1, 1]} : vector<64x128xf32> to vector<8x128xf32>
    %332 = arith.addf %330, %331 : vector<8x128xf32>
    %333 = vector.extract_strided_slice %323 {offsets = [40, 0], sizes = [8, 128], strides = [1, 1]} : vector<64x128xf32> to vector<8x128xf32>
    %334 = arith.addf %332, %333 : vector<8x128xf32>
    %335 = vector.extract_strided_slice %323 {offsets = [48, 0], sizes = [8, 128], strides = [1, 1]} : vector<64x128xf32> to vector<8x128xf32>
    %336 = arith.addf %334, %335 : vector<8x128xf32>
    %337 = vector.extract_strided_slice %323 {offsets = [56, 0], sizes = [8, 128], strides = [1, 1]} : vector<64x128xf32> to vector<8x128xf32>
    %338 = arith.addf %336, %337 : vector<8x128xf32>
    %c32_129 = arith.constant 32 : index
    %c0_130 = arith.constant 0 : index
    %339 = vector.load %arg7[%c32_129, %c0_130] : memref<48x128xf32, #tpu.memory_space<vmem>>, vector<8x128xf32>
    %340 = arith.addf %339, %338 : vector<8x128xf32>
    %c32_131 = arith.constant 32 : index
    %c0_132 = arith.constant 0 : index
    %341 = vector.load %arg7[%c32_131, %c0_132] : memref<48x128xf32, #tpu.memory_space<vmem>>, vector<8x128xf32>
    tpu.vector_store %arg7[%c32_131, %c0_132], %340 {strides = array<i32>} : memref<48x128xf32, #tpu.memory_space<vmem>>, vector<8x128xf32>,
    %c2_133 = arith.constant 2 : index
    %c64_134 = arith.constant 64 : index
    %c0_135 = arith.constant 0 : index
    %342 = vector.load %arg5[%c2_133, %c64_134, %c0_135] : memref<3x256x128xbf16, #tpu.memory_space<vmem>>, vector<1x64x128xbf16>
    %343 = vector.shape_cast %342 : vector<1x64x128xbf16> to vector<64x128xbf16>
    %344 = arith.extf %343 : vector<64x128xbf16> to vector<64x128xf32>
    %345 = arith.mulf %297, %344 : vector<64x128xf32>
    %346 = vector.extract_strided_slice %345 {offsets = [0, 0], sizes = [8, 128], strides = [1, 1]} : vector<64x128xf32> to vector<8x128xf32>
    %347 = vector.extract_strided_slice %345 {offsets = [8, 0], sizes = [8, 128], strides = [1, 1]} : vector<64x128xf32> to vector<8x128xf32>
    %348 = arith.addf %346, %347 : vector<8x128xf32>
    %349 = vector.extract_strided_slice %345 {offsets = [16, 0], sizes = [8, 128], strides = [1, 1]} : vector<64x128xf32> to vector<8x128xf32>
    %350 = arith.addf %348, %349 : vector<8x128xf32>
    %351 = vector.extract_strided_slice %345 {offsets = [24, 0], sizes = [8, 128], strides = [1, 1]} : vector<64x128xf32> to vector<8x128xf32>
    %352 = arith.addf %350, %351 : vector<8x128xf32>
    %353 = vector.extract_strided_slice %345 {offsets = [32, 0], sizes = [8, 128], strides = [1, 1]} : vector<64x128xf32> to vector<8x128xf32>
    %354 = arith.addf %352, %353 : vector<8x128xf32>
    %355 = vector.extract_strided_slice %345 {offsets = [40, 0], sizes = [8, 128], strides = [1, 1]} : vector<64x128xf32> to vector<8x128xf32>
    %356 = arith.addf %354, %355 : vector<8x128xf32>
    %357 = vector.extract_strided_slice %345 {offsets = [48, 0], sizes = [8, 128], strides = [1, 1]} : vector<64x128xf32> to vector<8x128xf32>
    %358 = arith.addf %356, %357 : vector<8x128xf32>
    %359 = vector.extract_strided_slice %345 {offsets = [56, 0], sizes = [8, 128], strides = [1, 1]} : vector<64x128xf32> to vector<8x128xf32>
    %360 = arith.addf %358, %359 : vector<8x128xf32>
    %c40_136 = arith.constant 40 : index
    %c0_137 = arith.constant 0 : index
    %361 = vector.load %arg7[%c40_136, %c0_137] : memref<48x128xf32, #tpu.memory_space<vmem>>, vector<8x128xf32>
    %362 = arith.addf %361, %360 : vector<8x128xf32>
    %c40_138 = arith.constant 40 : index
    %c0_139 = arith.constant 0 : index
    %363 = vector.load %arg7[%c40_138, %c0_139] : memref<48x128xf32, #tpu.memory_space<vmem>>, vector<8x128xf32>
    tpu.vector_store %arg7[%c40_138, %c0_139], %362 {strides = array<i32>} : memref<48x128xf32, #tpu.memory_space<vmem>>, vector<8x128xf32>,
    %c0_140 = arith.constant 0 : index
    %364 = memref.load %arg1[%c0_140] : memref<3xf32, #tpu.memory_space<smem>>
    %c0_141 = arith.constant 0 : index
    %c0_142 = arith.constant 0 : index
    %c128 = arith.constant 128 : index
    %c0_143 = arith.constant 0 : index
    %365 = vector.load %arg4[%c0_141, %c0_142, %c128, %c0_143] : memref<2x3x256x128xf32, #tpu.memory_space<vmem>>, vector<1x1x64x128xf32>
    %366 = vector.shape_cast %365 : vector<1x1x64x128xf32> to vector<64x128xf32>
    %367 = vector.broadcast %364 : f32 to vector<64x128xf32>
    %368 = arith.mulf %367, %366 : vector<64x128xf32>
    %369 = vector.broadcast %3 : f32 to vector<64x128xf32>
    %370 = arith.addf %368, %369 : vector<64x128xf32>
    %c1_144 = arith.constant 1 : index
    %371 = memref.load %arg1[%c1_144] : memref<3xf32, #tpu.memory_space<smem>>
    %c0_145 = arith.constant 0 : index
    %c1_146 = arith.constant 1 : index
    %c128_147 = arith.constant 128 : index
    %c0_148 = arith.constant 0 : index
    %372 = vector.load %arg4[%c0_145, %c1_146, %c128_147, %c0_148] : memref<2x3x256x128xf32, #tpu.memory_space<vmem>>, vector<1x1x64x128xf32>
    %373 = vector.shape_cast %372 : vector<1x1x64x128xf32> to vector<64x128xf32>
    %374 = vector.broadcast %371 : f32 to vector<64x128xf32>
    %375 = arith.mulf %374, %373 : vector<64x128xf32>
    %376 = arith.addf %370, %375 : vector<64x128xf32>
    %c2_149 = arith.constant 2 : index
    %377 = memref.load %arg1[%c2_149] : memref<3xf32, #tpu.memory_space<smem>>
    %c0_150 = arith.constant 0 : index
    %c2_151 = arith.constant 2 : index
    %c128_152 = arith.constant 128 : index
    %c0_153 = arith.constant 0 : index
    %378 = vector.load %arg4[%c0_150, %c2_151, %c128_152, %c0_153] : memref<2x3x256x128xf32, #tpu.memory_space<vmem>>, vector<1x1x64x128xf32>
    %379 = vector.shape_cast %378 : vector<1x1x64x128xf32> to vector<64x128xf32>
    %380 = vector.broadcast %377 : f32 to vector<64x128xf32>
    %381 = arith.mulf %380, %379 : vector<64x128xf32>
    %382 = arith.addf %376, %381 : vector<64x128xf32>
    %383 = arith.negf %382 : vector<64x128xf32>
    %384 = math.exp %383 : vector<64x128xf32>
    %cst_154 = arith.constant 1.000000e+00 : f32
    %385 = vector.broadcast %cst_154 : f32 to vector<64x128xf32>
    %386 = arith.addf %385, %384 : vector<64x128xf32>
    %387 = arith.divf %385, %386 : vector<64x128xf32>
    %c0_155 = arith.constant 0 : index
    %c128_156 = arith.constant 128 : index
    %c0_157 = arith.constant 0 : index
    %388 = vector.load %arg5[%c0_155, %c128_156, %c0_157] : memref<3x256x128xbf16, #tpu.memory_space<vmem>>, vector<1x64x128xbf16>
    %389 = vector.shape_cast %388 : vector<1x64x128xbf16> to vector<64x128xbf16>
    %390 = arith.extf %389 : vector<64x128xbf16> to vector<64x128xf32>
    %391 = arith.mulf %387, %390 : vector<64x128xf32>
    %392 = vector.extract_strided_slice %391 {offsets = [0, 0], sizes = [8, 128], strides = [1, 1]} : vector<64x128xf32> to vector<8x128xf32>
    %393 = vector.extract_strided_slice %391 {offsets = [8, 0], sizes = [8, 128], strides = [1, 1]} : vector<64x128xf32> to vector<8x128xf32>
    %394 = arith.addf %392, %393 : vector<8x128xf32>
    %395 = vector.extract_strided_slice %391 {offsets = [16, 0], sizes = [8, 128], strides = [1, 1]} : vector<64x128xf32> to vector<8x128xf32>
    %396 = arith.addf %394, %395 : vector<8x128xf32>
    %397 = vector.extract_strided_slice %391 {offsets = [24, 0], sizes = [8, 128], strides = [1, 1]} : vector<64x128xf32> to vector<8x128xf32>
    %398 = arith.addf %396, %397 : vector<8x128xf32>
    %399 = vector.extract_strided_slice %391 {offsets = [32, 0], sizes = [8, 128], strides = [1, 1]} : vector<64x128xf32> to vector<8x128xf32>
    %400 = arith.addf %398, %399 : vector<8x128xf32>
    %401 = vector.extract_strided_slice %391 {offsets = [40, 0], sizes = [8, 128], strides = [1, 1]} : vector<64x128xf32> to vector<8x128xf32>
    %402 = arith.addf %400, %401 : vector<8x128xf32>
    %403 = vector.extract_strided_slice %391 {offsets = [48, 0], sizes = [8, 128], strides = [1, 1]} : vector<64x128xf32> to vector<8x128xf32>
    %404 = arith.addf %402, %403 : vector<8x128xf32>
    %405 = vector.extract_strided_slice %391 {offsets = [56, 0], sizes = [8, 128], strides = [1, 1]} : vector<64x128xf32> to vector<8x128xf32>
    %406 = arith.addf %404, %405 : vector<8x128xf32>
    %c0_158 = arith.constant 0 : index
    %c0_159 = arith.constant 0 : index
    %407 = vector.load %arg7[%c0_158, %c0_159] : memref<48x128xf32, #tpu.memory_space<vmem>>, vector<8x128xf32>
    %408 = arith.addf %407, %406 : vector<8x128xf32>
    %c0_160 = arith.constant 0 : index
    %c0_161 = arith.constant 0 : index
    %409 = vector.load %arg7[%c0_160, %c0_161] : memref<48x128xf32, #tpu.memory_space<vmem>>, vector<8x128xf32>
    tpu.vector_store %arg7[%c0_160, %c0_161], %408 {strides = array<i32>} : memref<48x128xf32, #tpu.memory_space<vmem>>, vector<8x128xf32>,
    %c1_162 = arith.constant 1 : index
    %c128_163 = arith.constant 128 : index
    %c0_164 = arith.constant 0 : index
    %410 = vector.load %arg5[%c1_162, %c128_163, %c0_164] : memref<3x256x128xbf16, #tpu.memory_space<vmem>>, vector<1x64x128xbf16>
    %411 = vector.shape_cast %410 : vector<1x64x128xbf16> to vector<64x128xbf16>
    %412 = arith.extf %411 : vector<64x128xbf16> to vector<64x128xf32>
    %413 = arith.mulf %387, %412 : vector<64x128xf32>
    %414 = vector.extract_strided_slice %413 {offsets = [0, 0], sizes = [8, 128], strides = [1, 1]} : vector<64x128xf32> to vector<8x128xf32>
    %415 = vector.extract_strided_slice %413 {offsets = [8, 0], sizes = [8, 128], strides = [1, 1]} : vector<64x128xf32> to vector<8x128xf32>
    %416 = arith.addf %414, %415 : vector<8x128xf32>
    %417 = vector.extract_strided_slice %413 {offsets = [16, 0], sizes = [8, 128], strides = [1, 1]} : vector<64x128xf32> to vector<8x128xf32>
    %418 = arith.addf %416, %417 : vector<8x128xf32>
    %419 = vector.extract_strided_slice %413 {offsets = [24, 0], sizes = [8, 128], strides = [1, 1]} : vector<64x128xf32> to vector<8x128xf32>
    %420 = arith.addf %418, %419 : vector<8x128xf32>
    %421 = vector.extract_strided_slice %413 {offsets = [32, 0], sizes = [8, 128], strides = [1, 1]} : vector<64x128xf32> to vector<8x128xf32>
    %422 = arith.addf %420, %421 : vector<8x128xf32>
    %423 = vector.extract_strided_slice %413 {offsets = [40, 0], sizes = [8, 128], strides = [1, 1]} : vector<64x128xf32> to vector<8x128xf32>
    %424 = arith.addf %422, %423 : vector<8x128xf32>
    %425 = vector.extract_strided_slice %413 {offsets = [48, 0], sizes = [8, 128], strides = [1, 1]} : vector<64x128xf32> to vector<8x128xf32>
    %426 = arith.addf %424, %425 : vector<8x128xf32>
    %427 = vector.extract_strided_slice %413 {offsets = [56, 0], sizes = [8, 128], strides = [1, 1]} : vector<64x128xf32> to vector<8x128xf32>
    %428 = arith.addf %426, %427 : vector<8x128xf32>
    %c8_165 = arith.constant 8 : index
    %c0_166 = arith.constant 0 : index
    %429 = vector.load %arg7[%c8_165, %c0_166] : memref<48x128xf32, #tpu.memory_space<vmem>>, vector<8x128xf32>
    %430 = arith.addf %429, %428 : vector<8x128xf32>
    %c8_167 = arith.constant 8 : index
    %c0_168 = arith.constant 0 : index
    %431 = vector.load %arg7[%c8_167, %c0_168] : memref<48x128xf32, #tpu.memory_space<vmem>>, vector<8x128xf32>
    tpu.vector_store %arg7[%c8_167, %c0_168], %430 {strides = array<i32>} : memref<48x128xf32, #tpu.memory_space<vmem>>, vector<8x128xf32>,
    %c2_169 = arith.constant 2 : index
    %c128_170 = arith.constant 128 : index
    %c0_171 = arith.constant 0 : index
    %432 = vector.load %arg5[%c2_169, %c128_170, %c0_171] : memref<3x256x128xbf16, #tpu.memory_space<vmem>>, vector<1x64x128xbf16>
    %433 = vector.shape_cast %432 : vector<1x64x128xbf16> to vector<64x128xbf16>
    %434 = arith.extf %433 : vector<64x128xbf16> to vector<64x128xf32>
    %435 = arith.mulf %387, %434 : vector<64x128xf32>
    %436 = vector.extract_strided_slice %435 {offsets = [0, 0], sizes = [8, 128], strides = [1, 1]} : vector<64x128xf32> to vector<8x128xf32>
    %437 = vector.extract_strided_slice %435 {offsets = [8, 0], sizes = [8, 128], strides = [1, 1]} : vector<64x128xf32> to vector<8x128xf32>
    %438 = arith.addf %436, %437 : vector<8x128xf32>
    %439 = vector.extract_strided_slice %435 {offsets = [16, 0], sizes = [8, 128], strides = [1, 1]} : vector<64x128xf32> to vector<8x128xf32>
    %440 = arith.addf %438, %439 : vector<8x128xf32>
    %441 = vector.extract_strided_slice %435 {offsets = [24, 0], sizes = [8, 128], strides = [1, 1]} : vector<64x128xf32> to vector<8x128xf32>
    %442 = arith.addf %440, %441 : vector<8x128xf32>
    %443 = vector.extract_strided_slice %435 {offsets = [32, 0], sizes = [8, 128], strides = [1, 1]} : vector<64x128xf32> to vector<8x128xf32>
    %444 = arith.addf %442, %443 : vector<8x128xf32>
    %445 = vector.extract_strided_slice %435 {offsets = [40, 0], sizes = [8, 128], strides = [1, 1]} : vector<64x128xf32> to vector<8x128xf32>
    %446 = arith.addf %444, %445 : vector<8x128xf32>
    %447 = vector.extract_strided_slice %435 {offsets = [48, 0], sizes = [8, 128], strides = [1, 1]} : vector<64x128xf32> to vector<8x128xf32>
    %448 = arith.addf %446, %447 : vector<8x128xf32>
    %449 = vector.extract_strided_slice %435 {offsets = [56, 0], sizes = [8, 128], strides = [1, 1]} : vector<64x128xf32> to vector<8x128xf32>
    %450 = arith.addf %448, %449 : vector<8x128xf32>
    %c16_172 = arith.constant 16 : index
    %c0_173 = arith.constant 0 : index
    %451 = vector.load %arg7[%c16_172, %c0_173] : memref<48x128xf32, #tpu.memory_space<vmem>>, vector<8x128xf32>
    %452 = arith.addf %451, %450 : vector<8x128xf32>
    %c16_174 = arith.constant 16 : index
    %c0_175 = arith.constant 0 : index
    %453 = vector.load %arg7[%c16_174, %c0_175] : memref<48x128xf32, #tpu.memory_space<vmem>>, vector<8x128xf32>
    tpu.vector_store %arg7[%c16_174, %c0_175], %452 {strides = array<i32>} : memref<48x128xf32, #tpu.memory_space<vmem>>, vector<8x128xf32>,
    %c0_176 = arith.constant 0 : index
    %454 = memref.load %arg1[%c0_176] : memref<3xf32, #tpu.memory_space<smem>>
    %c1_177 = arith.constant 1 : index
    %c0_178 = arith.constant 0 : index
    %c128_179 = arith.constant 128 : index
    %c0_180 = arith.constant 0 : index
    %455 = vector.load %arg4[%c1_177, %c0_178, %c128_179, %c0_180] : memref<2x3x256x128xf32, #tpu.memory_space<vmem>>, vector<1x1x64x128xf32>
    %456 = vector.shape_cast %455 : vector<1x1x64x128xf32> to vector<64x128xf32>
    %457 = vector.broadcast %454 : f32 to vector<64x128xf32>
    %458 = arith.mulf %457, %456 : vector<64x128xf32>
    %459 = vector.broadcast %3 : f32 to vector<64x128xf32>
    %460 = arith.addf %458, %459 : vector<64x128xf32>
    %c1_181 = arith.constant 1 : index
    %461 = memref.load %arg1[%c1_181] : memref<3xf32, #tpu.memory_space<smem>>
    %c1_182 = arith.constant 1 : index
    %c1_183 = arith.constant 1 : index
    %c128_184 = arith.constant 128 : index
    %c0_185 = arith.constant 0 : index
    %462 = vector.load %arg4[%c1_182, %c1_183, %c128_184, %c0_185] : memref<2x3x256x128xf32, #tpu.memory_space<vmem>>, vector<1x1x64x128xf32>
    %463 = vector.shape_cast %462 : vector<1x1x64x128xf32> to vector<64x128xf32>
    %464 = vector.broadcast %461 : f32 to vector<64x128xf32>
    %465 = arith.mulf %464, %463 : vector<64x128xf32>
    %466 = arith.addf %460, %465 : vector<64x128xf32>
    %c2_186 = arith.constant 2 : index
    %467 = memref.load %arg1[%c2_186] : memref<3xf32, #tpu.memory_space<smem>>
    %c1_187 = arith.constant 1 : index
    %c2_188 = arith.constant 2 : index
    %c128_189 = arith.constant 128 : index
    %c0_190 = arith.constant 0 : index
    %468 = vector.load %arg4[%c1_187, %c2_188, %c128_189, %c0_190] : memref<2x3x256x128xf32, #tpu.memory_space<vmem>>, vector<1x1x64x128xf32>
    %469 = vector.shape_cast %468 : vector<1x1x64x128xf32> to vector<64x128xf32>
    %470 = vector.broadcast %467 : f32 to vector<64x128xf32>
    %471 = arith.mulf %470, %469 : vector<64x128xf32>
    %472 = arith.addf %466, %471 : vector<64x128xf32>
    %473 = arith.negf %472 : vector<64x128xf32>
    %474 = math.exp %473 : vector<64x128xf32>
    %cst_191 = arith.constant 1.000000e+00 : f32
    %475 = vector.broadcast %cst_191 : f32 to vector<64x128xf32>
    %476 = arith.addf %475, %474 : vector<64x128xf32>
    %477 = arith.divf %475, %476 : vector<64x128xf32>
    %c0_192 = arith.constant 0 : index
    %c128_193 = arith.constant 128 : index
    %c0_194 = arith.constant 0 : index
    %478 = vector.load %arg5[%c0_192, %c128_193, %c0_194] : memref<3x256x128xbf16, #tpu.memory_space<vmem>>, vector<1x64x128xbf16>
    %479 = vector.shape_cast %478 : vector<1x64x128xbf16> to vector<64x128xbf16>
    %480 = arith.extf %479 : vector<64x128xbf16> to vector<64x128xf32>
    %481 = arith.mulf %477, %480 : vector<64x128xf32>
    %482 = vector.extract_strided_slice %481 {offsets = [0, 0], sizes = [8, 128], strides = [1, 1]} : vector<64x128xf32> to vector<8x128xf32>
    %483 = vector.extract_strided_slice %481 {offsets = [8, 0], sizes = [8, 128], strides = [1, 1]} : vector<64x128xf32> to vector<8x128xf32>
    %484 = arith.addf %482, %483 : vector<8x128xf32>
    %485 = vector.extract_strided_slice %481 {offsets = [16, 0], sizes = [8, 128], strides = [1, 1]} : vector<64x128xf32> to vector<8x128xf32>
    %486 = arith.addf %484, %485 : vector<8x128xf32>
    %487 = vector.extract_strided_slice %481 {offsets = [24, 0], sizes = [8, 128], strides = [1, 1]} : vector<64x128xf32> to vector<8x128xf32>
    %488 = arith.addf %486, %487 : vector<8x128xf32>
    %489 = vector.extract_strided_slice %481 {offsets = [32, 0], sizes = [8, 128], strides = [1, 1]} : vector<64x128xf32> to vector<8x128xf32>
    %490 = arith.addf %488, %489 : vector<8x128xf32>
    %491 = vector.extract_strided_slice %481 {offsets = [40, 0], sizes = [8, 128], strides = [1, 1]} : vector<64x128xf32> to vector<8x128xf32>
    %492 = arith.addf %490, %491 : vector<8x128xf32>
    %493 = vector.extract_strided_slice %481 {offsets = [48, 0], sizes = [8, 128], strides = [1, 1]} : vector<64x128xf32> to vector<8x128xf32>
    %494 = arith.addf %492, %493 : vector<8x128xf32>
    %495 = vector.extract_strided_slice %481 {offsets = [56, 0], sizes = [8, 128], strides = [1, 1]} : vector<64x128xf32> to vector<8x128xf32>
    %496 = arith.addf %494, %495 : vector<8x128xf32>
    %c24_195 = arith.constant 24 : index
    %c0_196 = arith.constant 0 : index
    %497 = vector.load %arg7[%c24_195, %c0_196] : memref<48x128xf32, #tpu.memory_space<vmem>>, vector<8x128xf32>
    %498 = arith.addf %497, %496 : vector<8x128xf32>
    %c24_197 = arith.constant 24 : index
    %c0_198 = arith.constant 0 : index
    %499 = vector.load %arg7[%c24_197, %c0_198] : memref<48x128xf32, #tpu.memory_space<vmem>>, vector<8x128xf32>
    tpu.vector_store %arg7[%c24_197, %c0_198], %498 {strides = array<i32>} : memref<48x128xf32, #tpu.memory_space<vmem>>, vector<8x128xf32>,
    %c1_199 = arith.constant 1 : index
    %c128_200 = arith.constant 128 : index
    %c0_201 = arith.constant 0 : index
    %500 = vector.load %arg5[%c1_199, %c128_200, %c0_201] : memref<3x256x128xbf16, #tpu.memory_space<vmem>>, vector<1x64x128xbf16>
    %501 = vector.shape_cast %500 : vector<1x64x128xbf16> to vector<64x128xbf16>
    %502 = arith.extf %501 : vector<64x128xbf16> to vector<64x128xf32>
    %503 = arith.mulf %477, %502 : vector<64x128xf32>
    %504 = vector.extract_strided_slice %503 {offsets = [0, 0], sizes = [8, 128], strides = [1, 1]} : vector<64x128xf32> to vector<8x128xf32>
    %505 = vector.extract_strided_slice %503 {offsets = [8, 0], sizes = [8, 128], strides = [1, 1]} : vector<64x128xf32> to vector<8x128xf32>
    %506 = arith.addf %504, %505 : vector<8x128xf32>
    %507 = vector.extract_strided_slice %503 {offsets = [16, 0], sizes = [8, 128], strides = [1, 1]} : vector<64x128xf32> to vector<8x128xf32>
    %508 = arith.addf %506, %507 : vector<8x128xf32>
    %509 = vector.extract_strided_slice %503 {offsets = [24, 0], sizes = [8, 128], strides = [1, 1]} : vector<64x128xf32> to vector<8x128xf32>
    %510 = arith.addf %508, %509 : vector<8x128xf32>
    %511 = vector.extract_strided_slice %503 {offsets = [32, 0], sizes = [8, 128], strides = [1, 1]} : vector<64x128xf32> to vector<8x128xf32>
    %512 = arith.addf %510, %511 : vector<8x128xf32>
    %513 = vector.extract_strided_slice %503 {offsets = [40, 0], sizes = [8, 128], strides = [1, 1]} : vector<64x128xf32> to vector<8x128xf32>
    %514 = arith.addf %512, %513 : vector<8x128xf32>
    %515 = vector.extract_strided_slice %503 {offsets = [48, 0], sizes = [8, 128], strides = [1, 1]} : vector<64x128xf32> to vector<8x128xf32>
    %516 = arith.addf %514, %515 : vector<8x128xf32>
    %517 = vector.extract_strided_slice %503 {offsets = [56, 0], sizes = [8, 128], strides = [1, 1]} : vector<64x128xf32> to vector<8x128xf32>
    %518 = arith.addf %516, %517 : vector<8x128xf32>
    %c32_202 = arith.constant 32 : index
    %c0_203 = arith.constant 0 : index
    %519 = vector.load %arg7[%c32_202, %c0_203] : memref<48x128xf32, #tpu.memory_space<vmem>>, vector<8x128xf32>
    %520 = arith.addf %519, %518 : vector<8x128xf32>
    %c32_204 = arith.constant 32 : index
    %c0_205 = arith.constant 0 : index
    %521 = vector.load %arg7[%c32_204, %c0_205] : memref<48x128xf32, #tpu.memory_space<vmem>>, vector<8x128xf32>
    tpu.vector_store %arg7[%c32_204, %c0_205], %520 {strides = array<i32>} : memref<48x128xf32, #tpu.memory_space<vmem>>, vector<8x128xf32>,
    %c2_206 = arith.constant 2 : index
    %c128_207 = arith.constant 128 : index
    %c0_208 = arith.constant 0 : index
    %522 = vector.load %arg5[%c2_206, %c128_207, %c0_208] : memref<3x256x128xbf16, #tpu.memory_space<vmem>>, vector<1x64x128xbf16>
    %523 = vector.shape_cast %522 : vector<1x64x128xbf16> to vector<64x128xbf16>
    %524 = arith.extf %523 : vector<64x128xbf16> to vector<64x128xf32>
    %525 = arith.mulf %477, %524 : vector<64x128xf32>
    %526 = vector.extract_strided_slice %525 {offsets = [0, 0], sizes = [8, 128], strides = [1, 1]} : vector<64x128xf32> to vector<8x128xf32>
    %527 = vector.extract_strided_slice %525 {offsets = [8, 0], sizes = [8, 128], strides = [1, 1]} : vector<64x128xf32> to vector<8x128xf32>
    %528 = arith.addf %526, %527 : vector<8x128xf32>
    %529 = vector.extract_strided_slice %525 {offsets = [16, 0], sizes = [8, 128], strides = [1, 1]} : vector<64x128xf32> to vector<8x128xf32>
    %530 = arith.addf %528, %529 : vector<8x128xf32>
    %531 = vector.extract_strided_slice %525 {offsets = [24, 0], sizes = [8, 128], strides = [1, 1]} : vector<64x128xf32> to vector<8x128xf32>
    %532 = arith.addf %530, %531 : vector<8x128xf32>
    %533 = vector.extract_strided_slice %525 {offsets = [32, 0], sizes = [8, 128], strides = [1, 1]} : vector<64x128xf32> to vector<8x128xf32>
    %534 = arith.addf %532, %533 : vector<8x128xf32>
    %535 = vector.extract_strided_slice %525 {offsets = [40, 0], sizes = [8, 128], strides = [1, 1]} : vector<64x128xf32> to vector<8x128xf32>
    %536 = arith.addf %534, %535 : vector<8x128xf32>
    %537 = vector.extract_strided_slice %525 {offsets = [48, 0], sizes = [8, 128], strides = [1, 1]} : vector<64x128xf32> to vector<8x128xf32>
    %538 = arith.addf %536, %537 : vector<8x128xf32>
    %539 = vector.extract_strided_slice %525 {offsets = [56, 0], sizes = [8, 128], strides = [1, 1]} : vector<64x128xf32> to vector<8x128xf32>
    %540 = arith.addf %538, %539 : vector<8x128xf32>
    %c40_209 = arith.constant 40 : index
    %c0_210 = arith.constant 0 : index
    %541 = vector.load %arg7[%c40_209, %c0_210] : memref<48x128xf32, #tpu.memory_space<vmem>>, vector<8x128xf32>
    %542 = arith.addf %541, %540 : vector<8x128xf32>
    %c40_211 = arith.constant 40 : index
    %c0_212 = arith.constant 0 : index
    %543 = vector.load %arg7[%c40_211, %c0_212] : memref<48x128xf32, #tpu.memory_space<vmem>>, vector<8x128xf32>
    tpu.vector_store %arg7[%c40_211, %c0_212], %542 {strides = array<i32>} : memref<48x128xf32, #tpu.memory_space<vmem>>, vector<8x128xf32>,
    %c0_213 = arith.constant 0 : index
    %544 = memref.load %arg1[%c0_213] : memref<3xf32, #tpu.memory_space<smem>>
    %c0_214 = arith.constant 0 : index
    %c0_215 = arith.constant 0 : index
    %c192 = arith.constant 192 : index
    %c0_216 = arith.constant 0 : index
    %545 = vector.load %arg4[%c0_214, %c0_215, %c192, %c0_216] : memref<2x3x256x128xf32, #tpu.memory_space<vmem>>, vector<1x1x64x128xf32>
    %546 = vector.shape_cast %545 : vector<1x1x64x128xf32> to vector<64x128xf32>
    %547 = vector.broadcast %544 : f32 to vector<64x128xf32>
    %548 = arith.mulf %547, %546 : vector<64x128xf32>
    %549 = vector.broadcast %3 : f32 to vector<64x128xf32>
    %550 = arith.addf %548, %549 : vector<64x128xf32>
    %c1_217 = arith.constant 1 : index
    %551 = memref.load %arg1[%c1_217] : memref<3xf32, #tpu.memory_space<smem>>
    %c0_218 = arith.constant 0 : index
    %c1_219 = arith.constant 1 : index
    %c192_220 = arith.constant 192 : index
    %c0_221 = arith.constant 0 : index
    %552 = vector.load %arg4[%c0_218, %c1_219, %c192_220, %c0_221] : memref<2x3x256x128xf32, #tpu.memory_space<vmem>>, vector<1x1x64x128xf32>
    %553 = vector.shape_cast %552 : vector<1x1x64x128xf32> to vector<64x128xf32>
    %554 = vector.broadcast %551 : f32 to vector<64x128xf32>
    %555 = arith.mulf %554, %553 : vector<64x128xf32>
    %556 = arith.addf %550, %555 : vector<64x128xf32>
    %c2_222 = arith.constant 2 : index
    %557 = memref.load %arg1[%c2_222] : memref<3xf32, #tpu.memory_space<smem>>
    %c0_223 = arith.constant 0 : index
    %c2_224 = arith.constant 2 : index
    %c192_225 = arith.constant 192 : index
    %c0_226 = arith.constant 0 : index
    %558 = vector.load %arg4[%c0_223, %c2_224, %c192_225, %c0_226] : memref<2x3x256x128xf32, #tpu.memory_space<vmem>>, vector<1x1x64x128xf32>
    %559 = vector.shape_cast %558 : vector<1x1x64x128xf32> to vector<64x128xf32>
    %560 = vector.broadcast %557 : f32 to vector<64x128xf32>
    %561 = arith.mulf %560, %559 : vector<64x128xf32>
    %562 = arith.addf %556, %561 : vector<64x128xf32>
    %563 = arith.negf %562 : vector<64x128xf32>
    %564 = math.exp %563 : vector<64x128xf32>
    %cst_227 = arith.constant 1.000000e+00 : f32
    %565 = vector.broadcast %cst_227 : f32 to vector<64x128xf32>
    %566 = arith.addf %565, %564 : vector<64x128xf32>
    %567 = arith.divf %565, %566 : vector<64x128xf32>
    %c0_228 = arith.constant 0 : index
    %c192_229 = arith.constant 192 : index
    %c0_230 = arith.constant 0 : index
    %568 = vector.load %arg5[%c0_228, %c192_229, %c0_230] : memref<3x256x128xbf16, #tpu.memory_space<vmem>>, vector<1x64x128xbf16>
    %569 = vector.shape_cast %568 : vector<1x64x128xbf16> to vector<64x128xbf16>
    %570 = arith.extf %569 : vector<64x128xbf16> to vector<64x128xf32>
    %571 = arith.mulf %567, %570 : vector<64x128xf32>
    %572 = vector.extract_strided_slice %571 {offsets = [0, 0], sizes = [8, 128], strides = [1, 1]} : vector<64x128xf32> to vector<8x128xf32>
    %573 = vector.extract_strided_slice %571 {offsets = [8, 0], sizes = [8, 128], strides = [1, 1]} : vector<64x128xf32> to vector<8x128xf32>
    %574 = arith.addf %572, %573 : vector<8x128xf32>
    %575 = vector.extract_strided_slice %571 {offsets = [16, 0], sizes = [8, 128], strides = [1, 1]} : vector<64x128xf32> to vector<8x128xf32>
    %576 = arith.addf %574, %575 : vector<8x128xf32>
    %577 = vector.extract_strided_slice %571 {offsets = [24, 0], sizes = [8, 128], strides = [1, 1]} : vector<64x128xf32> to vector<8x128xf32>
    %578 = arith.addf %576, %577 : vector<8x128xf32>
    %579 = vector.extract_strided_slice %571 {offsets = [32, 0], sizes = [8, 128], strides = [1, 1]} : vector<64x128xf32> to vector<8x128xf32>
    %580 = arith.addf %578, %579 : vector<8x128xf32>
    %581 = vector.extract_strided_slice %571 {offsets = [40, 0], sizes = [8, 128], strides = [1, 1]} : vector<64x128xf32> to vector<8x128xf32>
    %582 = arith.addf %580, %581 : vector<8x128xf32>
    %583 = vector.extract_strided_slice %571 {offsets = [48, 0], sizes = [8, 128], strides = [1, 1]} : vector<64x128xf32> to vector<8x128xf32>
    %584 = arith.addf %582, %583 : vector<8x128xf32>
    %585 = vector.extract_strided_slice %571 {offsets = [56, 0], sizes = [8, 128], strides = [1, 1]} : vector<64x128xf32> to vector<8x128xf32>
    %586 = arith.addf %584, %585 : vector<8x128xf32>
    %c0_231 = arith.constant 0 : index
    %c0_232 = arith.constant 0 : index
    %587 = vector.load %arg7[%c0_231, %c0_232] : memref<48x128xf32, #tpu.memory_space<vmem>>, vector<8x128xf32>
    %588 = arith.addf %587, %586 : vector<8x128xf32>
    %c0_233 = arith.constant 0 : index
    %c0_234 = arith.constant 0 : index
    %589 = vector.load %arg7[%c0_233, %c0_234] : memref<48x128xf32, #tpu.memory_space<vmem>>, vector<8x128xf32>
    tpu.vector_store %arg7[%c0_233, %c0_234], %588 {strides = array<i32>} : memref<48x128xf32, #tpu.memory_space<vmem>>, vector<8x128xf32>,
    %c1_235 = arith.constant 1 : index
    %c192_236 = arith.constant 192 : index
    %c0_237 = arith.constant 0 : index
    %590 = vector.load %arg5[%c1_235, %c192_236, %c0_237] : memref<3x256x128xbf16, #tpu.memory_space<vmem>>, vector<1x64x128xbf16>
    %591 = vector.shape_cast %590 : vector<1x64x128xbf16> to vector<64x128xbf16>
    %592 = arith.extf %591 : vector<64x128xbf16> to vector<64x128xf32>
    %593 = arith.mulf %567, %592 : vector<64x128xf32>
    %594 = vector.extract_strided_slice %593 {offsets = [0, 0], sizes = [8, 128], strides = [1, 1]} : vector<64x128xf32> to vector<8x128xf32>
    %595 = vector.extract_strided_slice %593 {offsets = [8, 0], sizes = [8, 128], strides = [1, 1]} : vector<64x128xf32> to vector<8x128xf32>
    %596 = arith.addf %594, %595 : vector<8x128xf32>
    %597 = vector.extract_strided_slice %593 {offsets = [16, 0], sizes = [8, 128], strides = [1, 1]} : vector<64x128xf32> to vector<8x128xf32>
    %598 = arith.addf %596, %597 : vector<8x128xf32>
    %599 = vector.extract_strided_slice %593 {offsets = [24, 0], sizes = [8, 128], strides = [1, 1]} : vector<64x128xf32> to vector<8x128xf32>
    %600 = arith.addf %598, %599 : vector<8x128xf32>
    %601 = vector.extract_strided_slice %593 {offsets = [32, 0], sizes = [8, 128], strides = [1, 1]} : vector<64x128xf32> to vector<8x128xf32>
    %602 = arith.addf %600, %601 : vector<8x128xf32>
    %603 = vector.extract_strided_slice %593 {offsets = [40, 0], sizes = [8, 128], strides = [1, 1]} : vector<64x128xf32> to vector<8x128xf32>
    %604 = arith.addf %602, %603 : vector<8x128xf32>
    %605 = vector.extract_strided_slice %593 {offsets = [48, 0], sizes = [8, 128], strides = [1, 1]} : vector<64x128xf32> to vector<8x128xf32>
    %606 = arith.addf %604, %605 : vector<8x128xf32>
    %607 = vector.extract_strided_slice %593 {offsets = [56, 0], sizes = [8, 128], strides = [1, 1]} : vector<64x128xf32> to vector<8x128xf32>
    %608 = arith.addf %606, %607 : vector<8x128xf32>
    %c8_238 = arith.constant 8 : index
    %c0_239 = arith.constant 0 : index
    %609 = vector.load %arg7[%c8_238, %c0_239] : memref<48x128xf32, #tpu.memory_space<vmem>>, vector<8x128xf32>
    %610 = arith.addf %609, %608 : vector<8x128xf32>
    %c8_240 = arith.constant 8 : index
    %c0_241 = arith.constant 0 : index
    %611 = vector.load %arg7[%c8_240, %c0_241] : memref<48x128xf32, #tpu.memory_space<vmem>>, vector<8x128xf32>
    tpu.vector_store %arg7[%c8_240, %c0_241], %610 {strides = array<i32>} : memref<48x128xf32, #tpu.memory_space<vmem>>, vector<8x128xf32>,
    %c2_242 = arith.constant 2 : index
    %c192_243 = arith.constant 192 : index
    %c0_244 = arith.constant 0 : index
    %612 = vector.load %arg5[%c2_242, %c192_243, %c0_244] : memref<3x256x128xbf16, #tpu.memory_space<vmem>>, vector<1x64x128xbf16>
    %613 = vector.shape_cast %612 : vector<1x64x128xbf16> to vector<64x128xbf16>
    %614 = arith.extf %613 : vector<64x128xbf16> to vector<64x128xf32>
    %615 = arith.mulf %567, %614 : vector<64x128xf32>
    %616 = vector.extract_strided_slice %615 {offsets = [0, 0], sizes = [8, 128], strides = [1, 1]} : vector<64x128xf32> to vector<8x128xf32>
    %617 = vector.extract_strided_slice %615 {offsets = [8, 0], sizes = [8, 128], strides = [1, 1]} : vector<64x128xf32> to vector<8x128xf32>
    %618 = arith.addf %616, %617 : vector<8x128xf32>
    %619 = vector.extract_strided_slice %615 {offsets = [16, 0], sizes = [8, 128], strides = [1, 1]} : vector<64x128xf32> to vector<8x128xf32>
    %620 = arith.addf %618, %619 : vector<8x128xf32>
    %621 = vector.extract_strided_slice %615 {offsets = [24, 0], sizes = [8, 128], strides = [1, 1]} : vector<64x128xf32> to vector<8x128xf32>
    %622 = arith.addf %620, %621 : vector<8x128xf32>
    %623 = vector.extract_strided_slice %615 {offsets = [32, 0], sizes = [8, 128], strides = [1, 1]} : vector<64x128xf32> to vector<8x128xf32>
    %624 = arith.addf %622, %623 : vector<8x128xf32>
    %625 = vector.extract_strided_slice %615 {offsets = [40, 0], sizes = [8, 128], strides = [1, 1]} : vector<64x128xf32> to vector<8x128xf32>
    %626 = arith.addf %624, %625 : vector<8x128xf32>
    %627 = vector.extract_strided_slice %615 {offsets = [48, 0], sizes = [8, 128], strides = [1, 1]} : vector<64x128xf32> to vector<8x128xf32>
    %628 = arith.addf %626, %627 : vector<8x128xf32>
    %629 = vector.extract_strided_slice %615 {offsets = [56, 0], sizes = [8, 128], strides = [1, 1]} : vector<64x128xf32> to vector<8x128xf32>
    %630 = arith.addf %628, %629 : vector<8x128xf32>
    %c16_245 = arith.constant 16 : index
    %c0_246 = arith.constant 0 : index
    %631 = vector.load %arg7[%c16_245, %c0_246] : memref<48x128xf32, #tpu.memory_space<vmem>>, vector<8x128xf32>
    %632 = arith.addf %631, %630 : vector<8x128xf32>
    %c16_247 = arith.constant 16 : index
    %c0_248 = arith.constant 0 : index
    %633 = vector.load %arg7[%c16_247, %c0_248] : memref<48x128xf32, #tpu.memory_space<vmem>>, vector<8x128xf32>
    tpu.vector_store %arg7[%c16_247, %c0_248], %632 {strides = array<i32>} : memref<48x128xf32, #tpu.memory_space<vmem>>, vector<8x128xf32>,
    %c0_249 = arith.constant 0 : index
    %634 = memref.load %arg1[%c0_249] : memref<3xf32, #tpu.memory_space<smem>>
    %c1_250 = arith.constant 1 : index
    %c0_251 = arith.constant 0 : index
    %c192_252 = arith.constant 192 : index
    %c0_253 = arith.constant 0 : index
    %635 = vector.load %arg4[%c1_250, %c0_251, %c192_252, %c0_253] : memref<2x3x256x128xf32, #tpu.memory_space<vmem>>, vector<1x1x64x128xf32>
    %636 = vector.shape_cast %635 : vector<1x1x64x128xf32> to vector<64x128xf32>
    %637 = vector.broadcast %634 : f32 to vector<64x128xf32>
    %638 = arith.mulf %637, %636 : vector<64x128xf32>
    %639 = vector.broadcast %3 : f32 to vector<64x128xf32>
    %640 = arith.addf %638, %639 : vector<64x128xf32>
    %c1_254 = arith.constant 1 : index
    %641 = memref.load %arg1[%c1_254] : memref<3xf32, #tpu.memory_space<smem>>
    %c1_255 = arith.constant 1 : index
    %c1_256 = arith.constant 1 : index
    %c192_257 = arith.constant 192 : index
    %c0_258 = arith.constant 0 : index
    %642 = vector.load %arg4[%c1_255, %c1_256, %c192_257, %c0_258] : memref<2x3x256x128xf32, #tpu.memory_space<vmem>>, vector<1x1x64x128xf32>
    %643 = vector.shape_cast %642 : vector<1x1x64x128xf32> to vector<64x128xf32>
    %644 = vector.broadcast %641 : f32 to vector<64x128xf32>
    %645 = arith.mulf %644, %643 : vector<64x128xf32>
    %646 = arith.addf %640, %645 : vector<64x128xf32>
    %c2_259 = arith.constant 2 : index
    %647 = memref.load %arg1[%c2_259] : memref<3xf32, #tpu.memory_space<smem>>
    %c1_260 = arith.constant 1 : index
    %c2_261 = arith.constant 2 : index
    %c192_262 = arith.constant 192 : index
    %c0_263 = arith.constant 0 : index
    %648 = vector.load %arg4[%c1_260, %c2_261, %c192_262, %c0_263] : memref<2x3x256x128xf32, #tpu.memory_space<vmem>>, vector<1x1x64x128xf32>
    %649 = vector.shape_cast %648 : vector<1x1x64x128xf32> to vector<64x128xf32>
    %650 = vector.broadcast %647 : f32 to vector<64x128xf32>
    %651 = arith.mulf %650, %649 : vector<64x128xf32>
    %652 = arith.addf %646, %651 : vector<64x128xf32>
    %653 = arith.negf %652 : vector<64x128xf32>
    %654 = math.exp %653 : vector<64x128xf32>
    %cst_264 = arith.constant 1.000000e+00 : f32
    %655 = vector.broadcast %cst_264 : f32 to vector<64x128xf32>
    %656 = arith.addf %655, %654 : vector<64x128xf32>
    %657 = arith.divf %655, %656 : vector<64x128xf32>
    %c0_265 = arith.constant 0 : index
    %c192_266 = arith.constant 192 : index
    %c0_267 = arith.constant 0 : index
    %658 = vector.load %arg5[%c0_265, %c192_266, %c0_267] : memref<3x256x128xbf16, #tpu.memory_space<vmem>>, vector<1x64x128xbf16>
    %659 = vector.shape_cast %658 : vector<1x64x128xbf16> to vector<64x128xbf16>
    %660 = arith.extf %659 : vector<64x128xbf16> to vector<64x128xf32>
    %661 = arith.mulf %657, %660 : vector<64x128xf32>
    %662 = vector.extract_strided_slice %661 {offsets = [0, 0], sizes = [8, 128], strides = [1, 1]} : vector<64x128xf32> to vector<8x128xf32>
    %663 = vector.extract_strided_slice %661 {offsets = [8, 0], sizes = [8, 128], strides = [1, 1]} : vector<64x128xf32> to vector<8x128xf32>
    %664 = arith.addf %662, %663 : vector<8x128xf32>
    %665 = vector.extract_strided_slice %661 {offsets = [16, 0], sizes = [8, 128], strides = [1, 1]} : vector<64x128xf32> to vector<8x128xf32>
    %666 = arith.addf %664, %665 : vector<8x128xf32>
    %667 = vector.extract_strided_slice %661 {offsets = [24, 0], sizes = [8, 128], strides = [1, 1]} : vector<64x128xf32> to vector<8x128xf32>
    %668 = arith.addf %666, %667 : vector<8x128xf32>
    %669 = vector.extract_strided_slice %661 {offsets = [32, 0], sizes = [8, 128], strides = [1, 1]} : vector<64x128xf32> to vector<8x128xf32>
    %670 = arith.addf %668, %669 : vector<8x128xf32>
    %671 = vector.extract_strided_slice %661 {offsets = [40, 0], sizes = [8, 128], strides = [1, 1]} : vector<64x128xf32> to vector<8x128xf32>
    %672 = arith.addf %670, %671 : vector<8x128xf32>
    %673 = vector.extract_strided_slice %661 {offsets = [48, 0], sizes = [8, 128], strides = [1, 1]} : vector<64x128xf32> to vector<8x128xf32>
    %674 = arith.addf %672, %673 : vector<8x128xf32>
    %675 = vector.extract_strided_slice %661 {offsets = [56, 0], sizes = [8, 128], strides = [1, 1]} : vector<64x128xf32> to vector<8x128xf32>
    %676 = arith.addf %674, %675 : vector<8x128xf32>
    %c24_268 = arith.constant 24 : index
    %c0_269 = arith.constant 0 : index
    %677 = vector.load %arg7[%c24_268, %c0_269] : memref<48x128xf32, #tpu.memory_space<vmem>>, vector<8x128xf32>
    %678 = arith.addf %677, %676 : vector<8x128xf32>
    %c24_270 = arith.constant 24 : index
    %c0_271 = arith.constant 0 : index
    %679 = vector.load %arg7[%c24_270, %c0_271] : memref<48x128xf32, #tpu.memory_space<vmem>>, vector<8x128xf32>
    tpu.vector_store %arg7[%c24_270, %c0_271], %678 {strides = array<i32>} : memref<48x128xf32, #tpu.memory_space<vmem>>, vector<8x128xf32>,
    %c1_272 = arith.constant 1 : index
    %c192_273 = arith.constant 192 : index
    %c0_274 = arith.constant 0 : index
    %680 = vector.load %arg5[%c1_272, %c192_273, %c0_274] : memref<3x256x128xbf16, #tpu.memory_space<vmem>>, vector<1x64x128xbf16>
    %681 = vector.shape_cast %680 : vector<1x64x128xbf16> to vector<64x128xbf16>
    %682 = arith.extf %681 : vector<64x128xbf16> to vector<64x128xf32>
    %683 = arith.mulf %657, %682 : vector<64x128xf32>
    %684 = vector.extract_strided_slice %683 {offsets = [0, 0], sizes = [8, 128], strides = [1, 1]} : vector<64x128xf32> to vector<8x128xf32>
    %685 = vector.extract_strided_slice %683 {offsets = [8, 0], sizes = [8, 128], strides = [1, 1]} : vector<64x128xf32> to vector<8x128xf32>
    %686 = arith.addf %684, %685 : vector<8x128xf32>
    %687 = vector.extract_strided_slice %683 {offsets = [16, 0], sizes = [8, 128], strides = [1, 1]} : vector<64x128xf32> to vector<8x128xf32>
    %688 = arith.addf %686, %687 : vector<8x128xf32>
    %689 = vector.extract_strided_slice %683 {offsets = [24, 0], sizes = [8, 128], strides = [1, 1]} : vector<64x128xf32> to vector<8x128xf32>
    %690 = arith.addf %688, %689 : vector<8x128xf32>
    %691 = vector.extract_strided_slice %683 {offsets = [32, 0], sizes = [8, 128], strides = [1, 1]} : vector<64x128xf32> to vector<8x128xf32>
    %692 = arith.addf %690, %691 : vector<8x128xf32>
    %693 = vector.extract_strided_slice %683 {offsets = [40, 0], sizes = [8, 128], strides = [1, 1]} : vector<64x128xf32> to vector<8x128xf32>
    %694 = arith.addf %692, %693 : vector<8x128xf32>
    %695 = vector.extract_strided_slice %683 {offsets = [48, 0], sizes = [8, 128], strides = [1, 1]} : vector<64x128xf32> to vector<8x128xf32>
    %696 = arith.addf %694, %695 : vector<8x128xf32>
    %697 = vector.extract_strided_slice %683 {offsets = [56, 0], sizes = [8, 128], strides = [1, 1]} : vector<64x128xf32> to vector<8x128xf32>
    %698 = arith.addf %696, %697 : vector<8x128xf32>
    %c32_275 = arith.constant 32 : index
    %c0_276 = arith.constant 0 : index
    %699 = vector.load %arg7[%c32_275, %c0_276] : memref<48x128xf32, #tpu.memory_space<vmem>>, vector<8x128xf32>
    %700 = arith.addf %699, %698 : vector<8x128xf32>
    %c32_277 = arith.constant 32 : index
    %c0_278 = arith.constant 0 : index
    %701 = vector.load %arg7[%c32_277, %c0_278] : memref<48x128xf32, #tpu.memory_space<vmem>>, vector<8x128xf32>
    tpu.vector_store %arg7[%c32_277, %c0_278], %700 {strides = array<i32>} : memref<48x128xf32, #tpu.memory_space<vmem>>, vector<8x128xf32>,
    %c2_279 = arith.constant 2 : index
    %c192_280 = arith.constant 192 : index
    %c0_281 = arith.constant 0 : index
    %702 = vector.load %arg5[%c2_279, %c192_280, %c0_281] : memref<3x256x128xbf16, #tpu.memory_space<vmem>>, vector<1x64x128xbf16>
    %703 = vector.shape_cast %702 : vector<1x64x128xbf16> to vector<64x128xbf16>
    %704 = arith.extf %703 : vector<64x128xbf16> to vector<64x128xf32>
    %705 = arith.mulf %657, %704 : vector<64x128xf32>
    %706 = vector.extract_strided_slice %705 {offsets = [0, 0], sizes = [8, 128], strides = [1, 1]} : vector<64x128xf32> to vector<8x128xf32>
    %707 = vector.extract_strided_slice %705 {offsets = [8, 0], sizes = [8, 128], strides = [1, 1]} : vector<64x128xf32> to vector<8x128xf32>
    %708 = arith.addf %706, %707 : vector<8x128xf32>
    %709 = vector.extract_strided_slice %705 {offsets = [16, 0], sizes = [8, 128], strides = [1, 1]} : vector<64x128xf32> to vector<8x128xf32>
    %710 = arith.addf %708, %709 : vector<8x128xf32>
    %711 = vector.extract_strided_slice %705 {offsets = [24, 0], sizes = [8, 128], strides = [1, 1]} : vector<64x128xf32> to vector<8x128xf32>
    %712 = arith.addf %710, %711 : vector<8x128xf32>
    %713 = vector.extract_strided_slice %705 {offsets = [32, 0], sizes = [8, 128], strides = [1, 1]} : vector<64x128xf32> to vector<8x128xf32>
    %714 = arith.addf %712, %713 : vector<8x128xf32>
    %715 = vector.extract_strided_slice %705 {offsets = [40, 0], sizes = [8, 128], strides = [1, 1]} : vector<64x128xf32> to vector<8x128xf32>
    %716 = arith.addf %714, %715 : vector<8x128xf32>
    %717 = vector.extract_strided_slice %705 {offsets = [48, 0], sizes = [8, 128], strides = [1, 1]} : vector<64x128xf32> to vector<8x128xf32>
    %718 = arith.addf %716, %717 : vector<8x128xf32>
    %719 = vector.extract_strided_slice %705 {offsets = [56, 0], sizes = [8, 128], strides = [1, 1]} : vector<64x128xf32> to vector<8x128xf32>
    %720 = arith.addf %718, %719 : vector<8x128xf32>
    %c40_282 = arith.constant 40 : index
    %c0_283 = arith.constant 0 : index
    %721 = vector.load %arg7[%c40_282, %c0_283] : memref<48x128xf32, #tpu.memory_space<vmem>>, vector<8x128xf32>
    %722 = arith.addf %721, %720 : vector<8x128xf32>
    %c40_284 = arith.constant 40 : index
    %c0_285 = arith.constant 0 : index
    %723 = vector.load %arg7[%c40_284, %c0_285] : memref<48x128xf32, #tpu.memory_space<vmem>>, vector<8x128xf32>
    tpu.vector_store %arg7[%c40_284, %c0_285], %722 {strides = array<i32>} : memref<48x128xf32, #tpu.memory_space<vmem>>, vector<8x128xf32>,
    %c1_i32 = arith.constant 1 : i32
    %724 = arith.cmpi eq, %arg0, %c1_i32 : i32
    %725 = arith.extui %724 : i1 to i32
    %c0_i32_286 = arith.constant 0 : i32
    %726 = arith.cmpi ne, %725, %c0_i32_286 : i32
    scf.if %726 {
      %c0_287 = arith.constant 0 : index
      %c0_288 = arith.constant 0 : index
      %727 = vector.load %arg7[%c0_287, %c0_288] : memref<48x128xf32, #tpu.memory_space<vmem>>, vector<8x128xf32>
      %cst_289 = arith.constant dense<0.000000e+00> : vector<8xf32>
      %728 = vector.multi_reduction <add>, %727, %cst_289 [1] : vector<8x128xf32> to vector<8xf32>
      %729 = vector.shape_cast %728 : vector<8xf32> to vector<8x1xf32>
      %cst_290 = arith.constant dense<0.000000e+00> : vector<1xf32>
      %730 = vector.multi_reduction <add>, %729, %cst_290 [0] : vector<8x1xf32> to vector<1xf32>
      %731 = vector.shape_cast %730 : vector<1xf32> to vector<1x1xf32>
      %c0_291 = arith.constant 0 : index
      %732 = memref.load %arg3[%c0_291] : memref<3xf32, #tpu.memory_space<smem>>
      %733 = vector.broadcast %732 : f32 to vector<1x1xf32>
      %734 = arith.addf %731, %733 : vector<1x1xf32>
      %c0_292 = arith.constant 0 : index
      %c0_293 = arith.constant 0 : index
      %735 = vector.load %arg8[%c0_292, %c0_293] : memref<2x3xf32, #tpu.memory_space<vmem>>, vector<1x1xf32>
      tpu.vector_store %arg8[%c0_292, %c0_293], %734 {strides = array<i32>} : memref<2x3xf32, #tpu.memory_space<vmem>>, vector<1x1xf32>,
      %c8_294 = arith.constant 8 : index
      %c0_295 = arith.constant 0 : index
      %736 = vector.load %arg7[%c8_294, %c0_295] : memref<48x128xf32, #tpu.memory_space<vmem>>, vector<8x128xf32>
      %cst_296 = arith.constant dense<0.000000e+00> : vector<8xf32>
      %737 = vector.multi_reduction <add>, %736, %cst_296 [1] : vector<8x128xf32> to vector<8xf32>
      %738 = vector.shape_cast %737 : vector<8xf32> to vector<8x1xf32>
      %cst_297 = arith.constant dense<0.000000e+00> : vector<1xf32>
      %739 = vector.multi_reduction <add>, %738, %cst_297 [0] : vector<8x1xf32> to vector<1xf32>
      %740 = vector.shape_cast %739 : vector<1xf32> to vector<1x1xf32>
      %c1_298 = arith.constant 1 : index
      %741 = memref.load %arg3[%c1_298] : memref<3xf32, #tpu.memory_space<smem>>
      %742 = vector.broadcast %741 : f32 to vector<1x1xf32>
      %743 = arith.addf %740, %742 : vector<1x1xf32>
      %c0_299 = arith.constant 0 : index
      %c1_300 = arith.constant 1 : index
      %744 = vector.load %arg8[%c0_299, %c1_300] : memref<2x3xf32, #tpu.memory_space<vmem>>, vector<1x1xf32>
      tpu.vector_store %arg8[%c0_299, %c1_300], %743 {strides = array<i32>} : memref<2x3xf32, #tpu.memory_space<vmem>>, vector<1x1xf32>,
      %c16_301 = arith.constant 16 : index
      %c0_302 = arith.constant 0 : index
      %745 = vector.load %arg7[%c16_301, %c0_302] : memref<48x128xf32, #tpu.memory_space<vmem>>, vector<8x128xf32>
      %cst_303 = arith.constant dense<0.000000e+00> : vector<8xf32>
      %746 = vector.multi_reduction <add>, %745, %cst_303 [1] : vector<8x128xf32> to vector<8xf32>
      %747 = vector.shape_cast %746 : vector<8xf32> to vector<8x1xf32>
      %cst_304 = arith.constant dense<0.000000e+00> : vector<1xf32>
      %748 = vector.multi_reduction <add>, %747, %cst_304 [0] : vector<8x1xf32> to vector<1xf32>
      %749 = vector.shape_cast %748 : vector<1xf32> to vector<1x1xf32>
      %c2_305 = arith.constant 2 : index
      %750 = memref.load %arg3[%c2_305] : memref<3xf32, #tpu.memory_space<smem>>
      %751 = vector.broadcast %750 : f32 to vector<1x1xf32>
      %752 = arith.addf %749, %751 : vector<1x1xf32>
      %c0_306 = arith.constant 0 : index
      %c2_307 = arith.constant 2 : index
      %753 = vector.load %arg8[%c0_306, %c2_307] : memref<2x3xf32, #tpu.memory_space<vmem>>, vector<1x1xf32>
      tpu.vector_store %arg8[%c0_306, %c2_307], %752 {strides = array<i32>} : memref<2x3xf32, #tpu.memory_space<vmem>>, vector<1x1xf32>,
      %c24_308 = arith.constant 24 : index
      %c0_309 = arith.constant 0 : index
      %754 = vector.load %arg7[%c24_308, %c0_309] : memref<48x128xf32, #tpu.memory_space<vmem>>, vector<8x128xf32>
      %cst_310 = arith.constant dense<0.000000e+00> : vector<8xf32>
      %755 = vector.multi_reduction <add>, %754, %cst_310 [1] : vector<8x128xf32> to vector<8xf32>
      %756 = vector.shape_cast %755 : vector<8xf32> to vector<8x1xf32>
      %cst_311 = arith.constant dense<0.000000e+00> : vector<1xf32>
      %757 = vector.multi_reduction <add>, %756, %cst_311 [0] : vector<8x1xf32> to vector<1xf32>
      %758 = vector.shape_cast %757 : vector<1xf32> to vector<1x1xf32>
      %c0_312 = arith.constant 0 : index
      %759 = memref.load %arg3[%c0_312] : memref<3xf32, #tpu.memory_space<smem>>
      %760 = vector.broadcast %759 : f32 to vector<1x1xf32>
      %761 = arith.addf %758, %760 : vector<1x1xf32>
      %c1_313 = arith.constant 1 : index
      %c0_314 = arith.constant 0 : index
      %762 = vector.load %arg8[%c1_313, %c0_314] : memref<2x3xf32, #tpu.memory_space<vmem>>, vector<1x1xf32>
      tpu.vector_store %arg8[%c1_313, %c0_314], %761 {strides = array<i32>} : memref<2x3xf32, #tpu.memory_space<vmem>>, vector<1x1xf32>,
      %c32_315 = arith.constant 32 : index
      %c0_316 = arith.constant 0 : index
      %763 = vector.load %arg7[%c32_315, %c0_316] : memref<48x128xf32, #tpu.memory_space<vmem>>, vector<8x128xf32>
      %cst_317 = arith.constant dense<0.000000e+00> : vector<8xf32>
      %764 = vector.multi_reduction <add>, %763, %cst_317 [1] : vector<8x128xf32> to vector<8xf32>
      %765 = vector.shape_cast %764 : vector<8xf32> to vector<8x1xf32>
      %cst_318 = arith.constant dense<0.000000e+00> : vector<1xf32>
      %766 = vector.multi_reduction <add>, %765, %cst_318 [0] : vector<8x1xf32> to vector<1xf32>
      %767 = vector.shape_cast %766 : vector<1xf32> to vector<1x1xf32>
      %c1_319 = arith.constant 1 : index
      %768 = memref.load %arg3[%c1_319] : memref<3xf32, #tpu.memory_space<smem>>
      %769 = vector.broadcast %768 : f32 to vector<1x1xf32>
      %770 = arith.addf %767, %769 : vector<1x1xf32>
      %c1_320 = arith.constant 1 : index
      %c1_321 = arith.constant 1 : index
      %771 = vector.load %arg8[%c1_320, %c1_321] : memref<2x3xf32, #tpu.memory_space<vmem>>, vector<1x1xf32>
      tpu.vector_store %arg8[%c1_320, %c1_321], %770 {strides = array<i32>} : memref<2x3xf32, #tpu.memory_space<vmem>>, vector<1x1xf32>,
      %c40_322 = arith.constant 40 : index
      %c0_323 = arith.constant 0 : index
      %772 = vector.load %arg7[%c40_322, %c0_323] : memref<48x128xf32, #tpu.memory_space<vmem>>, vector<8x128xf32>
      %cst_324 = arith.constant dense<0.000000e+00> : vector<8xf32>
      %773 = vector.multi_reduction <add>, %772, %cst_324 [1] : vector<8x128xf32> to vector<8xf32>
      %774 = vector.shape_cast %773 : vector<8xf32> to vector<8x1xf32>
      %cst_325 = arith.constant dense<0.000000e+00> : vector<1xf32>
      %775 = vector.multi_reduction <add>, %774, %cst_325 [0] : vector<8x1xf32> to vector<1xf32>
      %776 = vector.shape_cast %775 : vector<1xf32> to vector<1x1xf32>
      %c2_326 = arith.constant 2 : index
      %777 = memref.load %arg3[%c2_326] : memref<3xf32, #tpu.memory_space<smem>>
      %778 = vector.broadcast %777 : f32 to vector<1x1xf32>
      %779 = arith.addf %776, %778 : vector<1x1xf32>
      %c1_327 = arith.constant 1 : index
      %c2_328 = arith.constant 2 : index
      %780 = vector.load %arg8[%c1_327, %c2_328] : memref<2x3xf32, #tpu.memory_space<vmem>>, vector<1x1xf32>
      tpu.vector_store %arg8[%c1_327, %c2_328], %779 {strides = array<i32>} : memref<2x3xf32, #tpu.memory_space<vmem>>, vector<1x1xf32>,
      %c0_329 = arith.constant 0 : index
      %c0_330 = arith.constant 0 : index
      %781 = vector.load %arg8[%c0_329, %c0_330] : memref<2x3xf32, #tpu.memory_space<vmem>>, vector<2x3xf32>
      %cst_331 = arith.constant dense<0xFF800000> : vector<2xf32>
      %782 = vector.multi_reduction <maximumf>, %781, %cst_331 [1] : vector<2x3xf32> to vector<2xf32>
      %783 = vector.shape_cast %782 : vector<2xf32> to vector<2x1xf32>
      %784 = vector.broadcast %783 : vector<2x1xf32> to vector<2x3xf32>
      %785 = arith.subf %781, %784 : vector<2x3xf32>
      %786 = math.exp %785 : vector<2x3xf32>
      %cst_332 = arith.constant dense<0.000000e+00> : vector<2xf32>
      %787 = vector.multi_reduction <add>, %786, %cst_332 [1] : vector<2x3xf32> to vector<2xf32>
      %788 = vector.shape_cast %787 : vector<2xf32> to vector<2x1xf32>
      %789 = vector.broadcast %788 : vector<2x1xf32> to vector<2x3xf32>
      %790 = arith.divf %786, %789 : vector<2x3xf32>
      %c0_333 = arith.constant 0 : index
      %c0_334 = arith.constant 0 : index
      %791 = vector.load %arg6[%c0_333, %c0_334] : memref<2x3xf32, #tpu.memory_space<vmem>>, vector<2x3xf32>
      tpu.vector_store %arg6[%c0_333, %c0_334], %790 {strides = array<i32>} : memref<2x3xf32, #tpu.memory_space<vmem>>, vector<2x3xf32>,
    } else {
    }
    return
  }
  func.func @transform_0(%arg0: i32) -> i32 {
    %c0_i32 = arith.constant 0 : i32
    %c0_i32_0 = arith.constant 0 : i32
    return %c0_i32 : i32
  }
  func.func @transform_1(%arg0: i32) -> i32 {
    %c0_i32 = arith.constant 0 : i32
    %c0_i32_0 = arith.constant 0 : i32
    return %c0_i32 : i32
  }
  func.func @transform_2(%arg0: i32) -> i32 {
    %c0_i32 = arith.constant 0 : i32
    %c0_i32_0 = arith.constant 0 : i32
    return %c0_i32 : i32
  }
  func.func @transform_3(%arg0: i32) -> (i32, i32, i32, i32) {
    %c0_i32 = arith.constant 0 : i32
    %c0_i32_0 = arith.constant 0 : i32
    %c0_i32_1 = arith.constant 0 : i32
    %c0_i32_2 = arith.constant 0 : i32
    return %c0_i32, %c0_i32_0, %arg0, %c0_i32_1 : i32, i32, i32, i32
  }
  func.func @transform_4(%arg0: i32) -> (i32, i32, i32) {
    %c0_i32 = arith.constant 0 : i32
    %c0_i32_0 = arith.constant 0 : i32
    %c0_i32_1 = arith.constant 0 : i32
    return %c0_i32, %arg0, %c0_i32_0 : i32, i32, i32
  }
  func.func @transform_5(%arg0: i32) -> (i32, i32) {
    %c0_i32 = arith.constant 0 : i32
    %c0_i32_0 = arith.constant 0 : i32
    %c0_i32_1 = arith.constant 0 : i32
    return %c0_i32, %c0_i32_0 : i32, i32
  }
}

</mosaic_0001>

<bundles_post_ra>
// kernel: unet_classifier_forward.1
= control target key start
LH: loop header
LB: loop body
LE: loop exit
PB: predicated region body
PF: predicated region fallthrough
CT: control target
= control target key end

     0   :  { %s6910_s0 = inlined_call_operand.vmem [shape: f32[3], index: 0, kind: input, shape index: {}]   ;;  %s6911_s1 = inlined_call_operand.<no memory space> [shape: f32[1], index: 1, kind: input, shape index: {}]   ;;  %s6912_s2 = inlined_call_operand.vmem [shape: f32[3], index: 2, kind: input, shape index: {}]   ;;  %s6913_s3 = inlined_call_operand.vmem [shape: f32[2,3,512,128], index: 3, kind: input, shape index: {}]   ;;  %s6914_s4 = inlined_call_operand.vmem [shape: bf16[3,512,128], index: 4, kind: input, shape index: {}]   ;;  %s6915_s5 = inlined_call_operand.hbm [shape: f32[2,3], index: 5, kind: output, shape index: {}]  }
   0x1   :  { %10 = sst [smem:[#allocation4]] %s6911_s1 }
   0x2   :  { %11 = vsyncpa [#allocation7], 0 }
   0x3   :  { %12 = vsyncpa [#allocation9], 0 }
   0x4   :  { %13 = vsyncpa [#allocation6], 0  ;;  %s4832_s20 = smov 0   ;;  %s4834_s21 = smov 0  }
   0x5   :  { %s4836_s22 = smov 0  }
   0x6 LB: > { %s4848_s1 = sadd.s32 4294967295, %s4793_s22   ;;  %s4851_s23 = sadd.s32 1, %s4793_s22   ;;  %s4793_s22 = sphi %s4836_s22, %s7286_s22   ;;  %s4789_s21 = sphi %s4834_s21, %s7285_s21   ;;  %s4785_s20 = sphi %s4832_s20, %s7284_s20  }
   0x7   : > { %s86_s24 = ssub.s32 %s4793_s22, %s4851_s23  ;;  %s89_s25 = sadd.s32 1, %s4789_s21 }
   0x8   : > { %p87_p0 = scmp.eq.s32.totalorder %s86_s24, 0  ;;  %p96_p1 = scmp.ne.s32.totalorder %s4789_s21, %s4785_s20 }
   0x9   : > { %p97_p2 = scmp.eq.s32.totalorder %s4793_s22, 0  ;;  %p3517_p3 = scmp.ge.s32.totalorder %s4793_s22, 1 }
   0xa   : > { %s4861_s26 = scalar_select %p87_p0, %s4789_s21, %s89_s25  }
   0xb   : > { %p4863_p4 = por %p97_p2, %p96_p1  ;;  %p160_p5 = scmp.lt.s32.totalorder %s4793_s22, 3 }
   0xc   : > { %p6916_p7 = scmp.eq.s32.totalorder %s4848_s1, 0  ;;  %s173_s6 = sshll.u32 %s6910_s0, 4  ;;  %s174_s6 = int_to_ptr.vmem [resolvable:$true] %s173_s6 }
   0xd   : > { %s7025_s27 = scalar_select %p4863_p4, 1, 0 }
   0xe   : > { %p4870_p8 = pnand %p3517_p3, %p160_p5  ;;  %s187_s9 = sshll.u32 %s6912_s2, 4  ;;  %s188_s9 = int_to_ptr.vmem [resolvable:$true] %s187_s9 }
   0xf   : > { %s4703_s11 = scalar_lea.vmem %s174_s6, 16  ;;  %p4711_p1 = scmp.lt.s32.totalorder %s174_s6, %s174_s6 }
  0x10   : > { %s7026_s28 = scalar_select %p4870_p8, 1, 0 }
  0x11   : > { %p4402_p9 = pneg %p4870_p8  ;;  %p4704_p11 = scmp.ne.s32.totalorder %s174_s6, %s4703_s11 }
  0x12   : > { %p4712_p2 = scmp.lt.s32.totalorder %s4703_s11, %s4703_s11 }
  0x13   : > { %p4884_p10 = pnand %p6916_p7, %p4402_p9 }
  0x14   : > { %p4713_p3 = por %p4712_p2, %p4711_p1 }
  0x15   : > { %p4705_p12 = pneg %p4884_p10 }
  0x17   : > { %p4706_p13 = pnand %p4705_p12, %p4704_p11 }
  0x19   : > { %p4707_p0 = pneg %p4706_p13 }
  0x1b   : > { %p4714_p5 = pnand %p4713_p3, %p4707_p0 }
  0x1d   : > { %4717 = shalt.err (!%p4714_p5)
}
  0x1e   : > { %s4795_s12 = smov [#allocation5]   ;;  %s4718_s13 = scalar_lea.vmem %s188_s9, 16 }
  0x1f   : > { %4405 = dma.vmem_to_smem (!%p4884_p10), %s174_s6, 16, %s4795_s12, [#allocation7]  }
  0x20   : > { %p4719_p9 = scmp.ne.s32.totalorder %s188_s9, %s4718_s13  ;;  %p4726_p8 = scmp.lt.s32.totalorder %s188_s9, %s188_s9 }
  0x21   : > { %p4727_p4 = scmp.lt.s32.totalorder %s4718_s13, %s4718_s13 }
  0x22   : > { %p4721_p6 = pnand %p4719_p9, %p4705_p12 }
  0x23   : > { %p4728_p11 = por %p4727_p4, %p4726_p8 }
  0x24   : > { %p4722_p7 = pneg %p4721_p6 }
  0x26   : > { %p4729_p13 = pnand %p4728_p11, %p4722_p7 }
  0x28   : > { %4732 = shalt.err (!%p4729_p13)
}
  0x29   : > { %s4796_s14 = smov [#allocation8]   ;;  %p3520_p0 = scmp.ge.s32.totalorder %s4793_s22, 2 }
  0x2a   : > { %4408 = dma.vmem_to_smem (!%p4884_p10), %s188_s9, 16, %s4796_s14, [#allocation9]  }
  0x2b   : > { %194 = sbr.rel (%p3520_p0) target bundleno = 181 (0xb5), region = 28  ;;  %p7028_p1 = scmp.ne.s32.totalorder (!%p3520_p0), %s7025_s27, 0 }
  0x32   : > { %197 = sbr.rel (!%p7028_p1) target bundleno = 151 (0x97), region = 32  ;;  %s199_s15 = sand.u32 (%p7028_p1), 1, %s4789_s21  }
  0x33   : > { %s3906_s16 = sshll.u32 (%p7028_p1), %s4793_s22, 8  ;;  %s4386_s17 = smul.u32 (%p7028_p1), 1536, %s199_s15 }
  0x34   : > { %s4902_s24 = scalar_lea.vmem (%p7028_p1), %s6913_s3, %s3906_s16 }
  0x35   : > { %v614_v0 = vld [vmem:[%s4902_s24] sm:$0xff] (%p7028_p1)  ;;  %v616_v1 = vld [vmem:[%s4902_s24 + $0x8] sm:$0xff] (%p7028_p1)  ;;  %v618_v2 = vld [vmem:[%s4902_s24 + $0x10] sm:$0xff] (%p7028_p1)  ;;  %s4910_s25 = scalar_lea.vmem (%p7028_p1), [#allocation10], %s4386_s17 }
  0x36   : > { %v620_v3 = vld [vmem:[%s4902_s24 + $0x18] sm:$0xff] (%p7028_p1)  ;;  %v622_v4 = vld [vmem:[%s4902_s24 + $0x20] sm:$0xff] (%p7028_p1)  ;;  %v624_v5 = vld [vmem:[%s4902_s24 + $0x28] sm:$0xff] (%p7028_p1)  ;;  %615 = vst [vmem:[%s4910_s25] sm:$0xff] (%p7028_p1), %v614_v0 }
  0x37   : > { %617 = vst [vmem:[%s4910_s25 + $0x8] sm:$0xff] (%p7028_p1), %v616_v1  ;;  %619 = vst [vmem:[%s4910_s25 + $0x10] sm:$0xff] (%p7028_p1), %v618_v2  ;;  %v626_v6 = vld [vmem:[%s4902_s24 + $0x30] sm:$0xff] (%p7028_p1)  ;;  %v628_v7 = vld [vmem:[%s4902_s24 + $0x38] sm:$0xff] (%p7028_p1) }
  0x38   : > { %621 = vst [vmem:[%s4910_s25 + $0x18] sm:$0xff] (%p7028_p1), %v620_v3  ;;  %623 = vst [vmem:[%s4910_s25 + $0x20] sm:$0xff] (%p7028_p1), %v622_v4  ;;  %v630_v8 = vld [vmem:[%s4902_s24 + $0x40] sm:$0xff] (%p7028_p1)  ;;  %v632_v9 = vld [vmem:[%s4902_s24 + $0x48] sm:$0xff] (%p7028_p1) }
  0x39   : > { %625 = vst [vmem:[%s4910_s25 + $0x28] sm:$0xff] %v624_v5  ;;  %627 = vst [vmem:[%s4910_s25 + $0x30] sm:$0xff] %v626_v6  ;;  %v634_v10 = vld [vmem:[%s4902_s24 + $0x50] sm:$0xff]  ;;  %v636_v11 = vld [vmem:[%s4902_s24 + $0x58] sm:$0xff] }
  0x3a   : > { %629 = vst [vmem:[%s4910_s25 + $0x38] sm:$0xff] %v628_v7  ;;  %631 = vst [vmem:[%s4910_s25 + $0x40] sm:$0xff] %v630_v8  ;;  %v638_v12 = vld [vmem:[%s4902_s24 + $0x60] sm:$0xff]  ;;  %v640_v13 = vld [vmem:[%s4902_s24 + $0x68] sm:$0xff] }
  0x3b   : > { %633 = vst [vmem:[%s4910_s25 + $0x48] sm:$0xff] %v632_v9  ;;  %635 = vst [vmem:[%s4910_s25 + $0x50] sm:$0xff] %v634_v10  ;;  %v642_v14 = vld [vmem:[%s4902_s24 + $0x70] sm:$0xff]  ;;  %v644_v15 = vld [vmem:[%s4902_s24 + $0x78] sm:$0xff] }
  0x3c   : > { %637 = vst [vmem:[%s4910_s25 + $0x58] sm:$0xff] %v636_v11  ;;  %639 = vst [vmem:[%s4910_s25 + $0x60] sm:$0xff] %v638_v12  ;;  %v646_v16 = vld [vmem:[%s4902_s24 + $0x80] sm:$0xff]  ;;  %v648_v17 = vld [vmem:[%s4902_s24 + $0x88] sm:$0xff] }
  0x3d   : > { %641 = vst [vmem:[%s4910_s25 + $0x68] sm:$0xff] %v640_v13  ;;  %643 = vst [vmem:[%s4910_s25 + $0x70] sm:$0xff] %v642_v14  ;;  %v650_v18 = vld [vmem:[%s4902_s24 + $0x90] sm:$0xff]  ;;  %v652_v19 = vld [vmem:[%s4902_s24 + $0x98] sm:$0xff] }
  0x3e   : > { %645 = vst [vmem:[%s4910_s25 + $0x78] sm:$0xff] %v644_v15  ;;  %647 = vst [vmem:[%s4910_s25 + $0x80] sm:$0xff] %v646_v16  ;;  %v654_v20 = vld [vmem:[%s4902_s24 + $0xa0] sm:$0xff]  ;;  %v656_v21 = vld [vmem:[%s4902_s24 + $0xa8] sm:$0xff] }
  0x3f   : > { %649 = vst [vmem:[%s4910_s25 + $0x88] sm:$0xff] %v648_v17  ;;  %651 = vst [vmem:[%s4910_s25 + $0x90] sm:$0xff] %v650_v18  ;;  %v658_v22 = vld [vmem:[%s4902_s24 + $0xb0] sm:$0xff]  ;;  %v660_v23 = vld [vmem:[%s4902_s24 + $0xb8] sm:$0xff] }
  0x40   : > { %653 = vst [vmem:[%s4910_s25 + $0x98] sm:$0xff] %v652_v19  ;;  %655 = vst [vmem:[%s4910_s25 + $0xa0] sm:$0xff] %v654_v20  ;;  %v662_v24 = vld [vmem:[%s4902_s24 + $0xc0] sm:$0xff]  ;;  %v664_v25 = vld [vmem:[%s4902_s24 + $0xc8] sm:$0xff] }
  0x41   : > { %657 = vst [vmem:[%s4910_s25 + $0xa8] sm:$0xff] %v656_v21  ;;  %659 = vst [vmem:[%s4910_s25 + $0xb0] sm:$0xff] %v658_v22  ;;  %v666_v26 = vld [vmem:[%s4902_s24 + $0xd0] sm:$0xff]  ;;  %v668_v27 = vld [vmem:[%s4902_s24 + $0xd8] sm:$0xff] }
  0x42   : > { %661 = vst [vmem:[%s4910_s25 + $0xb8] sm:$0xff] %v660_v23  ;;  %663 = vst [vmem:[%s4910_s25 + $0xc0] sm:$0xff] %v662_v24  ;;  %v670_v28 = vld [vmem:[%s4902_s24 + $0xe0] sm:$0xff]  ;;  %v672_v29 = vld [vmem:[%s4902_s24 + $0xe8] sm:$0xff] }
  0x43   : > { %665 = vst [vmem:[%s4910_s25 + $0xc8] sm:$0xff] %v664_v25  ;;  %667 = vst [vmem:[%s4910_s25 + $0xd0] sm:$0xff] %v666_v26  ;;  %v674_v30 = vld [vmem:[%s4902_s24 + $0xf0] sm:$0xff]  ;;  %v676_v31 = vld [vmem:[%s4902_s24 + $0xf8] sm:$0xff] }
  0x44   : > { %669 = vst [vmem:[%s4910_s25 + $0xd8] sm:$0xff] %v668_v27  ;;  %671 = vst [vmem:[%s4910_s25 + $0xe0] sm:$0xff] %v670_v28  ;;  %v678_v32 = vld [vmem:[%s4902_s24 + $0x200] sm:$0xff]  ;;  %v680_v33 = vld [vmem:[%s4902_s24 + $0x208] sm:$0xff] }
  0x45   : > { %673 = vst [vmem:[%s4910_s25 + $0xe8] sm:$0xff] %v672_v29  ;;  %675 = vst [vmem:[%s4910_s25 + $0xf0] sm:$0xff] %v674_v30  ;;  %v682_v34 = vld [vmem:[%s4902_s24 + $0x210] sm:$0xff]  ;;  %v684_v35 = vld [vmem:[%s4902_s24 + $0x218] sm:$0xff] }
  0x46   : > { %677 = vst [vmem:[%s4910_s25 + $0xf8] sm:$0xff] %v676_v31  ;;  %679 = vst [vmem:[%s4910_s25 + $0x100] sm:$0xff] %v678_v32  ;;  %v686_v36 = vld [vmem:[%s4902_s24 + $0x220] sm:$0xff]  ;;  %v688_v37 = vld [vmem:[%s4902_s24 + $0x228] sm:$0xff] }
  0x47   : > { %681 = vst [vmem:[%s4910_s25 + $0x108] sm:$0xff] %v680_v33  ;;  %683 = vst [vmem:[%s4910_s25 + $0x110] sm:$0xff] %v682_v34  ;;  %v690_v38 = vld [vmem:[%s4902_s24 + $0x230] sm:$0xff]  ;;  %v692_v39 = vld [vmem:[%s4902_s24 + $0x238] sm:$0xff] }
  0x48   : > { %685 = vst [vmem:[%s4910_s25 + $0x118] sm:$0xff] %v684_v35  ;;  %687 = vst [vmem:[%s4910_s25 + $0x120] sm:$0xff] %v686_v36  ;;  %v694_v40 = vld [vmem:[%s4902_s24 + $0x240] sm:$0xff]  ;;  %v696_v41 = vld [vmem:[%s4902_s24 + $0x248] sm:$0xff] }
  0x49   : > { %689 = vst [vmem:[%s4910_s25 + $0x128] sm:$0xff] %v688_v37  ;;  %691 = vst [vmem:[%s4910_s25 + $0x130] sm:$0xff] %v690_v38  ;;  %v698_v42 = vld [vmem:[%s4902_s24 + $0x250] sm:$0xff]  ;;  %v700_v43 = vld [vmem:[%s4902_s24 + $0x258] sm:$0xff] }
  0x4a   : > { %693 = vst [vmem:[%s4910_s25 + $0x138] sm:$0xff] %v692_v39  ;;  %695 = vst [vmem:[%s4910_s25 + $0x140] sm:$0xff] %v694_v40  ;;  %v702_v44 = vld [vmem:[%s4902_s24 + $0x260] sm:$0xff]  ;;  %v704_v45 = vld [vmem:[%s4902_s24 + $0x268] sm:$0xff] }
  0x4b   : > { %697 = vst [vmem:[%s4910_s25 + $0x148] sm:$0xff] %v696_v41  ;;  %699 = vst [vmem:[%s4910_s25 + $0x150] sm:$0xff] %v698_v42  ;;  %v706_v46 = vld [vmem:[%s4902_s24 + $0x270] sm:$0xff]  ;;  %v708_v47 = vld [vmem:[%s4902_s24 + $0x278] sm:$0xff] }
  0x4c   : > { %701 = vst [vmem:[%s4910_s25 + $0x158] sm:$0xff] %v700_v43  ;;  %703 = vst [vmem:[%s4910_s25 + $0x160] sm:$0xff] %v702_v44  ;;  %v710_v48 = vld [vmem:[%s4902_s24 + $0x280] sm:$0xff]  ;;  %v712_v49 = vld [vmem:[%s4902_s24 + $0x288] sm:$0xff] }
  0x4d   : > { %705 = vst [vmem:[%s4910_s25 + $0x168] sm:$0xff] %v704_v45  ;;  %707 = vst [vmem:[%s4910_s25 + $0x170] sm:$0xff] %v706_v46  ;;  %v714_v50 = vld [vmem:[%s4902_s24 + $0x290] sm:$0xff]  ;;  %v716_v51 = vld [vmem:[%s4902_s24 + $0x298] sm:$0xff] }
  0x4e   : > { %709 = vst [vmem:[%s4910_s25 + $0x178] sm:$0xff] %v708_v47  ;;  %711 = vst [vmem:[%s4910_s25 + $0x180] sm:$0xff] %v710_v48  ;;  %v718_v52 = vld [vmem:[%s4902_s24 + $0x2a0] sm:$0xff]  ;;  %v720_v53 = vld [vmem:[%s4902_s24 + $0x2a8] sm:$0xff] }
  0x4f   : > { %713 = vst [vmem:[%s4910_s25 + $0x188] sm:$0xff] %v712_v49  ;;  %715 = vst [vmem:[%s4910_s25 + $0x190] sm:$0xff] %v714_v50  ;;  %v722_v54 = vld [vmem:[%s4902_s24 + $0x2b0] sm:$0xff]  ;;  %v724_v55 = vld [vmem:[%s4902_s24 + $0x2b8] sm:$0xff] }
  0x50   : > { %717 = vst [vmem:[%s4910_s25 + $0x198] sm:$0xff] %v716_v51  ;;  %719 = vst [vmem:[%s4910_s25 + $0x1a0] sm:$0xff] %v718_v52  ;;  %v726_v56 = vld [vmem:[%s4902_s24 + $0x2c0] sm:$0xff]  ;;  %v728_v57 = vld [vmem:[%s4902_s24 + $0x2c8] sm:$0xff] }
  0x51   : > { %721 = vst [vmem:[%s4910_s25 + $0x1a8] sm:$0xff] %v720_v53  ;;  %723 = vst [vmem:[%s4910_s25 + $0x1b0] sm:$0xff] %v722_v54  ;;  %v730_v58 = vld [vmem:[%s4902_s24 + $0x2d0] sm:$0xff]  ;;  %v732_v59 = vld [vmem:[%s4902_s24 + $0x2d8] sm:$0xff] }
  0x52   : > { %725 = vst [vmem:[%s4910_s25 + $0x1b8] sm:$0xff] %v724_v55  ;;  %727 = vst [vmem:[%s4910_s25 + $0x1c0] sm:$0xff] %v726_v56  ;;  %v734_v60 = vld [vmem:[%s4902_s24 + $0x2e0] sm:$0xff]  ;;  %v736_v61 = vld [vmem:[%s4902_s24 + $0x2e8] sm:$0xff] }
  0x53   : > { %729 = vst [vmem:[%s4910_s25 + $0x1c8] sm:$0xff] %v728_v57  ;;  %731 = vst [vmem:[%s4910_s25 + $0x1d0] sm:$0xff] %v730_v58  ;;  %v738_v62 = vld [vmem:[%s4902_s24 + $0x2f0] sm:$0xff]  ;;  %v740_v63 = vld [vmem:[%s4902_s24 + $0x2f8] sm:$0xff] }
  0x54   : > { %733 = vst [vmem:[%s4910_s25 + $0x1d8] sm:$0xff] %v732_v59  ;;  %735 = vst [vmem:[%s4910_s25 + $0x1e0] sm:$0xff] %v734_v60  ;;  %v742_v0 = vld [vmem:[%s4902_s24 + $0x400] sm:$0xff]  ;;  %v744_v1 = vld [vmem:[%s4902_s24 + $0x408] sm:$0xff] }
  0x55   : > { %737 = vst [vmem:[%s4910_s25 + $0x1e8] sm:$0xff] %v736_v61  ;;  %739 = vst [vmem:[%s4910_s25 + $0x1f0] sm:$0xff] %v738_v62  ;;  %v746_v2 = vld [vmem:[%s4902_s24 + $0x410] sm:$0xff]  ;;  %v748_v3 = vld [vmem:[%s4902_s24 + $0x418] sm:$0xff] }
  0x56   : > { %741 = vst [vmem:[%s4910_s25 + $0x1f8] sm:$0xff] %v740_v63  ;;  %743 = vst [vmem:[%s4910_s25 + $0x200] sm:$0xff] %v742_v0  ;;  %v750_v4 = vld [vmem:[%s4902_s24 + $0x420] sm:$0xff]  ;;  %v752_v5 = vld [vmem:[%s4902_s24 + $0x428] sm:$0xff] }
  0x57   : > { %745 = vst [vmem:[%s4910_s25 + $0x208] sm:$0xff] %v744_v1  ;;  %747 = vst [vmem:[%s4910_s25 + $0x210] sm:$0xff] %v746_v2  ;;  %v754_v6 = vld [vmem:[%s4902_s24 + $0x430] sm:$0xff]  ;;  %v756_v7 = vld [vmem:[%s4902_s24 + $0x438] sm:$0xff] }
  0x58   : > { %749 = vst [vmem:[%s4910_s25 + $0x218] sm:$0xff] %v748_v3  ;;  %751 = vst [vmem:[%s4910_s25 + $0x220] sm:$0xff] %v750_v4  ;;  %v758_v8 = vld [vmem:[%s4902_s24 + $0x440] sm:$0xff]  ;;  %v760_v9 = vld [vmem:[%s4902_s24 + $0x448] sm:$0xff] }
  0x59   : > { %753 = vst [vmem:[%s4910_s25 + $0x228] sm:$0xff] %v752_v5  ;;  %755 = vst [vmem:[%s4910_s25 + $0x230] sm:$0xff] %v754_v6  ;;  %v762_v10 = vld [vmem:[%s4902_s24 + $0x450] sm:$0xff]  ;;  %v764_v11 = vld [vmem:[%s4902_s24 + $0x458] sm:$0xff] }
  0x5a   : > { %757 = vst [vmem:[%s4910_s25 + $0x238] sm:$0xff] %v756_v7  ;;  %759 = vst [vmem:[%s4910_s25 + $0x240] sm:$0xff] %v758_v8  ;;  %v766_v12 = vld [vmem:[%s4902_s24 + $0x460] sm:$0xff]  ;;  %v768_v13 = vld [vmem:[%s4902_s24 + $0x468] sm:$0xff] }
  0x5b   : > { %761 = vst [vmem:[%s4910_s25 + $0x248] sm:$0xff] %v760_v9  ;;  %763 = vst [vmem:[%s4910_s25 + $0x250] sm:$0xff] %v762_v10  ;;  %v770_v14 = vld [vmem:[%s4902_s24 + $0x470] sm:$0xff]  ;;  %v772_v15 = vld [vmem:[%s4902_s24 + $0x478] sm:$0xff] }
  0x5c   : > { %765 = vst [vmem:[%s4910_s25 + $0x258] sm:$0xff] %v764_v11  ;;  %767 = vst [vmem:[%s4910_s25 + $0x260] sm:$0xff] %v766_v12  ;;  %v774_v16 = vld [vmem:[%s4902_s24 + $0x480] sm:$0xff]  ;;  %v776_v17 = vld [vmem:[%s4902_s24 + $0x488] sm:$0xff] }
  0x5d   : > { %769 = vst [vmem:[%s4910_s25 + $0x268] sm:$0xff] %v768_v13  ;;  %771 = vst [vmem:[%s4910_s25 + $0x270] sm:$0xff] %v770_v14  ;;  %v778_v18 = vld [vmem:[%s4902_s24 + $0x490] sm:$0xff]  ;;  %v780_v19 = vld [vmem:[%s4902_s24 + $0x498] sm:$0xff] }
  0x5e   : > { %773 = vst [vmem:[%s4910_s25 + $0x278] sm:$0xff] %v772_v15  ;;  %775 = vst [vmem:[%s4910_s25 + $0x280] sm:$0xff] %v774_v16  ;;  %v782_v20 = vld [vmem:[%s4902_s24 + $0x4a0] sm:$0xff]  ;;  %v784_v21 = vld [vmem:[%s4902_s24 + $0x4a8] sm:$0xff] }
  0x5f   : > { %777 = vst [vmem:[%s4910_s25 + $0x288] sm:$0xff] %v776_v17  ;;  %779 = vst [vmem:[%s4910_s25 + $0x290] sm:$0xff] %v778_v18  ;;  %v786_v22 = vld [vmem:[%s4902_s24 + $0x4b0] sm:$0xff]  ;;  %v788_v23 = vld [vmem:[%s4902_s24 + $0x4b8] sm:$0xff] }
  0x60   : > { %781 = vst [vmem:[%s4910_s25 + $0x298] sm:$0xff] %v780_v19  ;;  %783 = vst [vmem:[%s4910_s25 + $0x2a0] sm:$0xff] %v782_v20  ;;  %v790_v24 = vld [vmem:[%s4902_s24 + $0x4c0] sm:$0xff]  ;;  %v792_v25 = vld [vmem:[%s4902_s24 + $0x4c8] sm:$0xff] }
  0x61   : > { %785 = vst [vmem:[%s4910_s25 + $0x2a8] sm:$0xff] %v784_v21  ;;  %787 = vst [vmem:[%s4910_s25 + $0x2b0] sm:$0xff] %v786_v22  ;;  %v794_v26 = vld [vmem:[%s4902_s24 + $0x4d0] sm:$0xff]  ;;  %v796_v27 = vld [vmem:[%s4902_s24 + $0x4d8] sm:$0xff] }
  0x62   : > { %789 = vst [vmem:[%s4910_s25 + $0x2b8] sm:$0xff] %v788_v23  ;;  %791 = vst [vmem:[%s4910_s25 + $0x2c0] sm:$0xff] %v790_v24  ;;  %v798_v28 = vld [vmem:[%s4902_s24 + $0x4e0] sm:$0xff]  ;;  %v800_v29 = vld [vmem:[%s4902_s24 + $0x4e8] sm:$0xff] }
  0x63   : > { %793 = vst [vmem:[%s4910_s25 + $0x2c8] sm:$0xff] %v792_v25  ;;  %795 = vst [vmem:[%s4910_s25 + $0x2d0] sm:$0xff] %v794_v26  ;;  %v802_v30 = vld [vmem:[%s4902_s24 + $0x4f0] sm:$0xff]  ;;  %v804_v31 = vld [vmem:[%s4902_s24 + $0x4f8] sm:$0xff] }
  0x64   : > { %797 = vst [vmem:[%s4910_s25 + $0x2d8] sm:$0xff] %v796_v27  ;;  %799 = vst [vmem:[%s4910_s25 + $0x2e0] sm:$0xff] %v798_v28  ;;  %v806_v32 = vld [vmem:[%s4902_s24 + $0x600] sm:$0xff]  ;;  %v808_v33 = vld [vmem:[%s4902_s24 + $0x608] sm:$0xff] }
  0x65   : > { %801 = vst [vmem:[%s4910_s25 + $0x2e8] sm:$0xff] %v800_v29  ;;  %803 = vst [vmem:[%s4910_s25 + $0x2f0] sm:$0xff] %v802_v30  ;;  %v810_v34 = vld [vmem:[%s4902_s24 + $0x610] sm:$0xff]  ;;  %v812_v35 = vld [vmem:[%s4902_s24 + $0x618] sm:$0xff] }
  0x66   : > { %805 = vst [vmem:[%s4910_s25 + $0x2f8] sm:$0xff] %v804_v31  ;;  %807 = vst [vmem:[%s4910_s25 + $0x300] sm:$0xff] %v806_v32  ;;  %v814_v36 = vld [vmem:[%s4902_s24 + $0x620] sm:$0xff]  ;;  %v816_v37 = vld [vmem:[%s4902_s24 + $0x628] sm:$0xff] }
  0x67   : > { %809 = vst [vmem:[%s4910_s25 + $0x308] sm:$0xff] %v808_v33  ;;  %811 = vst [vmem:[%s4910_s25 + $0x310] sm:$0xff] %v810_v34  ;;  %v818_v38 = vld [vmem:[%s4902_s24 + $0x630] sm:$0xff]  ;;  %v820_v39 = vld [vmem:[%s4902_s24 + $0x638] sm:$0xff] }
  0x68   : > { %813 = vst [vmem:[%s4910_s25 + $0x318] sm:$0xff] %v812_v35  ;;  %815 = vst [vmem:[%s4910_s25 + $0x320] sm:$0xff] %v814_v36  ;;  %v822_v40 = vld [vmem:[%s4902_s24 + $0x640] sm:$0xff]  ;;  %v824_v41 = vld [vmem:[%s4902_s24 + $0x648] sm:$0xff] }
  0x69   : > { %817 = vst [vmem:[%s4910_s25 + $0x328] sm:$0xff] %v816_v37  ;;  %819 = vst [vmem:[%s4910_s25 + $0x330] sm:$0xff] %v818_v38  ;;  %v826_v42 = vld [vmem:[%s4902_s24 + $0x650] sm:$0xff]  ;;  %v828_v43 = vld [vmem:[%s4902_s24 + $0x658] sm:$0xff] }
  0x6a   : > { %821 = vst [vmem:[%s4910_s25 + $0x338] sm:$0xff] %v820_v39  ;;  %823 = vst [vmem:[%s4910_s25 + $0x340] sm:$0xff] %v822_v40  ;;  %v830_v44 = vld [vmem:[%s4902_s24 + $0x660] sm:$0xff]  ;;  %v832_v45 = vld [vmem:[%s4902_s24 + $0x668] sm:$0xff] }
  0x6b   : > { %825 = vst [vmem:[%s4910_s25 + $0x348] sm:$0xff] %v824_v41  ;;  %827 = vst [vmem:[%s4910_s25 + $0x350] sm:$0xff] %v826_v42  ;;  %v834_v46 = vld [vmem:[%s4902_s24 + $0x670] sm:$0xff]  ;;  %v836_v47 = vld [vmem:[%s4902_s24 + $0x678] sm:$0xff] }
  0x6c   : > { %829 = vst [vmem:[%s4910_s25 + $0x358] sm:$0xff] %v828_v43  ;;  %831 = vst [vmem:[%s4910_s25 + $0x360] sm:$0xff] %v830_v44  ;;  %v838_v48 = vld [vmem:[%s4902_s24 + $0x680] sm:$0xff]  ;;  %v840_v49 = vld [vmem:[%s4902_s24 + $0x688] sm:$0xff] }
  0x6d   : > { %833 = vst [vmem:[%s4910_s25 + $0x368] sm:$0xff] %v832_v45  ;;  %835 = vst [vmem:[%s4910_s25 + $0x370] sm:$0xff] %v834_v46  ;;  %v842_v50 = vld [vmem:[%s4902_s24 + $0x690] sm:$0xff]  ;;  %v844_v51 = vld [vmem:[%s4902_s24 + $0x698] sm:$0xff] }
  0x6e   : > { %837 = vst [vmem:[%s4910_s25 + $0x378] sm:$0xff] %v836_v47  ;;  %839 = vst [vmem:[%s4910_s25 + $0x380] sm:$0xff] %v838_v48  ;;  %v846_v52 = vld [vmem:[%s4902_s24 + $0x6a0] sm:$0xff]  ;;  %v848_v53 = vld [vmem:[%s4902_s24 + $0x6a8] sm:$0xff] }
  0x6f   : > { %841 = vst [vmem:[%s4910_s25 + $0x388] sm:$0xff] %v840_v49  ;;  %843 = vst [vmem:[%s4910_s25 + $0x390] sm:$0xff] %v842_v50  ;;  %v850_v54 = vld [vmem:[%s4902_s24 + $0x6b0] sm:$0xff]  ;;  %v852_v55 = vld [vmem:[%s4902_s24 + $0x6b8] sm:$0xff] }
  0x70   : > { %845 = vst [vmem:[%s4910_s25 + $0x398] sm:$0xff] %v844_v51  ;;  %847 = vst [vmem:[%s4910_s25 + $0x3a0] sm:$0xff] %v846_v52  ;;  %v854_v56 = vld [vmem:[%s4902_s24 + $0x6c0] sm:$0xff]  ;;  %v856_v57 = vld [vmem:[%s4902_s24 + $0x6c8] sm:$0xff] }
  0x71   : > { %849 = vst [vmem:[%s4910_s25 + $0x3a8] sm:$0xff] %v848_v53  ;;  %851 = vst [vmem:[%s4910_s25 + $0x3b0] sm:$0xff] %v850_v54  ;;  %v858_v58 = vld [vmem:[%s4902_s24 + $0x6d0] sm:$0xff]  ;;  %v860_v59 = vld [vmem:[%s4902_s24 + $0x6d8] sm:$0xff] }
  0x72   : > { %853 = vst [vmem:[%s4910_s25 + $0x3b8] sm:$0xff] %v852_v55  ;;  %855 = vst [vmem:[%s4910_s25 + $0x3c0] sm:$0xff] %v854_v56  ;;  %v862_v60 = vld [vmem:[%s4902_s24 + $0x6e0] sm:$0xff]  ;;  %v864_v61 = vld [vmem:[%s4902_s24 + $0x6e8] sm:$0xff] }
  0x73   : > { %857 = vst [vmem:[%s4910_s25 + $0x3c8] sm:$0xff] %v856_v57  ;;  %859 = vst [vmem:[%s4910_s25 + $0x3d0] sm:$0xff] %v858_v58  ;;  %v866_v62 = vld [vmem:[%s4902_s24 + $0x6f0] sm:$0xff]  ;;  %v868_v63 = vld [vmem:[%s4902_s24 + $0x6f8] sm:$0xff] }
  0x74   : > { %861 = vst [vmem:[%s4910_s25 + $0x3d8] sm:$0xff] %v860_v59  ;;  %863 = vst [vmem:[%s4910_s25 + $0x3e0] sm:$0xff] %v862_v60  ;;  %v870_v0 = vld [vmem:[%s4902_s24 + $0x800] sm:$0xff]  ;;  %v872_v1 = vld [vmem:[%s4902_s24 + $0x808] sm:$0xff] }
  0x75   : > { %865 = vst [vmem:[%s4910_s25 + $0x3e8] sm:$0xff] %v864_v61  ;;  %867 = vst [vmem:[%s4910_s25 + $0x3f0] sm:$0xff] %v866_v62  ;;  %v874_v2 = vld [vmem:[%s4902_s24 + $0x810] sm:$0xff]  ;;  %v876_v3 = vld [vmem:[%s4902_s24 + $0x818] sm:$0xff] }
  0x76   : > { %869 = vst [vmem:[%s4910_s25 + $0x3f8] sm:$0xff] %v868_v63  ;;  %871 = vst [vmem:[%s4910_s25 + $0x400] sm:$0xff] %v870_v0  ;;  %v878_v4 = vld [vmem:[%s4902_s24 + $0x820] sm:$0xff]  ;;  %v880_v5 = vld [vmem:[%s4902_s24 + $0x828] sm:$0xff] }
  0x77   : > { %873 = vst [vmem:[%s4910_s25 + $0x408] sm:$0xff] %v872_v1  ;;  %875 = vst [vmem:[%s4910_s25 + $0x410] sm:$0xff] %v874_v2  ;;  %v882_v6 = vld [vmem:[%s4902_s24 + $0x830] sm:$0xff]  ;;  %v884_v7 = vld [vmem:[%s4902_s24 + $0x838] sm:$0xff] }
  0x78   : > { %877 = vst [vmem:[%s4910_s25 + $0x418] sm:$0xff] %v876_v3  ;;  %879 = vst [vmem:[%s4910_s25 + $0x420] sm:$0xff] %v878_v4  ;;  %v886_v8 = vld [vmem:[%s4902_s24 + $0x840] sm:$0xff]  ;;  %v888_v9 = vld [vmem:[%s4902_s24 + $0x848] sm:$0xff] }
  0x79   : > { %881 = vst [vmem:[%s4910_s25 + $0x428] sm:$0xff] %v880_v5  ;;  %883 = vst [vmem:[%s4910_s25 + $0x430] sm:$0xff] %v882_v6  ;;  %v890_v10 = vld [vmem:[%s4902_s24 + $0x850] sm:$0xff]  ;;  %v892_v11 = vld [vmem:[%s4902_s24 + $0x858] sm:$0xff] }
  0x7a   : > { %885 = vst [vmem:[%s4910_s25 + $0x438] sm:$0xff] %v884_v7  ;;  %887 = vst [vmem:[%s4910_s25 + $0x440] sm:$0xff] %v886_v8  ;;  %v894_v12 = vld [vmem:[%s4902_s24 + $0x860] sm:$0xff]  ;;  %v896_v13 = vld [vmem:[%s4902_s24 + $0x868] sm:$0xff] }
  0x7b   : > { %889 = vst [vmem:[%s4910_s25 + $0x448] sm:$0xff] %v888_v9  ;;  %891 = vst [vmem:[%s4910_s25 + $0x450] sm:$0xff] %v890_v10  ;;  %v898_v14 = vld [vmem:[%s4902_s24 + $0x870] sm:$0xff]  ;;  %v900_v15 = vld [vmem:[%s4902_s24 + $0x878] sm:$0xff] }
  0x7c   : > { %893 = vst [vmem:[%s4910_s25 + $0x458] sm:$0xff] %v892_v11  ;;  %895 = vst [vmem:[%s4910_s25 + $0x460] sm:$0xff] %v894_v12  ;;  %v902_v16 = vld [vmem:[%s4902_s24 + $0x880] sm:$0xff]  ;;  %v904_v17 = vld [vmem:[%s4902_s24 + $0x888] sm:$0xff] }
  0x7d   : > { %897 = vst [vmem:[%s4910_s25 + $0x468] sm:$0xff] %v896_v13  ;;  %899 = vst [vmem:[%s4910_s25 + $0x470] sm:$0xff] %v898_v14  ;;  %v906_v18 = vld [vmem:[%s4902_s24 + $0x890] sm:$0xff]  ;;  %v908_v19 = vld [vmem:[%s4902_s24 + $0x898] sm:$0xff] }
  0x7e   : > { %901 = vst [vmem:[%s4910_s25 + $0x478] sm:$0xff] %v900_v15  ;;  %903 = vst [vmem:[%s4910_s25 + $0x480] sm:$0xff] %v902_v16  ;;  %v910_v20 = vld [vmem:[%s4902_s24 + $0x8a0] sm:$0xff]  ;;  %v912_v21 = vld [vmem:[%s4902_s24 + $0x8a8] sm:$0xff] }
  0x7f   : > { %905 = vst [vmem:[%s4910_s25 + $0x488] sm:$0xff] %v904_v17  ;;  %907 = vst [vmem:[%s4910_s25 + $0x490] sm:$0xff] %v906_v18  ;;  %v914_v22 = vld [vmem:[%s4902_s24 + $0x8b0] sm:$0xff]  ;;  %v916_v23 = vld [vmem:[%s4902_s24 + $0x8b8] sm:$0xff] }
  0x80   : > { %909 = vst [vmem:[%s4910_s25 + $0x498] sm:$0xff] %v908_v19  ;;  %911 = vst [vmem:[%s4910_s25 + $0x4a0] sm:$0xff] %v910_v20  ;;  %v918_v24 = vld [vmem:[%s4902_s24 + $0x8c0] sm:$0xff]  ;;  %v920_v25 = vld [vmem:[%s4902_s24 + $0x8c8] sm:$0xff] }
  0x81   : > { %913 = vst [vmem:[%s4910_s25 + $0x4a8] sm:$0xff] %v912_v21  ;;  %915 = vst [vmem:[%s4910_s25 + $0x4b0] sm:$0xff] %v914_v22  ;;  %v922_v26 = vld [vmem:[%s4902_s24 + $0x8d0] sm:$0xff]  ;;  %v924_v27 = vld [vmem:[%s4902_s24 + $0x8d8] sm:$0xff] }
  0x82   : > { %917 = vst [vmem:[%s4910_s25 + $0x4b8] sm:$0xff] %v916_v23  ;;  %919 = vst [vmem:[%s4910_s25 + $0x4c0] sm:$0xff] %v918_v24  ;;  %v926_v28 = vld [vmem:[%s4902_s24 + $0x8e0] sm:$0xff]  ;;  %v928_v29 = vld [vmem:[%s4902_s24 + $0x8e8] sm:$0xff] }
  0x83   : > { %921 = vst [vmem:[%s4910_s25 + $0x4c8] sm:$0xff] %v920_v25  ;;  %923 = vst [vmem:[%s4910_s25 + $0x4d0] sm:$0xff] %v922_v26  ;;  %v930_v30 = vld [vmem:[%s4902_s24 + $0x8f0] sm:$0xff]  ;;  %v932_v31 = vld [vmem:[%s4902_s24 + $0x8f8] sm:$0xff] }
  0x84   : > { %925 = vst [vmem:[%s4910_s25 + $0x4d8] sm:$0xff] %v924_v27  ;;  %927 = vst [vmem:[%s4910_s25 + $0x4e0] sm:$0xff] %v926_v28  ;;  %v934_v32 = vld [vmem:[%s4902_s24 + $0xa00] sm:$0xff]  ;;  %v936_v33 = vld [vmem:[%s4902_s24 + $0xa08] sm:$0xff] }
  0x85   : > { %929 = vst [vmem:[%s4910_s25 + $0x4e8] sm:$0xff] %v928_v29  ;;  %931 = vst [vmem:[%s4910_s25 + $0x4f0] sm:$0xff] %v930_v30  ;;  %v938_v34 = vld [vmem:[%s4902_s24 + $0xa10] sm:$0xff]  ;;  %v940_v35 = vld [vmem:[%s4902_s24 + $0xa18] sm:$0xff] }
  0x86   : > { %933 = vst [vmem:[%s4910_s25 + $0x4f8] sm:$0xff] %v932_v31  ;;  %935 = vst [vmem:[%s4910_s25 + $0x500] sm:$0xff] %v934_v32  ;;  %v942_v36 = vld [vmem:[%s4902_s24 + $0xa20] sm:$0xff]  ;;  %v944_v37 = vld [vmem:[%s4902_s24 + $0xa28] sm:$0xff] }
  0x87   : > { %937 = vst [vmem:[%s4910_s25 + $0x508] sm:$0xff] %v936_v33  ;;  %939 = vst [vmem:[%s4910_s25 + $0x510] sm:$0xff] %v938_v34  ;;  %v946_v38 = vld [vmem:[%s4902_s24 + $0xa30] sm:$0xff]  ;;  %v948_v39 = vld [vmem:[%s4902_s24 + $0xa38] sm:$0xff] }
  0x88   : > { %941 = vst [vmem:[%s4910_s25 + $0x518] sm:$0xff] %v940_v35  ;;  %943 = vst [vmem:[%s4910_s25 + $0x520] sm:$0xff] %v942_v36  ;;  %v950_v40 = vld [vmem:[%s4902_s24 + $0xa40] sm:$0xff]  ;;  %v952_v41 = vld [vmem:[%s4902_s24 + $0xa48] sm:$0xff] }
  0x89   : > { %945 = vst [vmem:[%s4910_s25 + $0x528] sm:$0xff] %v944_v37  ;;  %947 = vst [vmem:[%s4910_s25 + $0x530] sm:$0xff] %v946_v38  ;;  %v954_v42 = vld [vmem:[%s4902_s24 + $0xa50] sm:$0xff]  ;;  %v956_v43 = vld [vmem:[%s4902_s24 + $0xa58] sm:$0xff] }
  0x8a   : > { %949 = vst [vmem:[%s4910_s25 + $0x538] sm:$0xff] %v948_v39  ;;  %951 = vst [vmem:[%s4910_s25 + $0x540] sm:$0xff] %v950_v40  ;;  %v958_v44 = vld [vmem:[%s4902_s24 + $0xa60] sm:$0xff]  ;;  %v960_v45 = vld [vmem:[%s4902_s24 + $0xa68] sm:$0xff] }
  0x8b   : > { %953 = vst [vmem:[%s4910_s25 + $0x548] sm:$0xff] %v952_v41  ;;  %955 = vst [vmem:[%s4910_s25 + $0x550] sm:$0xff] %v954_v42  ;;  %v962_v46 = vld [vmem:[%s4902_s24 + $0xa70] sm:$0xff]  ;;  %v964_v47 = vld [vmem:[%s4902_s24 + $0xa78] sm:$0xff] }
  0x8c   : > { %957 = vst [vmem:[%s4910_s25 + $0x558] sm:$0xff] %v956_v43  ;;  %959 = vst [vmem:[%s4910_s25 + $0x560] sm:$0xff] %v958_v44  ;;  %v966_v48 = vld [vmem:[%s4902_s24 + $0xa80] sm:$0xff]  ;;  %v968_v49 = vld [vmem:[%s4902_s24 + $0xa88] sm:$0xff] }
  0x8d   : > { %961 = vst [vmem:[%s4910_s25 + $0x568] sm:$0xff] %v960_v45  ;;  %963 = vst [vmem:[%s4910_s25 + $0x570] sm:$0xff] %v962_v46  ;;  %v970_v50 = vld [vmem:[%s4902_s24 + $0xa90] sm:$0xff]  ;;  %v972_v51 = vld [vmem:[%s4902_s24 + $0xa98] sm:$0xff] }
  0x8e   : > { %965 = vst [vmem:[%s4910_s25 + $0x578] sm:$0xff] %v964_v47  ;;  %967 = vst [vmem:[%s4910_s25 + $0x580] sm:$0xff] %v966_v48  ;;  %v974_v52 = vld [vmem:[%s4902_s24 + $0xaa0] sm:$0xff]  ;;  %v976_v53 = vld [vmem:[%s4902_s24 + $0xaa8] sm:$0xff] }
  0x8f   : > { %969 = vst [vmem:[%s4910_s25 + $0x588] sm:$0xff] %v968_v49  ;;  %971 = vst [vmem:[%s4910_s25 + $0x590] sm:$0xff] %v970_v50  ;;  %v978_v54 = vld [vmem:[%s4902_s24 + $0xab0] sm:$0xff]  ;;  %v980_v55 = vld [vmem:[%s4902_s24 + $0xab8] sm:$0xff] }
  0x90   : > { %973 = vst [vmem:[%s4910_s25 + $0x598] sm:$0xff] %v972_v51  ;;  %975 = vst [vmem:[%s4910_s25 + $0x5a0] sm:$0xff] %v974_v52  ;;  %v982_v56 = vld [vmem:[%s4902_s24 + $0xac0] sm:$0xff]  ;;  %v984_v57 = vld [vmem:[%s4902_s24 + $0xac8] sm:$0xff] }
  0x91   : > { %977 = vst [vmem:[%s4910_s25 + $0x5a8] sm:$0xff] %v976_v53  ;;  %979 = vst [vmem:[%s4910_s25 + $0x5b0] sm:$0xff] %v978_v54  ;;  %v986_v58 = vld [vmem:[%s4902_s24 + $0xad0] sm:$0xff]  ;;  %v988_v59 = vld [vmem:[%s4902_s24 + $0xad8] sm:$0xff] }
  0x92   : > { %981 = vst [vmem:[%s4910_s25 + $0x5b8] sm:$0xff] %v980_v55  ;;  %983 = vst [vmem:[%s4910_s25 + $0x5c0] sm:$0xff] %v982_v56  ;;  %v990_v60 = vld [vmem:[%s4902_s24 + $0xae0] sm:$0xff]  ;;  %v992_v61 = vld [vmem:[%s4902_s24 + $0xae8] sm:$0xff] }
  0x93   : > { %985 = vst [vmem:[%s4910_s25 + $0x5c8] sm:$0xff] %v984_v57  ;;  %987 = vst [vmem:[%s4910_s25 + $0x5d0] sm:$0xff] %v986_v58  ;;  %v994_v62 = vld [vmem:[%s4902_s24 + $0xaf0] sm:$0xff]  ;;  %v996_v63 = vld [vmem:[%s4902_s24 + $0xaf8] sm:$0xff] }
  0x94   : > { %989 = vst [vmem:[%s4910_s25 + $0x5d8] sm:$0xff] %v988_v59  ;;  %991 = vst [vmem:[%s4910_s25 + $0x5e0] sm:$0xff] %v990_v60 }
  0x95   : > { %993 = vst [vmem:[%s4910_s25 + $0x5e8] sm:$0xff] %v992_v61  ;;  %995 = vst [vmem:[%s4910_s25 + $0x5f0] sm:$0xff] %v994_v62 }
  0x96   : > { %997 = vst [vmem:[%s4910_s25 + $0x5f8] sm:$0xff] %v996_v63 }
  0x97 PF: > { %p7029_p4 = scmp.ne.s32.totalorder %s7025_s27, 0 }
  0x98   : > { %s1005_s29 = sand.u32 (%p7029_p4), 1, %s4789_s21   ;;  %s3907_s30 = sshll.u32 (%p7029_p4), %s4793_s22, 7 }
  0x99   : > { %1003 = sbr.rel (!%p7029_p4) target bundleno = 181 (0xb5), region = 70  ;;  %s5297_s9 = scalar_lea.vmem (%p7029_p4), %s6914_s4, %s3907_s30 }
  0x9a   : > { %s4387_s6 = smul.u32 (%p7029_p4), 384, %s1005_s29  ;;  %v1026_v0 = vld [vmem:[%s5297_s9] sm:$0xff] (%p7029_p4)   ;;  %v1030_v1 = vld [vmem:[%s5297_s9 + $0x8] sm:$0xff] (%p7029_p4)   ;;  %v1034_v2 = vld [vmem:[%s5297_s9 + $0x10] sm:$0xff] (%p7029_p4)  }
  0x9b   : > { %v1038_v3 = vld [vmem:[%s5297_s9 + $0x18] sm:$0xff] (%p7029_p4)   ;;  %v1042_v4 = vld [vmem:[%s5297_s9 + $0x20] sm:$0xff] (%p7029_p4)   ;;  %v1046_v5 = vld [vmem:[%s5297_s9 + $0x28] sm:$0xff] (%p7029_p4)  }
  0x9c   : > { %s5305_s22 = scalar_lea.vmem (%p7029_p4), [#allocation11], %s4387_s6  ;;  %v1050_v6 = vld [vmem:[%s5297_s9 + $0x30] sm:$0xff] (%p7029_p4)   ;;  %v1054_v7 = vld [vmem:[%s5297_s9 + $0x38] sm:$0xff] (%p7029_p4)   ;;  %v1058_v8 = vld [vmem:[%s5297_s9 + $0x40] sm:$0xff] (%p7029_p4)  }
  0x9d   : > { %1027 = vst [vmem:[%s5305_s22] sm:$0xff] (%p7029_p4), %v1026_v0   ;;  %1031 = vst [vmem:[%s5305_s22 + $0x8] sm:$0xff] (%p7029_p4), %v1030_v1   ;;  %v1062_v9 = vld [vmem:[%s5297_s9 + $0x48] sm:$0xff] (%p7029_p4)   ;;  %v1066_v10 = vld [vmem:[%s5297_s9 + $0x50] sm:$0xff] (%p7029_p4)  }
  0x9e   : > { %1035 = vst [vmem:[%s5305_s22 + $0x10] sm:$0xff] (%p7029_p4), %v1034_v2   ;;  %1039 = vst [vmem:[%s5305_s22 + $0x18] sm:$0xff] (%p7029_p4), %v1038_v3   ;;  %v1070_v11 = vld [vmem:[%s5297_s9 + $0x58] sm:$0xff] (%p7029_p4)   ;;  %v1074_v12 = vld [vmem:[%s5297_s9 + $0x60] sm:$0xff] (%p7029_p4)  }
  0x9f   : > { %1043 = vst [vmem:[%s5305_s22 + $0x20] sm:$0xff] (%p7029_p4), %v1042_v4   ;;  %1047 = vst [vmem:[%s5305_s22 + $0x28] sm:$0xff] (%p7029_p4), %v1046_v5   ;;  %v1078_v13 = vld [vmem:[%s5297_s9 + $0x68] sm:$0xff] (%p7029_p4)   ;;  %v1082_v14 = vld [vmem:[%s5297_s9 + $0x70] sm:$0xff] (%p7029_p4)  }
  0xa0   : > { %1051 = vst [vmem:[%s5305_s22 + $0x30] sm:$0xff] %v1050_v6   ;;  %1055 = vst [vmem:[%s5305_s22 + $0x38] sm:$0xff] %v1054_v7   ;;  %v1086_v15 = vld [vmem:[%s5297_s9 + $0x78] sm:$0xff]   ;;  %v1090_v16 = vld [vmem:[%s5297_s9 + $0x100] sm:$0xff]  }
  0xa1   : > { %1059 = vst [vmem:[%s5305_s22 + $0x40] sm:$0xff] %v1058_v8   ;;  %1063 = vst [vmem:[%s5305_s22 + $0x48] sm:$0xff] %v1062_v9   ;;  %v1094_v17 = vld [vmem:[%s5297_s9 + $0x108] sm:$0xff]   ;;  %v1098_v18 = vld [vmem:[%s5297_s9 + $0x110] sm:$0xff]  }
  0xa2   : > { %1067 = vst [vmem:[%s5305_s22 + $0x50] sm:$0xff] %v1066_v10   ;;  %1071 = vst [vmem:[%s5305_s22 + $0x58] sm:$0xff] %v1070_v11   ;;  %v1102_v19 = vld [vmem:[%s5297_s9 + $0x118] sm:$0xff]   ;;  %v1106_v20 = vld [vmem:[%s5297_s9 + $0x120] sm:$0xff]  }
  0xa3   : > { %1075 = vst [vmem:[%s5305_s22 + $0x60] sm:$0xff] %v1074_v12   ;;  %1079 = vst [vmem:[%s5305_s22 + $0x68] sm:$0xff] %v1078_v13   ;;  %v1110_v21 = vld [vmem:[%s5297_s9 + $0x128] sm:$0xff]   ;;  %v1114_v22 = vld [vmem:[%s5297_s9 + $0x130] sm:$0xff]  }
  0xa4   : > { %1083 = vst [vmem:[%s5305_s22 + $0x70] sm:$0xff] %v1082_v14   ;;  %1087 = vst [vmem:[%s5305_s22 + $0x78] sm:$0xff] %v1086_v15   ;;  %v1118_v23 = vld [vmem:[%s5297_s9 + $0x138] sm:$0xff]   ;;  %v1122_v24 = vld [vmem:[%s5297_s9 + $0x140] sm:$0xff]  }
  0xa5   : > { %1091 = vst [vmem:[%s5305_s22 + $0x80] sm:$0xff] %v1090_v16   ;;  %1095 = vst [vmem:[%s5305_s22 + $0x88] sm:$0xff] %v1094_v17   ;;  %v1126_v25 = vld [vmem:[%s5297_s9 + $0x148] sm:$0xff]   ;;  %v1130_v26 = vld [vmem:[%s5297_s9 + $0x150] sm:$0xff]  }
  0xa6   : > { %1099 = vst [vmem:[%s5305_s22 + $0x90] sm:$0xff] %v1098_v18   ;;  %1103 = vst [vmem:[%s5305_s22 + $0x98] sm:$0xff] %v1102_v19   ;;  %v1134_v27 = vld [vmem:[%s5297_s9 + $0x158] sm:$0xff]   ;;  %v1138_v28 = vld [vmem:[%s5297_s9 + $0x160] sm:$0xff]  }
  0xa7   : > { %1107 = vst [vmem:[%s5305_s22 + $0xa0] sm:$0xff] %v1106_v20   ;;  %1111 = vst [vmem:[%s5305_s22 + $0xa8] sm:$0xff] %v1110_v21   ;;  %v1142_v29 = vld [vmem:[%s5297_s9 + $0x168] sm:$0xff]   ;;  %v1146_v30 = vld [vmem:[%s5297_s9 + $0x170] sm:$0xff]  }
  0xa8   : > { %1115 = vst [vmem:[%s5305_s22 + $0xb0] sm:$0xff] %v1114_v22   ;;  %1119 = vst [vmem:[%s5305_s22 + $0xb8] sm:$0xff] %v1118_v23   ;;  %v1150_v31 = vld [vmem:[%s5297_s9 + $0x178] sm:$0xff]   ;;  %v1154_v32 = vld [vmem:[%s5297_s9 + $0x200] sm:$0xff]  }
  0xa9   : > { %1123 = vst [vmem:[%s5305_s22 + $0xc0] sm:$0xff] %v1122_v24   ;;  %1127 = vst [vmem:[%s5305_s22 + $0xc8] sm:$0xff] %v1126_v25   ;;  %v1158_v33 = vld [vmem:[%s5297_s9 + $0x208] sm:$0xff]   ;;  %v1162_v34 = vld [vmem:[%s5297_s9 + $0x210] sm:$0xff]  }
  0xaa   : > { %1131 = vst [vmem:[%s5305_s22 + $0xd0] sm:$0xff] %v1130_v26   ;;  %1135 = vst [vmem:[%s5305_s22 + $0xd8] sm:$0xff] %v1134_v27   ;;  %v1166_v35 = vld [vmem:[%s5297_s9 + $0x218] sm:$0xff]   ;;  %v1170_v36 = vld [vmem:[%s5297_s9 + $0x220] sm:$0xff]  }
  0xab   : > { %1139 = vst [vmem:[%s5305_s22 + $0xe0] sm:$0xff] %v1138_v28   ;;  %1143 = vst [vmem:[%s5305_s22 + $0xe8] sm:$0xff] %v1142_v29   ;;  %v1174_v37 = vld [vmem:[%s5297_s9 + $0x228] sm:$0xff]   ;;  %v1178_v38 = vld [vmem:[%s5297_s9 + $0x230] sm:$0xff]  }
  0xac   : > { %1147 = vst [vmem:[%s5305_s22 + $0xf0] sm:$0xff] %v1146_v30   ;;  %1151 = vst [vmem:[%s5305_s22 + $0xf8] sm:$0xff] %v1150_v31   ;;  %v1182_v39 = vld [vmem:[%s5297_s9 + $0x238] sm:$0xff]   ;;  %v1186_v40 = vld [vmem:[%s5297_s9 + $0x240] sm:$0xff]  }
  0xad   : > { %1155 = vst [vmem:[%s5305_s22 + $0x100] sm:$0xff] %v1154_v32   ;;  %1159 = vst [vmem:[%s5305_s22 + $0x108] sm:$0xff] %v1158_v33   ;;  %v1190_v41 = vld [vmem:[%s5297_s9 + $0x248] sm:$0xff]   ;;  %v1194_v42 = vld [vmem:[%s5297_s9 + $0x250] sm:$0xff]  }
  0xae   : > { %1163 = vst [vmem:[%s5305_s22 + $0x110] sm:$0xff] %v1162_v34   ;;  %1167 = vst [vmem:[%s5305_s22 + $0x118] sm:$0xff] %v1166_v35   ;;  %v1198_v43 = vld [vmem:[%s5297_s9 + $0x258] sm:$0xff]   ;;  %v1202_v44 = vld [vmem:[%s5297_s9 + $0x260] sm:$0xff]  }
  0xaf   : > { %1171 = vst [vmem:[%s5305_s22 + $0x120] sm:$0xff] %v1170_v36   ;;  %1175 = vst [vmem:[%s5305_s22 + $0x128] sm:$0xff] %v1174_v37   ;;  %v1206_v45 = vld [vmem:[%s5297_s9 + $0x268] sm:$0xff]   ;;  %v1210_v46 = vld [vmem:[%s5297_s9 + $0x270] sm:$0xff]  }
  0xb0   : > { %1179 = vst [vmem:[%s5305_s22 + $0x130] sm:$0xff] %v1178_v38   ;;  %1183 = vst [vmem:[%s5305_s22 + $0x138] sm:$0xff] %v1182_v39   ;;  %v1214_v47 = vld [vmem:[%s5297_s9 + $0x278] sm:$0xff]  }
  0xb1   : > { %1187 = vst [vmem:[%s5305_s22 + $0x140] sm:$0xff] %v1186_v40   ;;  %1191 = vst [vmem:[%s5305_s22 + $0x148] sm:$0xff] %v1190_v41  }
  0xb2   : > { %1195 = vst [vmem:[%s5305_s22 + $0x150] sm:$0xff] %v1194_v42   ;;  %1199 = vst [vmem:[%s5305_s22 + $0x158] sm:$0xff] %v1198_v43  }
  0xb3   : > { %1203 = vst [vmem:[%s5305_s22 + $0x160] sm:$0xff] %v1202_v44   ;;  %1207 = vst [vmem:[%s5305_s22 + $0x168] sm:$0xff] %v1206_v45  }
  0xb4   : > { %1211 = vst [vmem:[%s5305_s22 + $0x170] sm:$0xff] %v1210_v46   ;;  %1215 = vst [vmem:[%s5305_s22 + $0x178] sm:$0xff] %v1214_v47  }
  0xb5 PF: > { %p7030_p6 = scmp.ne.s32.totalorder %s7026_s28, 0 }
  0xb7   : > { %1435 = sbr.rel (%p7030_p6) target bundleno = 1044 (0x414), region = 111 }
  0xbe   : > { %p7031_p7 = scmp.eq.s32.totalorder %s4848_s1, 0 }
  0xc0   : > { %4772 = dma.done.wait (%p7031_p7), [#allocation7], 16   ;;  %p7032_p8 = pmov %p7031_p7 }
  0xc1   : > { %p7033_p10 = pmov %p7031_p7 }
  0xc2   : > { %4774 = vsyncadd (%p7032_p8), [#allocation7], 4294967280 }
  0xc3   : > { %4776 = dma.done.wait (%p7033_p10), [#allocation9], 16   ;;  %p7034_p12 = pmov %p7031_p7 }
  0xc4   : > { %s1446_s27 = sand.u32 1, %s4785_s20  }
  0xc5   : > { %4778 = vsyncadd (%p7034_p12), [#allocation9], 4294967280  ;;  %s4388_s10 = smul.u32 1536, %s1446_s27 }
  0xc6   : > { %s4389_s11 = smul.u32 384, %s1446_s27 }
  0xc7   : > { %s5408_s12 = scalar_lea.vmem [#allocation10], %s4388_s10 }
  0xc8   : > { %s5410_s28 = scalar_lea.vmem [#allocation11], %s4389_s11 }
  0xc9   : > { %1459 = sfence }
  0xca   : > { %p7035_p2 = scmp.ne.s32.totalorder %s4848_s1, 0 }
  0xcb   : > { %v4797_v48 = vmov (!%p7035_p2), 0.0  }
  0xcc   : > { %1485 = sbr.rel (%p7035_p2) target bundleno = 211 (0xd3), region = 131  ;;  %1486 = vst [vmem:[#allocation2] sm:$0xff] (!%p7035_p2), %v4797_v48  ;;  %1487 = vst [vmem:[#allocation2 + $0x8] sm:$0xff] (!%p7035_p2), %v4797_v48 }
  0xcd   : > { %1488 = vst [vmem:[#allocation2 + $0x10] sm:$0xff] (!%p7035_p2), %v4797_v48  ;;  %1489 = vst [vmem:[#allocation2 + $0x18] sm:$0xff] (!%p7035_p2), %v4797_v48 }
  0xce   : > { %1490 = vst [vmem:[#allocation2 + $0x20] sm:$0xff] (!%p7035_p2), %v4797_v48  ;;  %1491 = vst [vmem:[#allocation2 + $0x28] sm:$0xff] (!%p7035_p2), %v4797_v48 }
  0xd3 PF: > { %s1493_s13 = sld [smem:[#allocation5]]  ;;  %s3529_s14 = sld [smem:[#allocation5 + $0x1]]  ;;  %v1494_v49 = vld [vmem:[%s5408_s12] sm:$0xff]  ;;  %v1495_v51 = vld [vmem:[%s5408_s12 + $0x8] sm:$0xff]  ;;  %v1496_v56 = vld [vmem:[%s5408_s12 + $0x10] sm:$0xff] }
  0xd4   : > { %s1492_s20 = sld [smem:[#allocation4]]  ;;  %s3538_s15 = sld [smem:[#allocation5 + $0x2]]  ;;  %v3530_v55 = vld [vmem:[%s5408_s12 + $0x100] sm:$0xff]  ;;  %v3531_v57 = vld [vmem:[%s5408_s12 + $0x108] sm:$0xff]  ;;  %v1497_v61 = vld [vmem:[%s5408_s12 + $0x18] sm:$0xff] }
  0xd5   : > { %v3539_v1 = vld [vmem:[%s5408_s12 + $0x200] sm:$0xff]  ;;  %v3532_v3 = vld [vmem:[%s5408_s12 + $0x110] sm:$0xff]  ;;  %v3540_v4 = vld [vmem:[%s5408_s12 + $0x208] sm:$0xff]  ;;  %s5788_s16 = sld [smem:[#allocation5]]  ;;  %s5861_s17 = sld [smem:[#allocation5 + $0x1]] }
  0xd6   : > { %v1498_v8 = vld [vmem:[%s5408_s12 + $0x20] sm:$0xff]  ;;  %v3533_v13 = vld [vmem:[%s5408_s12 + $0x118] sm:$0xff]  ;;  %v3541_v14 = vld [vmem:[%s5408_s12 + $0x210] sm:$0xff]  ;;  %s5897_s18 = sld [smem:[#allocation5 + $0x2]]  ;;  %s6289_s19 = sld [smem:[#allocation5]] }
  0xd7   : > { %v1499_v15 = vld [vmem:[%s5408_s12 + $0x28] sm:$0xff]  ;;  %v3534_v19 = vld [vmem:[%s5408_s12 + $0x120] sm:$0xff]  ;;  %v3542_v24 = vld [vmem:[%s5408_s12 + $0x218] sm:$0xff]  ;;  %s6332_s24 = sld [smem:[#allocation5 + $0x1]]  ;;  %s6344_s25 = sld [smem:[#allocation5 + $0x2]] }
  0xd8   : > { %v1500_v25 = vld [vmem:[%s5408_s12 + $0x30] sm:$0xff]  ;;  %v1501_v27 = vld [vmem:[%s5408_s12 + $0x38] sm:$0xff]  ;;  %v3535_v29 = vld [vmem:[%s5408_s12 + $0x128] sm:$0xff]  ;;  %p3897_p3 = scmp.ne.s32.totalorder %s4848_s1, 1 }
  0xd9   : > { %v5415_v50 = vstv %s1493_s13  ;;  %v5425_v58 = vstv %s3529_s14  ;;  %v3543_v37 = vld [vmem:[%s5408_s12 + $0x220] sm:$0xff]  ;;  %v3536_v40 = vld [vmem:[%s5408_s12 + $0x130] sm:$0xff]  ;;  %s6867_s29 = sld [smem:[#allocation8 + $0x1]] (!%p3897_p3)  ;;  %s6869_s30 = sld [smem:[#allocation8]] (!%p3897_p3)  ;;  %vm3341_vm0 = vcmask (!%p3897_p3), 0   ;;  %vm3355_vm1 = vcmask (!%p3897_p3), 8200  }
  0xda   : > { %v1503_v52 = vmul.f32 %v5415_v50, %v1494_v49  ;;  %v1504_v53 = vmul.f32 %v5415_v50, %v1495_v51  ;;  %v5420_v54 = vstv %s1492_s20  ;;  %v1531_v60 = vmul.f32 %v3530_v55, %v5425_v58  ;;  %v3537_v42 = vld [vmem:[%s5408_s12 + $0x138] sm:$0xff]  ;;  %v3544_v44 = vld [vmem:[%s5408_s12 + $0x228] sm:$0xff]  ;;  %s3901_s6 = sld [smem:[#allocation8 + $0x2]] (!%p3897_p3) }
  0xdb   : > { %v1505_v62 = vmul.f32 %v5415_v50, %v1496_v56  ;;  %v1532_v0 = vmul.f32 %v3531_v57, %v5425_v58  ;;  %v5434_v2 = vstv %s3538_s15  ;;  %v1506_v5 = vmul.f32 %v5415_v50, %v1497_v61  ;;  %v3545_v56 = vld [vmem:[%s5408_s12 + $0x230] sm:$0xff]  ;;  %v3546_v57 = vld [vmem:[%s5408_s12 + $0x238] sm:$0xff]  ;;  %v3571_v61 = vld [vmem:[%s5408_s12 + $0x300] sm:$0xff] }
  0xdc   : > { %v1512_v59 = vadd.f32 %v5420_v54, %v1503_v52  ;;  %v1513_v63 = vadd.f32 %v5420_v54, %v1504_v53  ;;  %v1558_v7 = vmul.f32 %v3539_v1, %v5434_v2  ;;  %v1533_v10 = vmul.f32 %v3532_v3, %v5425_v58 }
  0xdd   : > { %v1514_v9 = vadd.f32 %v5420_v54, %v1505_v62  ;;  %v1559_v12 = vmul.f32 %v3540_v4, %v5434_v2  ;;  %v1507_v16 = vmul.f32 %v5415_v50, %v1498_v8  ;;  %v1515_v17 = vadd.f32 %v5420_v54, %v1506_v5 }
  0xde   : > { %v1539_v6 = vadd.f32 %v1531_v60, %v1512_v59  ;;  %v1540_v11 = vadd.f32 %v1532_v0, %v1513_v63  ;;  %v1534_v20 = vmul.f32 %v3533_v13, %v5425_v58  ;;  %v1560_v22 = vmul.f32 %v3541_v14, %v5434_v2  ;;  %v3572_v63 = vld [vmem:[%s5408_s12 + $0x308] sm:$0xff] }
  0xdf   : > { %v1541_v21 = vadd.f32 %v1533_v10, %v1514_v9  ;;  %v1508_v26 = vmul.f32 %v5415_v50, %v1499_v15  ;;  %v1516_v28 = vadd.f32 %v5420_v54, %v1507_v16  ;;  %v1535_v30 = vmul.f32 %v3534_v19, %v5425_v58  ;;  %v3580_v9 = vld [vmem:[%s5408_s12 + $0x400] sm:$0xff] }
  0xe0   : > { %v1566_v18 = vadd.f32 %v1558_v7, %v1539_v6  ;;  %v1567_v23 = vadd.f32 %v1559_v12, %v1540_v11  ;;  %v1542_v32 = vadd.f32 %v1534_v20, %v1515_v17  ;;  %v1561_v33 = vmul.f32 %v3542_v24, %v5434_v2  ;;  %v3573_v7 = vld [vmem:[%s5408_s12 + $0x310] sm:$0xff]  ;;  %v3581_v11 = vld [vmem:[%s5408_s12 + $0x408] sm:$0xff]  ;;  %v3574_v20 = vld [vmem:[%s5408_s12 + $0x318] sm:$0xff] }
  0xe1   : > { %v1568_v34 = vadd.f32 %v1560_v22, %v1541_v21  ;;  %v1509_v36 = vmul.f32 %v5415_v50, %v1500_v25  ;;  %v1510_v38 = vmul.f32 %v5415_v50, %v1501_v27  ;;  %v1517_v39 = vadd.f32 %v5420_v54, %v1508_v26  ;;  %v3582_v25 = vld [vmem:[%s5408_s12 + $0x410] sm:$0xff]  ;;  %v3590_v26 = vld [vmem:[%s5408_s12 + $0x508] sm:$0xff] }
  0xe2   : > { %v3547_v31 = vmul.f32 -1.442695, %v1566_v18  ;;  %v3548_v35 = vmul.f32 -1.442695, %v1567_v23  ;;  %v1536_v41 = vmul.f32 %v3535_v29, %v5425_v58  ;;  %v1543_v43 = vadd.f32 %v1535_v30, %v1516_v28  ;;  %v3589_v23 = vld [vmem:[%s5408_s12 + $0x500] sm:$0xff] }
  0xe3   : > { %v1562_v45 = vmul.f32 %v3543_v37, %v5434_v2  ;;  %v1569_v46 = vadd.f32 %v1561_v33, %v1542_v32  ;;  %v3549_v47 = vmul.f32 -1.442695, %v1568_v34  ;;  %v1518_v48 = vadd.f32 %v5420_v54, %v1509_v36  ;;  %v3575_v34 = vld [vmem:[%s5408_s12 + $0x320] sm:$0xff] }
  0xe4   : > { %4443 = vpow2.f32 %v3547_v31  ;;  %v1537_v49 = vmul.f32 %v3536_v40, %v5425_v58  ;;  %v1519_v51 = vadd.f32 %v5420_v54, %v1510_v38  ;;  %v1538_v52 = vmul.f32 %v3537_v42, %v5425_v58  ;;  %v3591_v40 = vld [vmem:[%s5408_s12 + $0x510] sm:$0xff]  ;;  %v5503_v42 = vld [vmem:[%s5410_s28] sm:$0xff]  }
  0xe5   : > { %4445 = vpow2.f32 %v3548_v35  ;;  %v1544_v53 = vadd.f32 %v1536_v41, %v1517_v39  ;;  %v1563_v55 = vmul.f32 %v3544_v44, %v5434_v2  ;;  %v1570_v59 = vadd.f32 %v1562_v45, %v1543_v43  ;;  %v3583_v39 = vld [vmem:[%s5408_s12 + $0x418] sm:$0xff]  ;;  %v5506_v43 = vld [vmem:[%s5410_s28 + $0x8] sm:$0xff]  }
  0xe6   : > { %4447 = vpow2.f32 %v3549_v47  ;;  %v3550_v60 = vmul.f32 -1.442695, %v1569_v46  ;;  %v1545_v62 = vadd.f32 %v1537_v49, %v1518_v48  ;;  %v1546_v0 = vadd.f32 %v1538_v52, %v1519_v51  ;;  %v3576_v47 = vld [vmem:[%s5408_s12 + $0x328] sm:$0xff]  ;;  %v3584_v48 = vld [vmem:[%s5408_s12 + $0x420] sm:$0xff] }
  0xe7   : > { %v1564_v1 = vmul.f32 %v3545_v56, %v5434_v2  ;;  %v1565_v3 = vmul.f32 %v3546_v57, %v5434_v2  ;;  %v1571_v4 = vadd.f32 %v1563_v55, %v1544_v53  ;;  %v1737_v5 = vmul.f32 %v3571_v61, %v5415_v50  ;;  %v3592_v56 = vld [vmem:[%s5408_s12 + $0x518] sm:$0xff] }
  0xe8   : > { %4449 = vpow2.f32 %v3550_v60  ;;  %v3551_v6 = vmul.f32 -1.442695, %v1570_v59  ;;  %v1738_v8 = vmul.f32 %v3572_v63, %v5415_v50  ;;  %v1739_v16 = vmul.f32 %v3573_v7, %v5415_v50  ;;  %v5522_v63 = vld [vmem:[%s5410_s28 + $0x80] sm:$0xff]  }
  0xe9   : > { %v1572_v13 = vadd.f32 %v1564_v1, %v1545_v62  ;;  %v1573_v14 = vadd.f32 %v1565_v3, %v1546_v0  ;;  %v3552_v15 = vmul.f32 -1.442695, %v1571_v4  ;;  %v1745_v17 = vadd.f32 %v1737_v5, %v5420_v54  ;;  %v5519_v62 = vld [vmem:[%s5410_s28 + $0x10] sm:$0xff]   ;;  %v3578_v1 = vld [vmem:[%s5408_s12 + $0x338] sm:$0xff] }
  0xea   : > { %v1764_v18 = vmul.f32 %v3580_v9, %v5425_v58  ;;  %4451 = vpow2.f32 %v3551_v6  ;;  %v1746_v21 = vadd.f32 %v1738_v8, %v5420_v54  ;;  %v1765_v22 = vmul.f32 %v3581_v11, %v5425_v58  ;;  %v3577_v0 = vld [vmem:[%s5408_s12 + $0x330] sm:$0xff]  ;;  %v3585_v8 = vld [vmem:[%s5408_s12 + $0x428] sm:$0xff] }
  0xeb   : > { %4453 = vpow2.f32 %v3552_v15  ;;  %v3553_v28 = vmul.f32 -1.442695, %v1572_v13  ;;  %v3554_v29 = vmul.f32 -1.442695, %v1573_v14  ;;  %v1740_v30 = vmul.f32 %v3574_v20, %v5415_v50  ;;  %v5539_v20 = vld [vmem:[%s5410_s28 + $0x88] sm:$0xff]  }
  0xec   : > { %v1747_v31 = vadd.f32 %v1739_v16, %v5420_v54  ;;  %v1772_v32 = vadd.f32 %v1764_v18, %v1745_v17  ;;  %v1791_v33 = vmul.f32 %v3589_v23, %v5434_v2  ;;  %v1766_v35 = vmul.f32 %v3582_v25, %v5425_v58  ;;  %v3593_v16 = vld [vmem:[%s5408_s12 + $0x520] sm:$0xff] }
  0xed   : > { %v1773_v36 = vadd.f32 %v1765_v22, %v1746_v21  ;;  %v1792_v37 = vmul.f32 %v3590_v26, %v5434_v2  ;;  %v1741_v44 = vmul.f32 %v3575_v34, %v5415_v50  ;;  %v1748_v45 = vadd.f32 %v1740_v30, %v5420_v54 }
  0xee   : > { %v4444_v10 = vpop.eup %4443  ;;  %v1799_v46 = vadd.f32 %v1791_v33, %v1772_v32  ;;  %v1767_v49 = vmul.f32 %v3583_v39, %v5425_v58  ;;  %v1774_v51 = vadd.f32 %v1766_v35, %v1747_v31  ;;  %v1793_v52 = vmul.f32 %v3591_v40, %v5434_v2  ;;  %v5560_v40 = vld [vmem:[%s5410_s28 + $0x100] sm:$0xff]  }
  0xef   : > { %v4446_v12 = vpop.eup %4445  ;;  %v1598_v19 = vadd.f32 1.0, %v4444_v10  ;;  %v1800_v53 = vadd.f32 %v1792_v37, %v1773_v36  ;;  %v3910_v59 = vunpack.c.l.bf16 %v5503_v42  ;;  %v3911_v60 = vunpack.c.h.bf16 %v5503_v42  ;;  %v3587_v37 = vld [vmem:[%s5408_s12 + $0x438] sm:$0xff]  ;;  %v3628_v42 = vld [vmem:[%s5408_s12 + $0x170] sm:$0xff] }
  0xf0   : > { %v1599_v24 = vadd.f32 1.0, %v4446_v12  ;;  %v4448_v27 = vpop.eup %4447  ;;  %v3914_v61 = vunpack.c.l.bf16 %v5506_v43  ;;  %v1742_v3 = vmul.f32 %v3576_v47, %v5415_v50  ;;  %v1749_v4 = vadd.f32 %v1741_v44, %v5420_v54 }
  0xf1   : > { %4455 = vrcp.f32 %v1598_v19  ;;  %v1600_v38 = vadd.f32 1.0, %v4448_v27  ;;  %v1768_v5 = vmul.f32 %v3584_v48, %v5425_v58  ;;  %v3597_v6 = vmul.f32 -1.442695, %v1799_v46 }
  0xf2   : > { %4457 = vrcp.f32 %v1599_v24  ;;  %v4450_v41 = vpop.eup %4449  ;;  %v1775_v9 = vadd.f32 %v1767_v49, %v1748_v45  ;;  %v1794_v10 = vmul.f32 %v3592_v56, %v5434_v2  ;;  %v1801_v11 = vadd.f32 %v1793_v52, %v1774_v51  ;;  %v3595_v52 = vld [vmem:[%s5408_s12 + $0x530] sm:$0xff] }
  0xf3   : > { %4459 = vpow2.f32 %v3553_v28  ;;  %v1601_v55 = vadd.f32 1.0, %v4450_v41  ;;  %v3598_v12 = vmul.f32 -1.442695, %v1800_v53  ;;  %v6934_v14 = vunpack.c.h.bf16 %v5506_v43  ;;  %v3586_v28 = vld [vmem:[%s5408_s12 + $0x430] sm:$0xff] }
  0xf4   : > { %4461 = vpow2.f32 %v3554_v29  ;;  %v4452_v57 = vpop.eup %4451  ;;  %v6931_v15 = vunpack.c.l.bf16 %v5519_v62  ;;  %v6928_v18 = vunpack.c.h.bf16 %v5519_v62  ;;  %v3926_v19 = vunpack.c.l.bf16 %v5522_v63  ;;  %v3594_v29 = vld [vmem:[%s5408_s12 + $0x528] sm:$0xff] }
  0xf5   : > { %4463 = vrcp.f32 %v1600_v38  ;;  %v4454_v7 = vpop.eup %4453  ;;  %v1602_v13 = vadd.f32 1.0, %v4452_v57  ;;  %v1743_v21 = vmul.f32 %v3577_v0, %v5415_v50  ;;  %v1744_v22 = vmul.f32 %v3578_v1, %v5415_v50  ;;  %v3596_v1 = vld [vmem:[%s5408_s12 + $0x538] sm:$0xff] }
  0xf6   : > { %4465 = vrcp.f32 %v1601_v55  ;;  %v1750_v24 = vadd.f32 %v1742_v3, %v5420_v54  ;;  %v1769_v25 = vmul.f32 %v3585_v8, %v5425_v58  ;;  %v1776_v26 = vadd.f32 %v1768_v5, %v1749_v4  ;;  %v5574_v3 = vld [vmem:[%s5410_s28 + $0x18] sm:$0xff]   ;;  %v5586_v8 = vld [vmem:[%s5410_s28 + $0x108] sm:$0xff]  }
  0xf7   : > { %4467 = vpow2.f32 %v3597_v6  ;;  %v1795_v30 = vmul.f32 %v3593_v16, %v5434_v2  ;;  %v1802_v31 = vadd.f32 %v1794_v10, %v1775_v9  ;;  %v3599_v32 = vmul.f32 -1.442695, %v1801_v11 }
  0xf8   : > { %4469 = vpow2.f32 %v3598_v12  ;;  %v1603_v34 = vadd.f32 1.0, %v4454_v7  ;;  %v3927_v35 = vunpack.c.h.bf16 %v5522_v63  ;;  %v3930_v36 = vunpack.c.l.bf16 %v5539_v20 }
  0xf9   : > { %4471 = vrcp.f32 %v1602_v13  ;;  %v1751_v41 = vadd.f32 %v1743_v21, %v5420_v54  ;;  %v1752_v44 = vadd.f32 %v1744_v22, %v5420_v54  ;;  %v1770_v47 = vmul.f32 %v3586_v28, %v5425_v58 }
  0xfa   : > { %v1777_v48 = vadd.f32 %v1769_v25, %v1750_v24  ;;  %v1796_v49 = vmul.f32 %v3594_v29, %v5434_v2  ;;  %v1771_v51 = vmul.f32 %v3587_v37, %v5425_v58  ;;  %v1803_v53 = vadd.f32 %v1795_v30, %v1776_v26  ;;  %v5596_v30 = vld [vmem:[%s5410_s28 + $0x90] sm:$0xff]  }
  0xfb   : > { %v5534_v17 = vpop.eup %4455  ;;  %4473 = vpow2.f32 %v3599_v32  ;;  %v3600_v55 = vmul.f32 -1.442695, %v1802_v31  ;;  %v3942_v57 = vunpack.c.l.bf16 %v5560_v40  ;;  %v6933_v0 = vunpack.c.h.bf16 %v5560_v40 }
  0xfc   : > { %v5543_v23 = vpop.eup %4457  ;;  %v1638_v38 = vmul.f32 %v5534_v17, %v3910_v59  ;;  %4475 = vrcp.f32 %v1603_v34  ;;  %v1673_v6 = vmul.f32 %v5534_v17, %v3926_v19  ;;  %v1778_v10 = vadd.f32 %v1770_v47, %v1751_v41 }
  0xfd   : > { %v4460_v27 = vpop.eup %4459  ;;  %v1639_v39 = vmul.f32 %v5543_v23, %v3911_v60  ;;  %v1674_v7 = vmul.f32 %v5543_v23, %v3927_v35  ;;  %v1797_v11 = vmul.f32 %v3595_v52, %v5434_v2  ;;  %v1804_v12 = vadd.f32 %v1796_v49, %v1777_v48  ;;  %v5611_v49 = vld [vmem:[%s5410_s28 + $0x98] sm:$0xff]  }
  0xfe   : > { %v4462_v33 = vpop.eup %4461  ;;  %v1604_v46 = vadd.f32 1.0, %v4460_v27  ;;  %v1779_v13 = vadd.f32 %v1771_v51, %v1752_v44  ;;  %v1798_v16 = vmul.f32 %v3596_v1, %v5434_v2  ;;  %v3601_v21 = vmul.f32 -1.442695, %v1803_v53  ;;  %v5615_v51 = vld [vmem:[%s5410_s28 + $0x110] sm:$0xff]  }
  0xff   : > { %v5564_v45 = vpop.eup %4463  ;;  %v1605_v56 = vadd.f32 1.0, %v4462_v33  ;;  %v1646_v5 = vadd.f32 %v1639_v39, %v1638_v38  ;;  %v6919_v24 = vunpack.c.l.bf16 %v5574_v3  ;;  %v6932_v25 = vunpack.c.h.bf16 %v5539_v20 }
 0x100   : > { %v1640_v4 = vmul.f32 %v5564_v45, %v3914_v61  ;;  %v4466_v9 = vpop.eup %4465  ;;  %4477 = vrcp.f32 %v1604_v46  ;;  %v6930_v26 = vunpack.c.l.bf16 %v5586_v8  ;;  %v1675_v31 = vmul.f32 %v5564_v45, %v3930_v36 }
 0x101   : > { %4479 = vpow2.f32 %v3600_v55  ;;  %v4468_v22 = vpop.eup %4467  ;;  %v1641_v28 = vmul.f32 %v4466_v9, %v6934_v14  ;;  %v1681_v32 = vadd.f32 %v1674_v7, %v1673_v6  ;;  %v1708_v34 = vmul.f32 %v5534_v17, %v3942_v57 }
 0x102   : > { %4481 = vrcp.f32 %v1605_v56  ;;  %v4470_v27 = vpop.eup %4469  ;;  %v1647_v29 = vadd.f32 %v1646_v5, %v1640_v4  ;;  %v1709_v37 = vmul.f32 %v5543_v23, %v6933_v0  ;;  %v1805_v38 = vadd.f32 %v1797_v11, %v1778_v10  ;;  %v5622_v4 = vld [vmem:[%s5410_s28 + $0x118] sm:$0xff]  }
 0x103   : > { %v4472_v33 = vpop.eup %4471  ;;  %v3602_v39 = vmul.f32 -1.442695, %v1804_v12  ;;  %v6924_v41 = vunpack.c.h.bf16 %v5574_v3  ;;  %v1806_v44 = vadd.f32 %v1798_v16, %v1779_v13  ;;  %4483 = vpow2.f32 %v3601_v21  ;;  %7036 = vst [vmem:[#allocation16_spill] sm:$0xff] %v5622_v4 }
 0x104   : > { %v1831_v46 = vadd.f32 1.0, %v4468_v22  ;;  %v6929_v47 = vunpack.c.l.bf16 %v5596_v30  ;;  %v6920_v48 = vunpack.c.h.bf16 %v5596_v30  ;;  %v6922_v17 = vunpack.c.h.bf16 %v5586_v8 }
 0x105   : > { %v1832_v52 = vadd.f32 1.0, %v4470_v27  ;;  %v4474_v23 = vpop.eup %4473  ;;  %v1642_v53 = vmul.f32 %v4472_v33, %v6931_v15  ;;  %v1648_v55 = vadd.f32 %v1647_v29, %v1641_v28  ;;  %v1676_v56 = vmul.f32 %v4466_v9, %v6932_v25  ;;  %v3633_v15 = vld [vmem:[%s5408_s12 + $0x250] sm:$0xff] }
 0x106   : > { %v1682_v1 = vadd.f32 %v1681_v32, %v1675_v31  ;;  %v4476_v5 = vpop.eup %4475  ;;  %v1710_v6 = vmul.f32 %v5564_v45, %v6930_v26  ;;  %v1716_v7 = vadd.f32 %v1709_v37, %v1708_v34  ;;  %4485 = vpow2.f32 %v3602_v39 }
 0x107   : > { %v3603_v10 = vmul.f32 -1.442695, %v1805_v38  ;;  %v6921_v11 = vunpack.c.l.bf16 %v5611_v49  ;;  %v6918_v12 = vunpack.c.l.bf16 %v5615_v51  ;;  %v3604_v13 = vmul.f32 -1.442695, %v1806_v44 }
 0x108   : > { %4487 = vrcp.f32 %v1831_v46  ;;  %v6925_v21 = vunpack.c.h.bf16 %v5615_v51  ;;  %v6923_v22 = vunpack.c.l.bf16 %v5622_v4  ;;  %v1833_v27 = vadd.f32 1.0, %v4474_v23  ;;  %v1958_v23 = vld [vmem:[%s5408_s12 + $0x40] sm:$0xff] }
 0x109   : > { %4489 = vrcp.f32 %v1832_v52  ;;  %v1643_v45 = vmul.f32 %v4476_v5, %v6928_v18  ;;  %v1649_v29 = vadd.f32 %v1648_v55, %v1642_v53  ;;  %v1677_v31 = vmul.f32 %v4472_v33, %v6929_v47  ;;  %v1959_v53 = vld [vmem:[%s5408_s12 + $0x48] sm:$0xff] }
 0x10a   : > { %v4478_v16 = vpop.eup %4477  ;;  %v1683_v32 = vadd.f32 %v1682_v1, %v1676_v56  ;;  %v6926_v37 = vunpack.c.h.bf16 %v5611_v49  ;;  %v1711_v38 = vmul.f32 %v4466_v9, %v6922_v17  ;;  %v1717_v39 = vadd.f32 %v1716_v7, %v1710_v6  ;;  %v1960_v1 = vld [vmem:[%s5408_s12 + $0x50] sm:$0xff]  ;;  %v1961_v6 = vld [vmem:[%s5408_s12 + $0x58] sm:$0xff]  ;;  %v1962_v7 = vld [vmem:[%s5408_s12 + $0x60] sm:$0xff] }
 0x10b   : > { %v4480_v28 = vpop.eup %4479  ;;  %4491 = vpow2.f32 %v3603_v10  ;;  %v1678_v44 = vmul.f32 %v4476_v5, %v6920_v48  ;;  %v6927_v46 = vunpack.c.h.bf16 %v5622_v4  ;;  %v1712_v52 = vmul.f32 %v4472_v33, %v6918_v12  ;;  %v1963_v48 = vld [vmem:[%s5408_s12 + $0x68] sm:$0xff]  ;;  %v1965_v17 = vld [vmem:[%s5408_s12 + $0x78] sm:$0xff] }
 0x10c   : > { %v4482_v34 = vpop.eup %4481  ;;  %4493 = vpow2.f32 %v3604_v13  ;;  %v1644_v55 = vmul.f32 %v4478_v16, %v6919_v24  ;;  %v5649_v9 = vmul.f32 %v4478_v16, %v6921_v11  ;;  %v1834_v56 = vadd.f32 1.0, %v4480_v28  ;;  %v1964_v11 = vld [vmem:[%s5408_s12 + $0x70] sm:$0xff]  ;;  %v3627_v18 = vld [vmem:[%s5408_s12 + $0x168] sm:$0xff] }
 0x10d   : > { %4495 = vrcp.f32 %v1833_v27  ;;  %v4484_v10 = vpop.eup %4483  ;;  %v1650_v33 = vadd.f32 %v1649_v29, %v1643_v45  ;;  %v1684_v13 = vadd.f32 %v1683_v32, %v1677_v31  ;;  %v5656_v12 = vmul.f32 %v4476_v5, %v6925_v21 }
 0x10e   : > { %v5660_v24 = vmul.f32 %v4478_v16, %v6923_v22  ;;  %v5666_v27 = vmul.f32 %v4482_v34, %v6924_v41  ;;  %v1718_v28 = vadd.f32 %v1717_v39, %v1711_v38  ;;  %v1967_v45 = vmul.f32 %v1958_v23, %v5415_v50  ;;  %v3622_v22 = vld [vmem:[%s5408_s12 + $0x140] sm:$0xff]  ;;  %v3623_v23 = vld [vmem:[%s5408_s12 + $0x148] sm:$0xff] }
 0x10f   : > { %v1968_v29 = vmul.f32 %v1959_v53, %v5415_v50  ;;  %v5673_v5 = vmul.f32 %v4482_v34, %v6926_v37  ;;  %v1969_v16 = vmul.f32 %v1960_v1, %v5415_v50  ;;  %v1970_v31 = vmul.f32 %v1961_v6, %v5415_v50 }
 0x110   : > { %v1971_v32 = vmul.f32 %v1962_v7, %v5415_v50  ;;  %v4486_v41 = vpop.eup %4485  ;;  %v1835_v21 = vadd.f32 1.0, %v4484_v10  ;;  %4497 = vrcp.f32 %v1834_v56  ;;  %v1972_v38 = vmul.f32 %v1963_v48, %v5415_v50 }
 0x111   : > { %v1973_v39 = vmul.f32 %v1964_v11, %v5415_v50  ;;  %v5682_v37 = vadd.f32 %v1650_v33, %v1644_v55  ;;  %v5684_v1 = vadd.f32 %v1684_v13, %v1678_v44  ;;  %v5688_v6 = vmul.f32 %v4482_v34, %v6927_v46  ;;  %v3624_v55 = vld [vmem:[%s5408_s12 + $0x150] sm:$0xff] }
 0x112   : > { %v4488_v53 = vpop.eup %4487  ;;  %v1974_v7 = vmul.f32 %v1965_v17, %v5415_v50  ;;  %v5693_v48 = vadd.f32 %v1718_v28, %v1712_v52  ;;  %v1975_v11 = vadd.f32 %v1967_v45, %v5420_v54  ;;  %v1976_v10 = vadd.f32 %v1968_v29, %v5420_v54  ;;  %v3625_v50 = vld [vmem:[%s5408_s12 + $0x158] sm:$0xff]  ;;  %v3626_v17 = vld [vmem:[%s5408_s12 + $0x160] sm:$0xff] }
 0x113   : > { %v5691_v56 = vpop.eup %4489  ;;  %v1993_v44 = vmul.f32 %v3622_v22, %v5425_v58  ;;  %v1977_v33 = vadd.f32 %v1969_v16, %v5420_v54  ;;  %v1978_v34 = vadd.f32 %v1970_v31, %v5420_v54  ;;  %v1979_v13 = vadd.f32 %v1971_v32, %v5420_v54  ;;  %v3631_v28 = vld [vmem:[%s5408_s12 + $0x240] sm:$0xff]  ;;  %v3632_v16 = vld [vmem:[%s5408_s12 + $0x248] sm:$0xff] }
 0x114   : > { %v1994_v52 = vmul.f32 %v3623_v23, %v5425_v58  ;;  %v1836_v45 = vadd.f32 1.0, %v4486_v41  ;;  %4499 = vrcp.f32 %v1835_v21  ;;  %v1980_v29 = vadd.f32 %v1972_v38, %v5420_v54 }
 0x115   : > { %v4492_v46 = vpop.eup %4491  ;;  %v1981_v22 = vadd.f32 %v1973_v39, %v5420_v54  ;;  %v1871_v32 = vmul.f32 %v4488_v53, %v3910_v59  ;;  %v1872_v23 = vmul.f32 %v5691_v56, %v3911_v60  ;;  %v1982_v47 = vadd.f32 %v1974_v7, %v5420_v54  ;;  %v3634_v7 = vld [vmem:[%s5408_s12 + $0x258] sm:$0xff] }
 0x116   : > { %v4494_v31 = vpop.eup %4493  ;;  %v1995_v41 = vmul.f32 %v3624_v55, %v5425_v58  ;;  %v1996_v38 = vmul.f32 %v3625_v50, %v5425_v58  ;;  %v1997_v39 = vmul.f32 %v3626_v17, %v5425_v58  ;;  %v2001_v26 = vadd.f32 %v1993_v44, %v1975_v11  ;;  %v3629_v44 = vld [vmem:[%s5408_s12 + $0x178] sm:$0xff] }
 0x117   : > { %v5717_v21 = vpop.eup %4495  ;;  %v2019_v59 = vmul.f32 %v3631_v28, %v5434_v2  ;;  %v1837_v25 = vadd.f32 1.0, %v4492_v46  ;;  %v1998_v60 = vmul.f32 %v3627_v18, %v5425_v58  ;;  %v2002_v0 = vadd.f32 %v1994_v52, %v1976_v10  ;;  %v3635_v10 = vld [vmem:[%s5408_s12 + $0x260] sm:$0xff] }
 0x118   : > { %v2020_v55 = vmul.f32 %v3632_v16, %v5434_v2  ;;  %v1838_v14 = vadd.f32 1.0, %v4494_v31  ;;  %4501 = vrcp.f32 %v1836_v45  ;;  %v1905_v50 = vmul.f32 %v4488_v53, %v3926_v19 }
 0x119   : > { %v1906_v11 = vmul.f32 %v5691_v56, %v3927_v35  ;;  %v1873_v46 = vmul.f32 %v5717_v21, %v3914_v61  ;;  %v1879_v17 = vadd.f32 %v1872_v23, %v1871_v32  ;;  %v2003_v18 = vadd.f32 %v1995_v41, %v1977_v33  ;;  %v3636_v23 = vld [vmem:[%s5408_s12 + $0x268] sm:$0xff] }
 0x11a   : > { %v2021_v52 = vmul.f32 %v3633_v15, %v5434_v2  ;;  %v4498_v28 = vpop.eup %4497  ;;  %v1999_v45 = vmul.f32 %v3628_v42, %v5425_v58  ;;  %v2004_v19 = vadd.f32 %v1996_v38, %v1978_v34  ;;  %v2022_v63 = vmul.f32 %v3634_v7, %v5434_v2  ;;  %v3637_v38 = vld [vmem:[%s5408_s12 + $0x270] sm:$0xff]  ;;  %v3638_v42 = vld [vmem:[%s5408_s12 + $0x278] sm:$0xff] }
 0x11b   : > { %v2027_v16 = vadd.f32 %v2019_v59, %v2001_v26  ;;  %4503 = vrcp.f32 %v1837_v25  ;;  %v1939_v35 = vmul.f32 %v4488_v53, %v3942_v57  ;;  %v2000_v61 = vmul.f32 %v3629_v44, %v5425_v58 }
 0x11c   : > { %v2028_v31 = vadd.f32 %v2020_v55, %v2002_v0  ;;  %v1907_v15 = vmul.f32 %v5717_v21, %v3930_v36  ;;  %v1913_v33 = vadd.f32 %v1906_v11, %v1905_v50  ;;  %v2005_v32 = vadd.f32 %v1997_v39, %v1979_v13 }
 0x11d   : > { %v2023_v34 = vmul.f32 %v3635_v10, %v5434_v2  ;;  %4505 = vrcp.f32 %v1838_v14  ;;  %v7037_v26 = vunpack.c.h.bf16 %v5506_v43  ;;  %v1880_v41 = vadd.f32 %v1879_v17, %v1873_v46 }
 0x11e   : > { %v2029_v57 = vadd.f32 %v2021_v52, %v2003_v18  ;;  %v4500_v53 = vpop.eup %4499  ;;  %v7038_v58 = vunpack.c.h.bf16 %v5560_v40  ;;  %v2006_v59 = vadd.f32 %v1998_v60, %v1980_v29  ;;  %v2030_v36 = vadd.f32 %v2022_v63, %v2004_v19 }
 0x11f   : > { %v1874_v25 = vmul.f32 %v4498_v28, %v7037_v26  ;;  %v3639_v7 = vmul.f32 -1.442695, %v2027_v16  ;;  %v2007_v13 = vadd.f32 %v1999_v45, %v1981_v22  ;;  %v2008_v39 = vadd.f32 %v2000_v61, %v1982_v47 }
 0x120   : > { %v1940_v0 = vmul.f32 %v5691_v56, %v7038_v58  ;;  %v2024_v55 = vmul.f32 %v3636_v23, %v5434_v2  ;;  %v3640_v14 = vmul.f32 -1.442695, %v2028_v31  ;;  %v7039_v43 = vunpack.c.h.bf16 %v5539_v20  ;;  %v1653_v23 = vld [vmem:[#allocation2] sm:$0xff] }
 0x121   : > { %v1914_v11 = vadd.f32 %v1913_v33, %v1907_v15  ;;  %v2025_v44 = vmul.f32 %v3637_v38, %v5434_v2  ;;  %v2031_v46 = vadd.f32 %v2023_v34, %v2005_v32  ;;  %v7040_v40 = vunpack.c.l.bf16 %v5519_v62  ;;  %v1688_v34 = vld [vmem:[#allocation2 + $0x8] sm:$0xff] }
 0x122   : > { %v1908_v50 = vmul.f32 %v4498_v28, %v7039_v43  ;;  %v1881_v56 = vadd.f32 %v1880_v41, %v1874_v25  ;;  %v2026_v29 = vmul.f32 %v3638_v42, %v5434_v2  ;;  %v3641_v60 = vmul.f32 -1.442695, %v2029_v57  ;;  %v4502_v18 = vpop.eup %4501 }
 0x123   : > { %v1875_v17 = vmul.f32 %v4500_v53, %v7040_v40  ;;  %v1686_v47 = vadd.f32 %v5684_v1, %v5649_v9  ;;  %v1720_v22 = vadd.f32 %v5693_v48, %v5656_v12  ;;  %4507 = vpow2.f32 %v3639_v7 }
 0x124   : > { %v3642_v20 = vmul.f32 -1.442695, %v2030_v36  ;;  %v7041_v10 = vunpack.c.l.bf16 %v5586_v8  ;;  %v1947_v45 = vadd.f32 %v1940_v0, %v1939_v35  ;;  %v2032_v19 = vadd.f32 %v2024_v55, %v2006_v59  ;;  %v5798_v59 = vld [vmem:[%s5410_s28 + $0x20] sm:$0xff]  }
 0x125   : > { %4509 = vpow2.f32 %v3640_v14  ;;  %v7042_v63 = vunpack.c.l.bf16 %v5596_v30  ;;  %v1915_v16 = vadd.f32 %v1914_v11, %v1908_v50  ;;  %v2033_v61 = vadd.f32 %v2025_v44, %v2007_v13  ;;  %v5771_v15 = vpop.eup %4503  ;;  %7052 = vst [vmem:[#allocation22_spill] sm:$0xff] %v5798_v59  ;;  %v5817_v14 = vld [vmem:[%s5410_s28 + $0x30] sm:$0xff]  }
 0x126   : > { %v1941_v52 = vmul.f32 %v5717_v21, %v7041_v10  ;;  %v3643_v31 = vmul.f32 -1.442695, %v2031_v46  ;;  %7043 = vst [vmem:[#allocation17_spill] sm:$0xff] %v5771_v15  ;;  %v7044_v9 = vunpack.c.h.bf16 %v5519_v62  ;;  %v1882_v1 = vadd.f32 %v1881_v56, %v1875_v17  ;;  %v5832_v46 = vld [vmem:[%s5410_s28 + $0x38] sm:$0xff]  }
 0x127   : > { %v1909_v2 = vmul.f32 %v4500_v53, %v7042_v63  ;;  %v2034_v48 = vadd.f32 %v2026_v29, %v2008_v39  ;;  %4511 = vpow2.f32 %v3641_v60  ;;  %v1652_v21 = vadd.f32 %v5682_v37, %v5666_v27  ;;  %v5779_v32 = vpop.eup %4505  ;;  %7062 = vst [vmem:[#allocation27_spill] sm:$0xff] %v5832_v46  ;;  %v5843_v29 = vld [vmem:[%s5410_s28 + $0xa8] sm:$0xff]  }
 0x128   : > { %v1876_v12 = vmul.f32 %v4502_v18, %v7044_v9  ;;  %v1687_v35 = vadd.f32 %v1686_v47, %v5673_v5  ;;  %v1721_v33 = vadd.f32 %v1720_v22, %v5660_v24  ;;  %4513 = vpow2.f32 %v3642_v20  ;;  %7045 = vst [vmem:[#allocation18_spill] sm:$0xff] %v5779_v32  ;;  %7065 = vst [vmem:[#allocation30_spill] sm:$0xff] %v5843_v29  ;;  %v5850_v20 = vld [vmem:[%s5410_s28 + $0xb0] sm:$0xff]  }
 0x129   : > { %v7046_v26 = vunpack.c.h.bf16 %v5586_v8  ;;  %v3644_v25 = vmul.f32 -1.442695, %v2032_v19  ;;  %v7047_v41 = vunpack.c.h.bf16 %v5596_v30  ;;  %v1916_v57 = vadd.f32 %v1915_v16, %v1909_v2  ;;  %7066 = vst [vmem:[#allocation31_spill] sm:$0xff] %v5850_v20  ;;  %v5856_v2 = vld [vmem:[%s5410_s28 + $0xb8] sm:$0xff]   ;;  %v5859_v16 = vld [vmem:[%s5410_s28 + $0x120] sm:$0xff]   ;;  %v3678_v47 = vld [vmem:[%s5408_s12 + $0x470] sm:$0xff] }
 0x12a   : > { %4515 = vpow2.f32 %v3643_v31  ;;  %v3645_v37 = vmul.f32 -1.442695, %v2033_v61  ;;  %v7048_v24 = vunpack.c.l.bf16 %v5574_v3  ;;  %v1883_v5 = vadd.f32 %v1882_v1, %v1876_v12  ;;  %7067 = vst [vmem:[#allocation32_spill] sm:$0xff] %v5856_v2  ;;  %7068 = vst [vmem:[#allocation33_spill] sm:$0xff] %v5859_v16  ;;  %v2416_v12 = vld [vmem:[%s5408_s12 + $0x90] sm:$0xff] }
 0x12b   : > { %v1942_v62 = vmul.f32 %v4498_v28, %v7046_v26  ;;  %v1910_v38 = vmul.f32 %v4502_v18, %v7047_v41  ;;  %v1948_v58 = vadd.f32 %v1947_v45, %v1941_v52  ;;  %v3646_v0 = vmul.f32 -1.442695, %v2034_v48  ;;  %v5867_v48 = vld [vmem:[%s5410_s28 + $0x128] sm:$0xff]   ;;  %v3665_v26 = vld [vmem:[%s5408_s12 + $0x350] sm:$0xff] }
 0x12c   : > { %v1877_v27 = vmul.f32 %v5771_v15, %v7048_v24  ;;  %v5790_v8 = vadd.f32 %v1653_v23, %v1652_v21  ;;  %v5792_v28 = vadd.f32 %v1688_v34, %v1687_v35  ;;  %v5795_v30 = vadd.f32 %v1721_v33, %v5688_v6  ;;  %v5814_v6 = vld [vmem:[%s5410_s28 + $0x28] sm:$0xff]   ;;  %7069 = vst [vmem:[#allocation34_spill] sm:$0xff] %v5867_v48  ;;  %v3663_v23 = vld [vmem:[%s5408_s12 + $0x340] sm:$0xff]  ;;  %v3666_v24 = vld [vmem:[%s5408_s12 + $0x358] sm:$0xff] }
 0x12d   : > { %v7053_v42 = vunpack.c.l.bf16 %v5611_v49  ;;  %v7054_v7 = vunpack.c.l.bf16 %v5615_v51  ;;  %v7055_v39 = vunpack.c.h.bf16 %v5615_v51  ;;  %4517 = vpow2.f32 %v3644_v25  ;;  %7057 = vst [vmem:[#allocation24_spill] sm:$0xff] %v5814_v6  ;;  %v4508_v43 = vpop.eup %4507  ;;  %v3664_v34 = vld [vmem:[%s5408_s12 + $0x348] sm:$0xff] }
 0x12e   : > { %7049 = vst [vmem:[#allocation19_spill] sm:$0xff] %v5790_v8  ;;  %7050 = vst [vmem:[#allocation20_spill] sm:$0xff] %v5792_v28  ;;  %v7058_v50 = vunpack.c.h.bf16 %v5574_v3  ;;  %v5829_v44 = vadd.f32 %v1916_v57, %v1910_v38  ;;  %4519 = vpow2.f32 %v3645_v37  ;;  %v5834_v17 = vadd.f32 %v1883_v5, %v1877_v27  ;;  %v3667_v27 = vld [vmem:[%s5408_s12 + $0x360] sm:$0xff]  ;;  %v3673_v33 = vld [vmem:[%s5408_s12 + $0x448] sm:$0xff] }
 0x12f   : > { %7051 = vst [vmem:[#allocation21_spill] sm:$0xff] %v5795_v30  ;;  %v5803_v36 = vmul.f32 %v5771_v15, %v7053_v42  ;;  %v5807_v13 = vmul.f32 %v4500_v53, %v7054_v7  ;;  %v5811_v55 = vmul.f32 %v4502_v18, %v7055_v39  ;;  %v7060_v53 = vunpack.c.h.bf16 %v5611_v49  ;;  %v4510_v40 = vpop.eup %4509  ;;  %v5840_v49 = vld [vmem:[%s5410_s28 + $0xa0] sm:$0xff]   ;;  %v5886_v42 = vld [vmem:[%s5410_s28 + $0x130] sm:$0xff]   ;;  %v3668_v7 = vld [vmem:[%s5408_s12 + $0x368] sm:$0xff] }
 0x130   : > { %v5822_v11 = vmul.f32 %v5779_v32, %v7058_v50  ;;  %7063 = vst [vmem:[#allocation28_spill] sm:$0xff] %v5834_v17  ;;  %v5836_v56 = vadd.f32 %v1948_v58, %v1942_v62  ;;  %4521 = vpow2.f32 %v3646_v0  ;;  %v6937_v3 = vunpack.c.l.bf16 %v5798_v59  ;;  %7064 = vst [vmem:[#allocation29_spill] sm:$0xff] %v5840_v49  ;;  %v3669_v39 = vld [vmem:[%s5408_s12 + $0x370] sm:$0xff]  ;;  %v3672_v38 = vld [vmem:[%s5408_s12 + $0x440] sm:$0xff] }
 0x131   : > { %7056 = vst [vmem:[#allocation23_spill] sm:$0xff] %v5811_v55  ;;  %v5827_v51 = vmul.f32 %v5779_v32, %v7060_v53  ;;  %v6936_v60 = vunpack.c.h.bf16 %v5798_v59  ;;  %v4512_v10 = vpop.eup %4511  ;;  %v2059_v52 = vadd.f32 1.0, %v4508_v43  ;;  %v2060_v31 = vadd.f32 1.0, %v4510_v40  ;;  %7070 = vst [vmem:[#allocation35_spill] sm:$0xff] %v5886_v42  ;;  %v3670_v43 = vld [vmem:[%s5408_s12 + $0x378] sm:$0xff]  ;;  %v3677_v35 = vld [vmem:[%s5408_s12 + $0x468] sm:$0xff] }
 0x132   : > { %7059 = vst [vmem:[#allocation25_spill] sm:$0xff] %v5822_v11  ;;  %v4514_v61 = vpop.eup %4513  ;;  %v6935_v9 = vunpack.c.l.bf16 %v5840_v49  ;;  %v5876_v62 = vstv %s5788_s16  ;;  %v2061_v41 = vadd.f32 1.0, %v4512_v10  ;;  %v5908_v19 = vstv %s5861_s17  ;;  %v2418_v32 = vld [vmem:[%s5408_s12 + $0xa0] sm:$0xff]  ;;  %v3717_v55 = vld [vmem:[%s5408_s12 + $0x198] sm:$0xff] }
 0x133   : > { %7061 = vst [vmem:[#allocation26_spill] sm:$0xff] %v5827_v51  ;;  %v2062_v5 = vadd.f32 1.0, %v4514_v61  ;;  %4523 = vrcp.f32 %v2059_v52  ;;  %v2195_v50 = vmul.f32 %v3663_v23, %v5876_v62  ;;  %v2196_v53 = vmul.f32 %v3664_v34, %v5876_v62  ;;  %v3676_v61 = vld [vmem:[%s5408_s12 + $0x460] sm:$0xff]  ;;  %v3725_v15 = vld [vmem:[%s5408_s12 + $0x290] sm:$0xff] }
 0x134   : > { %v4516_v25 = vpop.eup %4515  ;;  %4525 = vrcp.f32 %v2060_v31  ;;  %v2197_v40 = vmul.f32 %v3665_v26, %v5876_v62  ;;  %v2198_v57 = vmul.f32 %v3666_v24, %v5876_v62  ;;  %v2199_v31 = vmul.f32 %v3667_v27, %v5876_v62 }
 0x135   : > { %v2063_v52 = vadd.f32 1.0, %v4516_v25  ;;  %4527 = vrcp.f32 %v2061_v41  ;;  %v2200_v26 = vmul.f32 %v3668_v7, %v5876_v62  ;;  %v2201_v24 = vmul.f32 %v3669_v39, %v5876_v62  ;;  %v3674_v41 = vld [vmem:[%s5408_s12 + $0x450] sm:$0xff] }
 0x136   : > { %4529 = vrcp.f32 %v2062_v5  ;;  %v2202_v27 = vmul.f32 %v3670_v43, %v5876_v62  ;;  %v2203_v34 = vadd.f32 %v2195_v50, %v5420_v54  ;;  %v2204_v23 = vadd.f32 %v2196_v53, %v5420_v54  ;;  %v3675_v5 = vld [vmem:[%s5408_s12 + $0x458] sm:$0xff] }
 0x137   : > { %v4518_v10 = vpop.eup %4517  ;;  %v2205_v7 = vadd.f32 %v2197_v40, %v5420_v54  ;;  %4531 = vrcp.f32 %v2063_v52  ;;  %v5917_v43 = vld [vmem:[%s5410_s28 + $0x138] sm:$0xff]   ;;  %v2206_v21 = vadd.f32 %v2198_v57, %v5420_v54  ;;  %v2207_v22 = vadd.f32 %v2199_v31, %v5420_v54  ;;  %v2414_v31 = vld [vmem:[%s5408_s12 + $0x80] sm:$0xff] }
 0x138   : > { %v4520_v63 = vpop.eup %4519  ;;  %v2064_v45 = vadd.f32 1.0, %v4518_v10  ;;  %7071 = vst [vmem:[#allocation36_spill] sm:$0xff] %v5917_v43  ;;  %v2208_v10 = vadd.f32 %v2200_v26, %v5420_v54  ;;  %v3679_v50 = vld [vmem:[%s5408_s12 + $0x478] sm:$0xff]  ;;  %v2221_v53 = vmul.f32 %v3672_v38, %v5908_v19  ;;  %v2222_v40 = vmul.f32 %v3673_v33, %v5908_v19 }
 0x139   : > { %v2065_v39 = vadd.f32 1.0, %v4520_v63  ;;  %v2223_v63 = vmul.f32 %v3674_v41, %v5908_v19  ;;  %v2224_v52 = vmul.f32 %v3675_v5, %v5908_v19  ;;  %v2225_v1 = vmul.f32 %v3676_v61, %v5908_v19  ;;  %v3681_v41 = vld [vmem:[%s5408_s12 + $0x540] sm:$0xff] }
 0x13a   : > { %v4522_v25 = vpop.eup %4521  ;;  %v2226_v57 = vmul.f32 %v3677_v35, %v5908_v19  ;;  %4533 = vrcp.f32 %v2064_v45  ;;  %v2209_v26 = vadd.f32 %v2201_v24, %v5420_v54  ;;  %v2210_v33 = vadd.f32 %v2202_v27, %v5420_v54 }
 0x13b   : > { %v2066_v0 = vadd.f32 1.0, %v4522_v25  ;;  %v2227_v25 = vmul.f32 %v3678_v47, %v5908_v19  ;;  %4535 = vrcp.f32 %v2065_v39  ;;  %v2228_v38 = vmul.f32 %v3679_v50, %v5908_v19  ;;  %v2415_v50 = vld [vmem:[%s5408_s12 + $0x88] sm:$0xff] }
 0x13c   : > { %v5937_v61 = vstv %s5897_s18  ;;  %v2229_v5 = vadd.f32 %v2221_v53, %v2203_v34  ;;  %v2230_v24 = vadd.f32 %v2222_v40, %v2204_v23  ;;  %v2231_v47 = vadd.f32 %v2223_v63, %v2205_v7  ;;  %v3682_v7 = vld [vmem:[%s5408_s12 + $0x548] sm:$0xff]  ;;  %v3683_v63 = vld [vmem:[%s5408_s12 + $0x550] sm:$0xff] }
 0x13d   : > { %v4524_v18 = vpop.eup %4523  ;;  %4537 = vrcp.f32 %v2066_v0  ;;  %v2232_v58 = vadd.f32 %v2224_v52, %v2206_v21  ;;  %v5941_v39 = vadd.f32 %v2225_v1, %v2207_v22  ;;  %v5943_v27 = vadd.f32 %v2226_v57, %v2208_v10  ;;  %v3684_v52 = vld [vmem:[%s5408_s12 + $0x558] sm:$0xff] }
 0x13e   : > { %v4526_v35 = vpop.eup %4525  ;;  %v2099_v0 = vmul.f32 %v4524_v18, %v6937_v3  ;;  %v2133_v34 = vmul.f32 %v4524_v18, %v6935_v9  ;;  %v5951_v23 = vadd.f32 %v2227_v25, %v2209_v26  ;;  %v2247_v21 = vmul.f32 %v3681_v41, %v5937_v61 }
 0x13f   : > { %v4528_v37 = vpop.eup %4527  ;;  %v2100_v1 = vmul.f32 %v4526_v35, %v6936_v60  ;;  %v7072_v10 = vunpack.c.l.bf16 %v5859_v16  ;;  %v5961_v40 = vadd.f32 %v2228_v38, %v2210_v33  ;;  %v2423_v57 = vmul.f32 %v2414_v31, %v5876_v62  ;;  %v2417_v60 = vld [vmem:[%s5408_s12 + $0x98] sm:$0xff]  ;;  %v3714_v33 = vld [vmem:[%s5408_s12 + $0x180] sm:$0xff] }
 0x140   : > { %v4530_v22 = vpop.eup %4529  ;;  %v7073_v26 = vunpack.c.h.bf16 %v5840_v49  ;;  %v7074_v41 = vunpack.c.h.bf16 %v5859_v16  ;;  %v7075_v3 = vunpack.c.l.bf16 %v5814_v6  ;;  %v7076_v31 = vunpack.c.l.bf16 %v5843_v29 }
 0x141   : > { %v5959_v53 = vmul.f32 %v4524_v18, %v7072_v10  ;;  %v2424_v18 = vmul.f32 %v2415_v50, %v5876_v62  ;;  %v2425_v10 = vmul.f32 %v2416_v12, %v5876_v62  ;;  %v4532_v38 = vpop.eup %4531  ;;  %v3716_v50 = vld [vmem:[%s5408_s12 + $0x190] sm:$0xff]  ;;  %v7078_v12 = vunpack.c.h.bf16 %v5814_v6 }
 0x142   : > { %v2134_v25 = vmul.f32 %v4526_v35, %v7073_v26  ;;  %v5970_v9 = vmul.f32 %v4526_v35, %v7074_v41  ;;  %v2101_v45 = vmul.f32 %v4528_v37, %v7075_v3  ;;  %v5980_v59 = vmul.f32 %v4528_v37, %v7076_v31  ;;  %v3715_v41 = vld [vmem:[%s5408_s12 + $0x188] sm:$0xff] }
 0x143   : > { %v7077_v26 = vunpack.c.l.bf16 %v5867_v48  ;;  %v2248_v35 = vmul.f32 %v3682_v7, %v5937_v61  ;;  %v5991_v49 = vmul.f32 %v4530_v22, %v7078_v12  ;;  %v2249_v3 = vmul.f32 %v3683_v63, %v5937_v61 }
 0x144   : > { %v2250_v28 = vmul.f32 %v3684_v52, %v5937_v61  ;;  %v2255_v31 = vadd.f32 %v2247_v21, %v2229_v5  ;;  %v2107_v8 = vadd.f32 %v2100_v1, %v2099_v0  ;;  %v2431_v7 = vadd.f32 %v2423_v57, %v5420_v54  ;;  %v5999_v6 = vpop.eup %4533  ;;  %v3723_v21 = vld [vmem:[%s5408_s12 + $0x280] sm:$0xff] }
 0x145   : > { %v5984_v16 = vmul.f32 %v4528_v37, %v7077_v26  ;;  %v2426_v37 = vmul.f32 %v2417_v60, %v5876_v62  ;;  %v2449_v26 = vmul.f32 %v3714_v33, %v5908_v19  ;;  %v2432_v12 = vadd.f32 %v2424_v18, %v5420_v54  ;;  %v6007_v60 = vpop.eup %4535 }
 0x146   : > { %v2433_v63 = vadd.f32 %v2425_v10, %v5420_v54  ;;  %v2450_v5 = vmul.f32 %v3715_v41, %v5908_v19  ;;  %v2451_v0 = vmul.f32 %v3716_v50, %v5908_v19  ;;  %v7079_v1 = vunpack.c.l.bf16 %v5817_v14  ;;  %v3724_v10 = vld [vmem:[%s5408_s12 + $0x288] sm:$0xff]  ;;  %v3685_v50 = vld [vmem:[%s5408_s12 + $0x560] sm:$0xff] }
 0x147   : > { %v7080_v57 = vunpack.c.h.bf16 %v5843_v29  ;;  %v2141_v18 = vadd.f32 %v2134_v25, %v2133_v34  ;;  %v2256_v51 = vadd.f32 %v2248_v35, %v2230_v24  ;;  %v6019_v41 = vpop.eup %4537  ;;  %v2257_v4 = vadd.f32 %v2249_v3, %v2231_v47  ;;  %v3718_v29 = vld [vmem:[%s5408_s12 + $0x1a0] sm:$0xff] }
 0x148   : > { %v6011_v52 = vmul.f32 %v4532_v38, %v7079_v1  ;;  %7081 = vst [vmem:[#allocation37_spill] sm:$0xff] %v6019_v41  ;;  %v2258_v17 = vadd.f32 %v2250_v28, %v2232_v58  ;;  %v3689_v11 = vmul.f32 -1.442695, %v2255_v31  ;;  %v2427_v30 = vmul.f32 %v2418_v32, %v5876_v62  ;;  %v3726_v41 = vld [vmem:[%s5408_s12 + $0x298] sm:$0xff] }
 0x149   : > { %v6015_v33 = vmul.f32 %v4530_v22, %v7080_v57  ;;  %v2434_v1 = vadd.f32 %v2426_v37, %v5420_v54  ;;  %v2452_v57 = vmul.f32 %v3717_v55, %v5908_v19  ;;  %v2457_v34 = vadd.f32 %v2449_v26, %v2431_v7 }
 0x14a   : > { %v2475_v24 = vmul.f32 %v3723_v21, %v5937_v61  ;;  %v2458_v25 = vadd.f32 %v2450_v5, %v2432_v12  ;;  %v2459_v35 = vadd.f32 %v2451_v0, %v2433_v63  ;;  %v2476_v28 = vmul.f32 %v3724_v10, %v5937_v61  ;;  %v3686_v12 = vld [vmem:[%s5408_s12 + $0x568] sm:$0xff]  ;;  %v3687_v63 = vld [vmem:[%s5408_s12 + $0x570] sm:$0xff] }
 0x14b   : > { %v2477_v58 = vmul.f32 %v3725_v15, %v5937_v61  ;;  %v7082_v32 = vunpack.c.l.bf16 %v5850_v20  ;;  %v7083_v3 = vunpack.c.h.bf16 %v5867_v48  ;;  %v2251_v55 = vmul.f32 %v3685_v50, %v5937_v61  ;;  %v2419_v10 = vld [vmem:[%s5408_s12 + $0xa8] sm:$0xff]  ;;  %v3688_v48 = vld [vmem:[%s5408_s12 + $0x578] sm:$0xff] }
 0x14c   : > { %v3690_v37 = vmul.f32 -1.442695, %v2256_v51  ;;  %v7084_v7 = vunpack.c.l.bf16 %v5886_v42  ;;  %v3691_v5 = vmul.f32 -1.442695, %v2257_v4  ;;  %v2435_v15 = vadd.f32 %v2427_v30, %v5420_v54 }
 0x14d   : > { %v6032_v47 = vmul.f32 %v4532_v38, %v7082_v32  ;;  %v6036_v31 = vmul.f32 %v4530_v22, %v7083_v3  ;;  %v2453_v0 = vmul.f32 %v3718_v29, %v5908_v19  ;;  %v2108_v21 = vadd.f32 %v2107_v8, %v2101_v45  ;;  %v3727_v32 = vld [vmem:[%s5408_s12 + $0x2a0] sm:$0xff]  ;;  %v2420_v8 = vld [vmem:[%s5408_s12 + $0xb0] sm:$0xff]  ;;  %v2421_v45 = vld [vmem:[%s5408_s12 + $0xb8] sm:$0xff] }
 0x14e   : > { %v6041_v26 = vmul.f32 %v4532_v38, %v7084_v7  ;;  %v2460_v22 = vadd.f32 %v2452_v57, %v2434_v1  ;;  %v2478_v51 = vmul.f32 %v3726_v41, %v5937_v61  ;;  %v2483_v50 = vadd.f32 %v2475_v24, %v2457_v34 }
 0x14f   : > { %4539 = vpow2.f32 %v3689_v11  ;;  %v3692_v38 = vmul.f32 -1.442695, %v2258_v17  ;;  %v2484_v3 = vadd.f32 %v2476_v28, %v2458_v25  ;;  %v2485_v7 = vadd.f32 %v2477_v58, %v2459_v35  ;;  %v3719_v28 = vld [vmem:[%s5408_s12 + $0x1a8] sm:$0xff] }
 0x150   : > { %v2252_v4 = vmul.f32 %v3686_v12, %v5937_v61  ;;  %v2253_v30 = vmul.f32 %v3687_v63, %v5937_v61  ;;  %v2259_v29 = vadd.f32 %v2251_v55, %v5941_v39  ;;  %4541 = vpow2.f32 %v3690_v37 }
 0x151   : > { %4543 = vpow2.f32 %v3691_v5  ;;  %v2428_v1 = vmul.f32 %v2419_v10, %v5876_v62  ;;  %v2461_v41 = vadd.f32 %v2453_v0, %v2435_v15  ;;  %v2479_v11 = vmul.f32 %v3727_v32, %v5937_v61  ;;  %v3720_v5 = vld [vmem:[%s5408_s12 + $0x1b0] sm:$0xff] }
 0x152   : > { %v2486_v17 = vadd.f32 %v2478_v51, %v2460_v22  ;;  %v3731_v57 = vmul.f32 -1.442695, %v2483_v50  ;;  %v3732_v34 = vmul.f32 -1.442695, %v2484_v3  ;;  %v3733_v24 = vmul.f32 -1.442695, %v2485_v7 }
 0x153   : > { %v2142_v25 = vadd.f32 %v2141_v18, %v5980_v59  ;;  %v2175_v39 = vadd.f32 %v5970_v9, %v5959_v53  ;;  %v2254_v35 = vmul.f32 %v3688_v48, %v5937_v61  ;;  %4545 = vpow2.f32 %v3692_v38  ;;  %v3721_v53 = vld [vmem:[%s5408_s12 + $0x1b8] sm:$0xff]  ;;  %v3728_v22 = vld [vmem:[%s5408_s12 + $0x2a8] sm:$0xff] }
 0x154   : > { %v2260_v58 = vadd.f32 %v2252_v4, %v5943_v27  ;;  %v2261_v55 = vadd.f32 %v2253_v30, %v5951_v23  ;;  %v2429_v37 = vmul.f32 %v2420_v8, %v5876_v62  ;;  %4547 = vpow2.f32 %v3731_v57 }
 0x155   : > { %v3693_v12 = vmul.f32 -1.442695, %v2259_v29  ;;  %v2430_v63 = vmul.f32 %v2421_v45, %v5876_v62  ;;  %v2487_v59 = vadd.f32 %v2479_v11, %v2461_v41  ;;  %4549 = vpow2.f32 %v3732_v34 }
 0x156   : > { %v2436_v9 = vadd.f32 %v2428_v1, %v5420_v54  ;;  %v2454_v48 = vmul.f32 %v3719_v28, %v5908_v19  ;;  %4551 = vpow2.f32 %v3733_v24  ;;  %v3734_v27 = vmul.f32 -1.442695, %v2486_v17 }
 0x157   : > { %v7085_v23 = vunpack.c.h.bf16 %v5817_v14  ;;  %v2109_v15 = vadd.f32 %v2108_v21, %v5991_v49  ;;  %v2176_v0 = vadd.f32 %v2175_v39, %v5984_v16  ;;  %v2262_v10 = vadd.f32 %v2254_v35, %v5961_v40  ;;  %v3729_v49 = vld [vmem:[%s5408_s12 + $0x2b0] sm:$0xff]  ;;  %v3730_v40 = vld [vmem:[%s5408_s12 + $0x2b8] sm:$0xff] }
 0x158   : > { %v2143_v32 = vadd.f32 %v2142_v25, %v6015_v33  ;;  %v3694_v51 = vmul.f32 -1.442695, %v2260_v58  ;;  %v2437_v50 = vadd.f32 %v2429_v37, %v5420_v54  ;;  %v2455_v38 = vmul.f32 %v3720_v5, %v5908_v19 }
 0x159   : > { %v2104_v18 = vmul.f32 %v5999_v6, %v7085_v23  ;;  %v4540_v3 = vpop.eup %4539  ;;  %4553 = vpow2.f32 %v3693_v12  ;;  %v2438_v7 = vadd.f32 %v2430_v63, %v5420_v54  ;;  %v2456_v4 = vmul.f32 %v3721_v53, %v5908_v19 }
 0x15a   : > { %v3735_v21 = vmul.f32 -1.442695, %v2487_v59  ;;  %v4542_v16 = vpop.eup %4541  ;;  %v3695_v30 = vmul.f32 -1.442695, %v2261_v55  ;;  %v2462_v29 = vadd.f32 %v2454_v48, %v2436_v9  ;;  %v2480_v8 = vmul.f32 %v3728_v22, %v5937_v61 }
 0x15b   : > { %4555 = vpow2.f32 %v3734_v27  ;;  %v4544_v33 = vpop.eup %4543  ;;  %v7086_v45 = vunpack.c.l.bf16 %v5832_v46  ;;  %v7087_v41 = vunpack.c.h.bf16 %v5850_v20  ;;  %v2177_v17 = vadd.f32 %v2176_v0, %v6036_v31 }
 0x15c   : > { %v3696_v57 = vmul.f32 -1.442695, %v2262_v10  ;;  %4557 = vpow2.f32 %v3694_v51  ;;  %v2287_v34 = vadd.f32 1.0, %v4540_v3  ;;  %v2463_v24 = vadd.f32 %v2455_v38, %v2437_v50 }
 0x15d   : > { %v2105_v1 = vmul.f32 %v6007_v60, %v7086_v45  ;;  %v2138_v11 = vmul.f32 %v5999_v6, %v7087_v41  ;;  %v2481_v25 = vmul.f32 %v3729_v49, %v5937_v61  ;;  %v4546_v39 = vpop.eup %4545  ;;  %v2288_v35 = vadd.f32 1.0, %v4542_v16 }
 0x15e   : > { %v2464_v28 = vadd.f32 %v2456_v4, %v2438_v7  ;;  %v2482_v58 = vmul.f32 %v3730_v40, %v5937_v61  ;;  %4559 = vpow2.f32 %v3735_v21  ;;  %v4548_v55 = vpop.eup %4547  ;;  %v2110_v37 = vadd.f32 %v2109_v15, %v6011_v52  ;;  %v1723_v21 = vld [vmem:[#allocation2 + $0x10] sm:$0xff] }
 0x15f   : > { %v2144_v12 = vadd.f32 %v2143_v32, %v6032_v47  ;;  %4561 = vpow2.f32 %v3695_v30  ;;  %v2488_v63 = vadd.f32 %v2480_v8, %v2462_v29  ;;  %v4550_v31 = vpop.eup %4549  ;;  %v7088_v5 = vunpack.c.h.bf16 %v5886_v42  ;;  %v7092_v30 = vld [vmem:[#allocation37_spill] sm:$0xff] }
 0x160   : > { %v2178_v9 = vadd.f32 %v2177_v17, %v6041_v26  ;;  %4563 = vpow2.f32 %v3696_v57  ;;  %v2515_v53 = vadd.f32 1.0, %v4548_v55  ;;  %v4552_v48 = vpop.eup %4551  ;;  %v2289_v27 = vadd.f32 1.0, %v4544_v33 }
 0x161   : > { %v2172_v59 = vmul.f32 %v5999_v6, %v7088_v5  ;;  %4565 = vrcp.f32 %v2287_v34  ;;  %v2489_v23 = vadd.f32 %v2481_v25, %v2463_v24  ;;  %v2516_v0 = vadd.f32 1.0, %v4550_v31  ;;  %v7095_v34 = vld [vmem:[#allocation21_spill] sm:$0xff]  ;;  %v7102_v31 = vld [vmem:[#allocation23_spill] sm:$0xff] }
 0x162   : > { %v7089_v52 = vunpack.c.l.bf16 %v5856_v2  ;;  %v2290_v15 = vadd.f32 1.0, %v4546_v39  ;;  %4567 = vrcp.f32 %v2288_v35  ;;  %v2490_v10 = vadd.f32 %v2482_v58, %v2464_v28  ;;  %v7096_v25 = vld [vmem:[#allocation25_spill] sm:$0xff]  ;;  %v7097_v39 = vld [vmem:[#allocation28_spill] sm:$0xff] }
 0x163   : > { %v2111_v22 = vadd.f32 %v2110_v37, %v2104_v18  ;;  %v2145_v32 = vadd.f32 %v2144_v12, %v2138_v11  ;;  %v3736_v51 = vmul.f32 -1.442695, %v2488_v63  ;;  %4569 = vrcp.f32 %v2515_v53  ;;  %v4554_v6 = vpop.eup %4553  ;;  %v7100_v58 = vld [vmem:[#allocation17_spill] sm:$0xff]  ;;  %v7101_v12 = vld [vmem:[#allocation26_spill] sm:$0xff]  ;;  %v6132_v53 = vld [vmem:[%s5410_s28 + $0xc0] sm:$0xff]  }
 0x164   : > { %v2139_v47 = vmul.f32 %v6007_v60, %v7089_v52  ;;  %v7090_v26 = vunpack.c.l.bf16 %v5917_v43  ;;  %v2179_v38 = vadd.f32 %v2178_v9, %v2172_v59  ;;  %v2517_v3 = vadd.f32 1.0, %v4552_v48  ;;  %v6129_v9 = vld [vmem:[%s5410_s28 + $0x40] sm:$0xff]   ;;  %7104 = vst [vmem:[#allocation21_spill] sm:$0xff] %v6132_v53 }
 0x165   : > { %4571 = vrcp.f32 %v2516_v0  ;;  %v4556_v7 = vpop.eup %4555  ;;  %v1918_v4 = vadd.f32 %v5829_v44, %v5803_v36  ;;  %v1950_v49 = vadd.f32 %v5836_v56, %v5807_v13  ;;  %v3737_v18 = vmul.f32 -1.442695, %v2489_v23  ;;  %7103 = vst [vmem:[#allocation37_spill] sm:$0xff] %v6129_v9  ;;  %v1920_v23 = vld [vmem:[#allocation2 + $0x20] sm:$0xff] }
 0x166   : > { %v2173_v50 = vmul.f32 %v6007_v60, %v7090_v26  ;;  %4573 = vrcp.f32 %v2289_v27  ;;  %v7091_v16 = vunpack.c.h.bf16 %v5832_v46  ;;  %v7093_v40 = vunpack.c.h.bf16 %v5856_v2  ;;  %v4558_v33 = vpop.eup %4557  ;;  %v1886_v27 = vld [vmem:[#allocation2 + $0x18] sm:$0xff] }
 0x167   : > { %4575 = vrcp.f32 %v2290_v15  ;;  %v3738_v8 = vmul.f32 -1.442695, %v2490_v10  ;;  %v2112_v45 = vadd.f32 %v2111_v22, %v2105_v1  ;;  %v2146_v41 = vadd.f32 %v2145_v32, %v2139_v47  ;;  %v7098_v1 = vld [vmem:[#allocation16_spill] sm:$0xff]  ;;  %v7106_v22 = vld [vmem:[#allocation18_spill] sm:$0xff] }
 0x168   : > { %v2106_v29 = vmul.f32 %v7092_v30, %v7091_v16  ;;  %v2140_v60 = vmul.f32 %v7092_v30, %v7093_v40  ;;  %v2291_v36 = vadd.f32 1.0, %v4554_v6  ;;  %4577 = vpow2.f32 %v3736_v51  ;;  %v4560_v13 = vpop.eup %4559  ;;  %v3777_v2 = vld [vmem:[%s5408_s12 + $0x5a0] sm:$0xff] }
 0x169   : > { %v7094_v44 = vunpack.c.h.bf16 %v5917_v43  ;;  %v2180_v11 = vadd.f32 %v2179_v38, %v2173_v50  ;;  %v2518_v17 = vadd.f32 1.0, %v4556_v7  ;;  %4579 = vrcp.f32 %v2517_v3  ;;  %v4562_v57 = vpop.eup %4561  ;;  %v6148_v3 = vld [vmem:[%s5410_s28 + $0x48] sm:$0xff]  }
 0x16a   : > { %v1724_v24 = vadd.f32 %v1723_v21, %v7095_v34  ;;  %v1885_v35 = vadd.f32 %v7097_v39, %v7096_v25  ;;  %v7099_v28 = vunpack.c.l.bf16 %v7098_v1  ;;  %4581 = vpow2.f32 %v3737_v18  ;;  %v4564_v37 = vpop.eup %4563  ;;  %7108 = vst [vmem:[#allocation28_spill] sm:$0xff] %v6148_v3  ;;  %v6192_v39 = vld [vmem:[%s5410_s28 + $0x140] sm:$0xff]  }
 0x16b   : > { %v2174_v56 = vmul.f32 %v7092_v30, %v7094_v44  ;;  %v1919_v63 = vadd.f32 %v1918_v4, %v7101_v12  ;;  %v1951_v5 = vadd.f32 %v1950_v49, %v7102_v31  ;;  %v2292_v59 = vadd.f32 1.0, %v4558_v33  ;;  %v6134_v48 = vpop.eup %4565  ;;  %v6153_v49 = vld [vmem:[%s5410_s28 + $0xc8] sm:$0xff]   ;;  %7119 = vst [vmem:[#allocation39_spill] sm:$0xff] %v6192_v39 }
 0x16c   : > { %v1945_v55 = vmul.f32 %v7100_v58, %v7099_v28  ;;  %4583 = vpow2.f32 %v3738_v8  ;;  %v2113_v0 = vadd.f32 %v2112_v45, %v2106_v29  ;;  %v2147_v52 = vadd.f32 %v2146_v41, %v2140_v60  ;;  %v6136_v15 = vpop.eup %4567  ;;  %7109 = vst [vmem:[#allocation16_spill] sm:$0xff] %v6153_v49  ;;  %v7113_v60 = vld [vmem:[#allocation19_spill] sm:$0xff]  ;;  %v7114_v33 = vld [vmem:[#allocation20_spill] sm:$0xff]  ;;  %v6170_v41 = vld [vmem:[%s5410_s28 + $0x50] sm:$0xff]  }
 0x16d   : > { %4585 = vrcp.f32 %v2291_v36  ;;  %v2519_v47 = vadd.f32 1.0, %v4560_v13  ;;  %v7105_v10 = vunpack.c.h.bf16 %v7098_v1  ;;  %v2181_v51 = vadd.f32 %v2180_v11, %v2174_v56  ;;  %v6143_v26 = vpop.eup %4569  ;;  %7116 = vst [vmem:[#allocation19_spill] sm:$0xff] %v6170_v41  ;;  %v6178_v56 = vld [vmem:[%s5410_s28 + $0x58] sm:$0xff]  }
 0x16e   : > { %v2293_v6 = vadd.f32 1.0, %v4562_v57  ;;  %4587 = vrcp.f32 %v2518_v17  ;;  %v6958_v50 = vunpack.c.l.bf16 %v6129_v9  ;;  %v6957_v38 = vunpack.c.h.bf16 %v6129_v9  ;;  %7118 = vst [vmem:[#allocation38_spill] sm:$0xff] %v6178_v56  ;;  %v7120_v1 = vld [vmem:[#allocation22_spill] sm:$0xff]  ;;  %v3819_v9 = vld [vmem:[%s5408_s12 + $0x2e0] sm:$0xff] }
 0x16f   : > { %v6141_v32 = vmul.f32 %v7106_v22, %v7105_v10  ;;  %v6956_v7 = vunpack.c.l.bf16 %v6132_v53  ;;  %v6955_v4 = vunpack.c.h.bf16 %v6132_v53  ;;  %v4572_v18 = vpop.eup %4571  ;;  %v6155_v21 = vadd.f32 %v1886_v27, %v1885_v35 }
 0x170   : > { %v6157_v16 = vadd.f32 %v1920_v23, %v1919_v63  ;;  %v2294_v30 = vadd.f32 1.0, %v4564_v37  ;;  %4589 = vrcp.f32 %v2292_v59  ;;  %v6159_v29 = vpop.eup %4573  ;;  %v6161_v40 = vadd.f32 %v1951_v5, %v1945_v55  ;;  %v6210_v23 = vld [vmem:[%s5410_s28 + $0xd0] sm:$0xff]  }
 0x171   : > { %7107 = vst [vmem:[#allocation25_spill] sm:$0xff] %v6141_v32  ;;  %7110 = vst [vmem:[#allocation17_spill] sm:$0xff] %v6155_v21  ;;  %v6164_v8 = vadd.f32 %v2113_v0, %v7113_v60  ;;  %v6167_v45 = vadd.f32 %v2147_v52, %v7114_v33  ;;  %4591 = vrcp.f32 %v2519_v47  ;;  %v6172_v36 = vpop.eup %4575  ;;  %v6174_v13 = vadd.f32 %v2181_v51, %v1724_v24  ;;  %v6213_v0 = vld [vmem:[%s5410_s28 + $0xd8] sm:$0xff]  }
 0x172   : > { %7111 = vst [vmem:[#allocation26_spill] sm:$0xff] %v6157_v16  ;;  %7112 = vst [vmem:[#allocation23_spill] sm:$0xff] %v6161_v40  ;;  %4593 = vrcp.f32 %v2293_v6  ;;  %v6959_v44 = vunpack.c.l.bf16 %v6148_v3  ;;  %v6960_v11 = vunpack.c.l.bf16 %v6153_v49  ;;  %v4578_v17 = vpop.eup %4577  ;;  %v2555_v57 = vmul.f32 %v6143_v26, %v6958_v50  ;;  %v6219_v6 = vld [vmem:[%s5410_s28 + $0x148] sm:$0xff]   ;;  %v3762_v40 = vld [vmem:[%s5408_s12 + $0x3b8] sm:$0xff] }
 0x173   : > { %7115 = vst [vmem:[#allocation18_spill] sm:$0xff] %v6167_v45  ;;  %7117 = vst [vmem:[#allocation20_spill] sm:$0xff] %v6174_v13  ;;  %v2556_v34 = vmul.f32 %v4572_v18, %v6957_v38  ;;  %v2589_v24 = vmul.f32 %v6143_v26, %v6956_v7  ;;  %v2590_v25 = vmul.f32 %v4572_v18, %v6955_v4  ;;  %v4580_v35 = vpop.eup %4579  ;;  %4595 = vrcp.f32 %v2294_v30  ;;  %v3756_v50 = vld [vmem:[%s5408_s12 + $0x388] sm:$0xff] }
 0x174   : > { %v7121_v28 = vunpack.c.l.bf16 %v7120_v1  ;;  %v6964_v55 = vunpack.c.h.bf16 %v6148_v3  ;;  %v6968_v37 = vunpack.c.l.bf16 %v6170_v41  ;;  %v4582_v12 = vpop.eup %4581  ;;  %v7122_v63 = vunpack.c.h.bf16 %v7120_v1  ;;  %7123 = vst [vmem:[#allocation22_spill] sm:$0xff] %v6210_v23  ;;  %7124 = vst [vmem:[#allocation40_spill] sm:$0xff] %v6213_v0  ;;  %v3765_v16 = vld [vmem:[%s5408_s12 + $0x488] sm:$0xff] }
 0x175   : > { %v2520_v47 = vadd.f32 1.0, %v4578_v17  ;;  %v6963_v10 = vunpack.c.h.bf16 %v6153_v49  ;;  %v6962_v22 = vunpack.c.l.bf16 %v6192_v39  ;;  %v6961_v51 = vunpack.c.h.bf16 %v6192_v39  ;;  %7125 = vst [vmem:[#allocation41_spill] sm:$0xff] %v6219_v6  ;;  %v6228_v17 = vld [vmem:[%s5410_s28 + $0x150] sm:$0xff]  }
 0x176   : > { %v6197_v58 = vmul.f32 %v6134_v48, %v7121_v28  ;;  %v6204_v31 = vmul.f32 %v6136_v15, %v7122_v63  ;;  %v4584_v52 = vpop.eup %4583  ;;  %v2557_v60 = vmul.f32 %v4580_v35, %v6959_v44  ;;  %v2563_v33 = vadd.f32 %v2556_v34, %v2555_v57  ;;  %7126 = vst [vmem:[#allocation42_spill] sm:$0xff] %v6228_v17  ;;  %v3755_v44 = vld [vmem:[%s5408_s12 + $0x380] sm:$0xff]  ;;  %v3757_v34 = vld [vmem:[%s5408_s12 + $0x390] sm:$0xff] }
 0x177   : > { %v6221_v30 = vpop.eup %4585  ;;  %v2591_v1 = vmul.f32 %v4580_v35, %v6960_v11  ;;  %v2597_v28 = vadd.f32 %v2590_v25, %v2589_v24  ;;  %v2521_v4 = vadd.f32 1.0, %v4582_v12  ;;  %v2522_v27 = vadd.f32 1.0, %v4584_v52  ;;  %v6237_v24 = vld [vmem:[%s5410_s28 + $0x158] sm:$0xff]  }
 0x178   : > { %v4588_v63 = vpop.eup %4587  ;;  %v6965_v57 = vunpack.c.l.bf16 %v6219_v6  ;;  %7127 = vst [vmem:[#allocation43_spill] sm:$0xff] %v6237_v24  ;;  %4597 = vrcp.f32 %v2520_v47  ;;  %v2623_v11 = vmul.f32 %v6143_v26, %v6962_v22  ;;  %v2624_v52 = vmul.f32 %v4572_v18, %v6961_v51  ;;  %v3758_v22 = vld [vmem:[%s5408_s12 + $0x398] sm:$0xff] }
 0x179   : > { %v2558_v38 = vmul.f32 %v4588_v63, %v6964_v55  ;;  %v2564_v47 = vadd.f32 %v2563_v33, %v2557_v60  ;;  %v2592_v5 = vmul.f32 %v4588_v63, %v6963_v10  ;;  %v2598_v12 = vadd.f32 %v2597_v28, %v2591_v1  ;;  %v3759_v33 = vld [vmem:[%s5408_s12 + $0x3a0] sm:$0xff]  ;;  %v3760_v1 = vld [vmem:[%s5408_s12 + $0x3a8] sm:$0xff]  ;;  %v3761_v28 = vld [vmem:[%s5408_s12 + $0x3b0] sm:$0xff] }
 0x17a   : > { %v6239_v25 = vpop.eup %4589  ;;  %4599 = vrcp.f32 %v2521_v4  ;;  %v2625_v60 = vmul.f32 %v4580_v35, %v6965_v57  ;;  %v2651_v4 = vmul.f32 %v3755_v44, %v5876_v62  ;;  %v2652_v10 = vmul.f32 %v3756_v50, %v5876_v62  ;;  %v3764_v57 = vld [vmem:[%s5408_s12 + $0x480] sm:$0xff] }
 0x17b   : > { %7128 = vst [vmem:[#allocation44_spill] sm:$0xff] %v6239_v25  ;;  %v4592_v59 = vpop.eup %4591  ;;  %4601 = vrcp.f32 %v2522_v27  ;;  %v7131_v51 = vunpack.c.l.bf16 %v6210_v23  ;;  %v2631_v26 = vadd.f32 %v2624_v52, %v2623_v11  ;;  %v2653_v35 = vmul.f32 %v3757_v34, %v5876_v62 }
 0x17c   : > { %v6254_v7 = vpop.eup %4593  ;;  %v2559_v18 = vmul.f32 %v4592_v59, %v6968_v37  ;;  %v2565_v21 = vadd.f32 %v2564_v47, %v2558_v38  ;;  %v2599_v44 = vadd.f32 %v2598_v12, %v2592_v5  ;;  %v7132_v50 = vunpack.c.h.bf16 %v6219_v6  ;;  %v3766_v37 = vld [vmem:[%s5408_s12 + $0x490] sm:$0xff]  ;;  %v3767_v38 = vld [vmem:[%s5408_s12 + $0x498] sm:$0xff]  ;;  %v3769_v12 = vld [vmem:[%s5408_s12 + $0x4a8] sm:$0xff] }
 0x17d   : > { %7129 = vst [vmem:[#allocation45_spill] sm:$0xff] %v6254_v7  ;;  %v6267_v55 = vpop.eup %4595  ;;  %v2593_v27 = vmul.f32 %v4592_v59, %v7131_v51  ;;  %v2654_v32 = vmul.f32 %v3758_v22, %v5876_v62  ;;  %v7133_v39 = vunpack.c.l.bf16 %v6228_v17  ;;  %v2655_v11 = vmul.f32 %v3759_v33, %v5876_v62 }
 0x17e   : > { %7130 = vst [vmem:[#allocation46_spill] sm:$0xff] %v6267_v55  ;;  %v2626_v43 = vmul.f32 %v4588_v63, %v7132_v50  ;;  %v2656_v34 = vmul.f32 %v3760_v1, %v5876_v62  ;;  %v2657_v52 = vmul.f32 %v3761_v28, %v5876_v62  ;;  %v2659_v5 = vadd.f32 %v2651_v4, %v5420_v54  ;;  %v3768_v63 = vld [vmem:[%s5408_s12 + $0x4a0] sm:$0xff]  ;;  %v3770_v28 = vld [vmem:[%s5408_s12 + $0x4b0] sm:$0xff] }
 0x17f   : > { %v6283_v51 = vmul.f32 %v4592_v59, %v7133_v39  ;;  %v2660_v22 = vadd.f32 %v2652_v10, %v5420_v54  ;;  %v2677_v39 = vmul.f32 %v3764_v57, %v5908_v19  ;;  %v2678_v59 = vmul.f32 %v3765_v16, %v5908_v19  ;;  %v3773_v55 = vld [vmem:[%s5408_s12 + $0x580] sm:$0xff]  ;;  %v3774_v16 = vld [vmem:[%s5408_s12 + $0x588] sm:$0xff] }
 0x180   : > { %v2632_v47 = vadd.f32 %v2631_v26, %v2625_v60  ;;  %v2658_v33 = vmul.f32 %v3762_v40, %v5876_v62  ;;  %v2661_v1 = vadd.f32 %v2653_v35, %v5420_v54  ;;  %v2679_v50 = vmul.f32 %v3766_v37, %v5908_v19  ;;  %v3775_v26 = vld [vmem:[%s5408_s12 + $0x590] sm:$0xff] }
 0x181   : > { %v6301_v4 = vadd.f32 %v2565_v21, %v2559_v18  ;;  %v6303_v6 = vadd.f32 %v2599_v44, %v2593_v27  ;;  %v2662_v10 = vadd.f32 %v2654_v32, %v5420_v54  ;;  %v2680_v57 = vmul.f32 %v3767_v38, %v5908_v19  ;;  %v3771_v21 = vld [vmem:[%s5408_s12 + $0x4b8] sm:$0xff] }
 0x182   : > { %v4598_v62 = vpop.eup %4597  ;;  %v2663_v40 = vadd.f32 %v2655_v11, %v5420_v54  ;;  %v2664_v37 = vadd.f32 %v2656_v34, %v5420_v54  ;;  %v2681_v18 = vmul.f32 %v3768_v63, %v5908_v19  ;;  %v2682_v60 = vmul.f32 %v3769_v12, %v5908_v19  ;;  %v3776_v38 = vld [vmem:[%s5408_s12 + $0x598] sm:$0xff]  ;;  %v3778_v11 = vld [vmem:[%s5408_s12 + $0x5a8] sm:$0xff]  ;;  %v3779_v34 = vld [vmem:[%s5408_s12 + $0x5b0] sm:$0xff] }
 0x183   : > { %v2665_v32 = vadd.f32 %v2657_v52, %v5420_v54  ;;  %v2683_v27 = vmul.f32 %v3770_v28, %v5908_v19  ;;  %v2685_v35 = vadd.f32 %v2677_v39, %v2659_v5  ;;  %v2686_v44 = vadd.f32 %v2678_v59, %v2660_v22 }
 0x184   : > { %v6318_v49 = vpop.eup %4599  ;;  %v2687_v3 = vadd.f32 %v2679_v50, %v2661_v1  ;;  %v2703_v63 = vmul.f32 %v3773_v55, %v5937_v61  ;;  %v2704_v12 = vmul.f32 %v3774_v16, %v5937_v61  ;;  %v2705_v52 = vmul.f32 %v3775_v26, %v5937_v61  ;;  %v2870_v50 = vld [vmem:[%s5408_s12 + $0xc0] sm:$0xff]  ;;  %v2871_v16 = vld [vmem:[%s5408_s12 + $0xc8] sm:$0xff] }
 0x185   : > { %v6326_v42 = vpop.eup %4601  ;;  %v6328_v5 = vadd.f32 %v2632_v47, %v2626_v43  ;;  %v2666_v22 = vadd.f32 %v2658_v33, %v5420_v54  ;;  %v2684_v39 = vmul.f32 %v3771_v21, %v5908_v19  ;;  %v2688_v59 = vadd.f32 %v2680_v57, %v2662_v10  ;;  %v2872_v33 = vld [vmem:[%s5408_s12 + $0xd0] sm:$0xff] }
 0x186   : > { %v2689_v1 = vadd.f32 %v2681_v18, %v2663_v40  ;;  %v2690_v28 = vadd.f32 %v2682_v60, %v2664_v37  ;;  %v2706_v55 = vmul.f32 %v3776_v38, %v5937_v61  ;;  %v6338_v26 = vstv %s6289_s19  ;;  %v2873_v18 = vld [vmem:[%s5408_s12 + $0xd8] sm:$0xff]  ;;  %v2874_v38 = vld [vmem:[%s5408_s12 + $0xe0] sm:$0xff] }
 0x187   : > { %v2691_v7 = vadd.f32 %v2683_v27, %v2665_v32  ;;  %v2707_v43 = vmul.f32 %v3777_v2, %v5937_v61  ;;  %v2708_v47 = vmul.f32 %v3778_v11, %v5937_v61  ;;  %v2709_v19 = vmul.f32 %v3779_v34, %v5937_v61 }
 0x188   : > { %v7134_v10 = vunpack.c.h.bf16 %v6170_v41  ;;  %v2711_v40 = vadd.f32 %v2703_v63, %v2685_v35  ;;  %v2712_v37 = vadd.f32 %v2704_v12, %v2686_v44  ;;  %v2713_v21 = vadd.f32 %v2705_v52, %v2687_v3  ;;  %v2875_v12 = vld [vmem:[%s5408_s12 + $0xe8] sm:$0xff] }
 0x189   : > { %v7135_v60 = vunpack.c.h.bf16 %v6210_v23  ;;  %v7136_v32 = vunpack.c.h.bf16 %v6228_v17  ;;  %v2879_v11 = vmul.f32 %v6338_v26, %v2870_v50  ;;  %v2880_v34 = vmul.f32 %v6338_v26, %v2871_v16  ;;  %v3808_v17 = vld [vmem:[%s5408_s12 + $0x1d0] sm:$0xff]  ;;  %v3809_v23 = vld [vmem:[%s5408_s12 + $0x1d8] sm:$0xff] }
 0x18a   : > { %v6348_v57 = vmul.f32 %v4598_v62, %v7134_v10  ;;  %v7137_v35 = vunpack.c.l.bf16 %v6178_v56  ;;  %v6367_v44 = vadd.f32 %v2684_v39, %v2666_v22  ;;  %v2714_v63 = vadd.f32 %v2706_v55, %v2688_v59 }
 0x18b   : > { %v6353_v2 = vmul.f32 %v4598_v62, %v7135_v60  ;;  %v6357_v27 = vmul.f32 %v4598_v62, %v7136_v32  ;;  %v2881_v52 = vmul.f32 %v6338_v26, %v2872_v33  ;;  %v3806_v62 = vld [vmem:[%s5408_s12 + $0x1c0] sm:$0xff]  ;;  %v2715_v10 = vadd.f32 %v2707_v43, %v2689_v1  ;;  %v3807_v32 = vld [vmem:[%s5408_s12 + $0x1c8] sm:$0xff] }
 0x18c   : > { %v6365_v3 = vmul.f32 %v6318_v49, %v7137_v35  ;;  %v2716_v60 = vadd.f32 %v2708_v47, %v2690_v28  ;;  %v2717_v50 = vadd.f32 %v2709_v19, %v2691_v7  ;;  %v2882_v16 = vmul.f32 %v6338_v26, %v2873_v18  ;;  %v3810_v7 = vld [vmem:[%s5408_s12 + $0x1e0] sm:$0xff]  ;;  %v3811_v47 = vld [vmem:[%s5408_s12 + $0x1e8] sm:$0xff] }
 0x18d   : > { %v3781_v35 = vmul.f32 -1.442695, %v2711_v40  ;;  %v3782_v41 = vmul.f32 -1.442695, %v2712_v37  ;;  %v3783_v22 = vmul.f32 -1.442695, %v2713_v21  ;;  %v2883_v39 = vmul.f32 %v6338_v26, %v2874_v38 }
 0x18e   : > { %v2884_v59 = vmul.f32 %v6338_v26, %v2875_v12  ;;  %v2887_v1 = vadd.f32 %v2879_v11, %v5420_v54  ;;  %v2888_v28 = vadd.f32 %v2880_v34, %v5420_v54  ;;  %v6382_v55 = vstv %s6332_s24  ;;  %v3815_v38 = vld [vmem:[%s5408_s12 + $0x2c0] sm:$0xff]  ;;  %v3816_v11 = vld [vmem:[%s5408_s12 + $0x2c8] sm:$0xff] }
 0x18f   : > { %v2889_v43 = vadd.f32 %v2881_v52, %v5420_v54  ;;  %v2905_v19 = vmul.f32 %v3806_v62, %v6382_v55  ;;  %v2906_v33 = vmul.f32 %v3807_v32, %v6382_v55  ;;  %v2907_v40 = vmul.f32 %v3808_v17, %v6382_v55  ;;  %v2876_v52 = vld [vmem:[%s5408_s12 + $0xf0] sm:$0xff] }
 0x190   : > { %v3784_v37 = vmul.f32 -1.442695, %v2714_v63  ;;  %v2890_v21 = vadd.f32 %v2882_v16, %v5420_v54  ;;  %v2908_v18 = vmul.f32 %v3809_v23, %v6382_v55  ;;  %v6394_v34 = vstv %s6344_s25  ;;  %v3817_v17 = vld [vmem:[%s5408_s12 + $0x2d0] sm:$0xff]  ;;  %v3818_v63 = vld [vmem:[%s5408_s12 + $0x2d8] sm:$0xff] }
 0x191   : > { %4603 = vpow2.f32 %v3781_v35  ;;  %v3785_v12 = vmul.f32 -1.442695, %v2715_v10  ;;  %v2891_v62 = vadd.f32 %v2883_v39, %v5420_v54  ;;  %v2909_v32 = vmul.f32 %v3810_v7, %v6382_v55  ;;  %v2877_v16 = vld [vmem:[%s5408_s12 + $0xf8] sm:$0xff]  ;;  %v3820_v35 = vld [vmem:[%s5408_s12 + $0x2e8] sm:$0xff] }
 0x192   : > { %4605 = vpow2.f32 %v3782_v41  ;;  %v2892_v23 = vadd.f32 %v2884_v59, %v5420_v54  ;;  %v2910_v46 = vmul.f32 %v3811_v47, %v6382_v55  ;;  %v2913_v53 = vadd.f32 %v2905_v19, %v2887_v1  ;;  %v3780_v7 = vld [vmem:[%s5408_s12 + $0x5b8] sm:$0xff]  ;;  %v3812_v47 = vld [vmem:[%s5408_s12 + $0x1f0] sm:$0xff] }
 0x193   : > { %v2914_v25 = vadd.f32 %v2906_v33, %v2888_v28  ;;  %v2915_v10 = vadd.f32 %v2907_v40, %v2889_v43  ;;  %v2931_v20 = vmul.f32 %v3815_v38, %v6394_v34  ;;  %v2932_v39 = vmul.f32 %v3816_v11, %v6394_v34  ;;  %v3813_v19 = vld [vmem:[%s5408_s12 + $0x1f8] sm:$0xff] }
 0x194   : > { %v2885_v13 = vmul.f32 %v6338_v26, %v2876_v52  ;;  %v2916_v41 = vadd.f32 %v2908_v18, %v2890_v21  ;;  %v2933_v45 = vmul.f32 %v3817_v17, %v6394_v34  ;;  %v2934_v59 = vmul.f32 %v3818_v63, %v6394_v34 }
 0x195   : > { %4607 = vpow2.f32 %v3783_v22  ;;  %v2886_v1 = vmul.f32 %v6338_v26, %v2877_v16  ;;  %v2917_v28 = vadd.f32 %v2909_v32, %v2891_v62  ;;  %v2935_v43 = vmul.f32 %v3819_v9, %v6394_v34 }
 0x196   : > { %4609 = vpow2.f32 %v3784_v37  ;;  %v2918_v33 = vadd.f32 %v2910_v46, %v2892_v23  ;;  %v2936_v40 = vmul.f32 %v3820_v35, %v6394_v34  ;;  %v2939_v38 = vadd.f32 %v2931_v20, %v2913_v53  ;;  %v3821_v53 = vld [vmem:[%s5408_s12 + $0x2f0] sm:$0xff] }
 0x197   : > { %v2710_v21 = vmul.f32 %v3780_v7, %v5937_v61  ;;  %v3786_v18 = vmul.f32 -1.442695, %v2716_v60  ;;  %v2940_v11 = vadd.f32 %v2932_v39, %v2914_v25  ;;  %v2941_v52 = vadd.f32 %v2933_v45, %v2915_v10  ;;  %v3822_v45 = vld [vmem:[%s5408_s12 + $0x2f8] sm:$0xff] }
 0x198   : > { %v3787_v22 = vmul.f32 -1.442695, %v2717_v50  ;;  %v2893_v17 = vadd.f32 %v2885_v13, %v5420_v54  ;;  %v2911_v62 = vmul.f32 %v3812_v47, %v6382_v55  ;;  %v2942_v32 = vadd.f32 %v2934_v59, %v2916_v41 }
 0x199   : > { %v7138_v9 = vunpack.c.l.bf16 %v6213_v0  ;;  %v2894_v46 = vadd.f32 %v2886_v1, %v5420_v54  ;;  %v2912_v20 = vmul.f32 %v3813_v19, %v6382_v55  ;;  %v2943_v63 = vadd.f32 %v2935_v43, %v2917_v28 }
 0x19a   : > { %v2634_v61 = vadd.f32 %v6328_v5, %v6283_v51  ;;  %4611 = vpow2.f32 %v3785_v12  ;;  %v2944_v25 = vadd.f32 %v2936_v40, %v2918_v33  ;;  %v3823_v13 = vmul.f32 -1.442695, %v2939_v38 }
 0x19b   : > { %v2595_v37 = vmul.f32 %v6318_v49, %v7138_v9  ;;  %v4604_v60 = vpop.eup %4603  ;;  %v2718_v50 = vadd.f32 %v2710_v21, %v6367_v44  ;;  %4613 = vpow2.f32 %v3786_v18  ;;  %v3824_v16 = vmul.f32 -1.442695, %v2940_v11  ;;  %v7143_v9 = vld [vmem:[#allocation29_spill] sm:$0xff] }
 0x19c   : > { %v3825_v23 = vmul.f32 -1.442695, %v2941_v52  ;;  %v4606_v10 = vpop.eup %4605  ;;  %4615 = vpow2.f32 %v3787_v22  ;;  %v2919_v35 = vadd.f32 %v2911_v62, %v2893_v17  ;;  %v2937_v39 = vmul.f32 %v3821_v53, %v6394_v34  ;;  %v7145_v53 = vld [vmem:[#allocation33_spill] sm:$0xff] }
 0x19d   : > { %v3826_v7 = vmul.f32 -1.442695, %v2942_v32  ;;  %v2920_v41 = vadd.f32 %v2912_v20, %v2894_v46  ;;  %v2938_v59 = vmul.f32 %v3822_v45, %v6394_v34  ;;  %4617 = vpow2.f32 %v3823_v13 }
 0x19e   : > { %v3827_v51 = vmul.f32 -1.442695, %v2943_v63  ;;  %v2567_v5 = vadd.f32 %v6301_v4, %v6348_v57  ;;  %v7139_v12 = vunpack.c.l.bf16 %v6237_v24  ;;  %4619 = vpow2.f32 %v3824_v16  ;;  %v7150_v16 = vld [vmem:[#allocation24_spill] sm:$0xff] }
 0x19f   : > { %v3828_v1 = vmul.f32 -1.442695, %v2944_v25  ;;  %v4608_v47 = vpop.eup %4607  ;;  %v2601_v28 = vadd.f32 %v6303_v6, %v6353_v2  ;;  %v2635_v43 = vadd.f32 %v2634_v61, %v6357_v27  ;;  %v3788_v19 = vmul.f32 -1.442695, %v2718_v50 }
 0x1a0   : > { %v2629_v44 = vmul.f32 %v6318_v49, %v7139_v12  ;;  %4621 = vpow2.f32 %v3825_v23  ;;  %v4610_v33 = vpop.eup %4609  ;;  %v7140_v40 = vunpack.c.h.bf16 %v6178_v56  ;;  %v2743_v4 = vadd.f32 1.0, %v4604_v60  ;;  %v3851_v56 = vld [vmem:[%s5408_s12 + $0x3e0] sm:$0xff] }
 0x1a1   : > { %v2945_v57 = vadd.f32 %v2937_v39, %v2919_v35  ;;  %4623 = vpow2.f32 %v3826_v7  ;;  %v7141_v49 = vunpack.c.h.bf16 %v6213_v0  ;;  %v2744_v18 = vadd.f32 1.0, %v4606_v10  ;;  %v7152_v7 = vld [vmem:[#allocation30_spill] sm:$0xff] }
 0x1a2   : > { %v2562_v38 = vmul.f32 %v6326_v42, %v7140_v40  ;;  %v2946_v11 = vadd.f32 %v2938_v59, %v2920_v41  ;;  %4625 = vpow2.f32 %v3827_v51  ;;  %v2568_v6 = vadd.f32 %v2567_v5, %v6365_v3  ;;  %v6496_v40 = vld [vmem:[%s5410_s28 + $0x60] sm:$0xff]   ;;  %v3850_v0 = vld [vmem:[%s5408_s12 + $0x3d8] sm:$0xff] }
 0x1a3   : > { %v2596_v21 = vmul.f32 %v6326_v42, %v7141_v49  ;;  %v7142_v2 = vunpack.c.h.bf16 %v6237_v24  ;;  %v2745_v52 = vadd.f32 1.0, %v4608_v47  ;;  %4627 = vpow2.f32 %v3828_v1  ;;  %7157 = vst [vmem:[#allocation33_spill] sm:$0xff] %v6496_v40 }
 0x1a4   : > { %v2602_v22 = vadd.f32 %v2601_v28, %v2595_v37  ;;  %v2636_v17 = vadd.f32 %v2635_v43, %v2629_v44  ;;  %4629 = vpow2.f32 %v3788_v19  ;;  %v2746_v62 = vadd.f32 1.0, %v4610_v33  ;;  %v4612_v32 = vpop.eup %4611 }
 0x1a5   : > { %v2630_v27 = vmul.f32 %v6326_v42, %v7142_v2  ;;  %v7144_v46 = vunpack.c.l.bf16 %v7143_v9  ;;  %v7146_v63 = vunpack.c.l.bf16 %v7145_v53  ;;  %4631 = vrcp.f32 %v2743_v4  ;;  %v4614_v45 = vpop.eup %4613 }
 0x1a6   : > { %v3829_v3 = vmul.f32 -1.442695, %v2945_v57  ;;  %v7147_v42 = vunpack.c.h.bf16 %v7143_v9  ;;  %v7148_v25 = vunpack.c.h.bf16 %v7145_v53  ;;  %4633 = vrcp.f32 %v2744_v18  ;;  %v6466_v50 = vpop.eup %4615  ;;  %v7158_v18 = vld [vmem:[#allocation18_spill] sm:$0xff] }
 0x1a7   : > { %v2361_v20 = vmul.f32 %v6134_v48, %v7144_v46  ;;  %v6456_v61 = vmul.f32 %v6134_v48, %v7146_v63  ;;  %v3830_v60 = vmul.f32 -1.442695, %v2946_v11  ;;  %7149 = vst [vmem:[#allocation29_spill] sm:$0xff] %v6466_v50  ;;  %v7151_v23 = vunpack.c.l.bf16 %v7150_v16  ;;  %v4618_v39 = vpop.eup %4617  ;;  %v6519_v46 = vld [vmem:[%s5410_s28 + $0x78] sm:$0xff]  }
 0x1a8   : > { %v2362_v37 = vmul.f32 %v6136_v15, %v7147_v42  ;;  %v6464_v13 = vmul.f32 %v6136_v15, %v7148_v25  ;;  %v2335_v10 = vadd.f32 %v6204_v31, %v6197_v58  ;;  %v2569_v35 = vadd.f32 %v2568_v6, %v2562_v38  ;;  %v4620_v5 = vpop.eup %4619  ;;  %v7159_v6 = vld [vmem:[#allocation20_spill] sm:$0xff] }
 0x1a9   : > { %v2329_v48 = vmul.f32 %v6159_v29, %v7151_v23  ;;  %4635 = vrcp.f32 %v2745_v52  ;;  %v7153_v41 = vunpack.c.l.bf16 %v7152_v7  ;;  %v2603_v59 = vadd.f32 %v2602_v22, %v2596_v21  ;;  %v6510_v52 = vld [vmem:[%s5410_s28 + $0x68] sm:$0xff]   ;;  %v6513_v22 = vld [vmem:[%s5410_s28 + $0x70] sm:$0xff]   ;;  %v6541_v23 = vld [vmem:[%s5410_s28 + $0xf8] sm:$0xff]  }
 0x1aa   : > { %v2637_v51 = vadd.f32 %v2636_v17, %v2630_v27  ;;  %4637 = vrcp.f32 %v2746_v62  ;;  %v7154_v12 = vunpack.c.h.bf16 %v7150_v16  ;;  %v7155_v58 = vunpack.c.h.bf16 %v7152_v7  ;;  %v4622_v47 = vpop.eup %4621  ;;  %7160 = vst [vmem:[#allocation24_spill] sm:$0xff] %v6510_v52  ;;  %v6530_v42 = vld [vmem:[%s5410_s28 + $0xe8] sm:$0xff]   ;;  %v6538_v16 = vld [vmem:[%s5410_s28 + $0xf0] sm:$0xff]   ;;  %v6549_v7 = vld [vmem:[%s5410_s28 + $0x160] sm:$0xff]  }
 0x1ab   : > { %v6476_v15 = vmul.f32 %v6159_v29, %v7153_v41  ;;  %4639 = vpow2.f32 %v3829_v3  ;;  %v2971_v1 = vadd.f32 1.0, %v4618_v39  ;;  %v7156_v28 = vunpack.c.l.bf16 %v5817_v14  ;;  %v4624_v38 = vpop.eup %4623  ;;  %7163 = vst [vmem:[#allocation20_spill] sm:$0xff] %v6530_v42  ;;  %7165 = vst [vmem:[#allocation48_spill] sm:$0xff] %v6549_v7  ;;  %v6552_v41 = vld [vmem:[%s5410_s28 + $0x168] sm:$0xff]  }
 0x1ac   : > { %v6481_v44 = vmul.f32 %v6172_v36, %v7154_v12  ;;  %v6486_v31 = vmul.f32 %v6172_v36, %v7155_v58  ;;  %v6493_v19 = vadd.f32 %v2362_v37, %v2361_v20  ;;  %4641 = vpow2.f32 %v3830_v60  ;;  %v4626_v21 = vpop.eup %4625  ;;  %7166 = vst [vmem:[#allocation49_spill] sm:$0xff] %v6552_v41 }
 0x1ad   : > { %v6491_v43 = vmul.f32 %v6221_v30, %v7156_v28  ;;  %v2972_v33 = vadd.f32 1.0, %v4620_v5  ;;  %v6498_v4 = vadd.f32 %v2335_v10, %v2329_v48  ;;  %v6501_v57 = vadd.f32 %v2569_v35, %v6164_v8  ;;  %v4628_v17 = vpop.eup %4627  ;;  %v3849_v35 = vld [vmem:[%s5408_s12 + $0x3d0] sm:$0xff] }
 0x1ae   : > { %v2973_v49 = vadd.f32 1.0, %v4622_v47  ;;  %4643 = vrcp.f32 %v2971_v1  ;;  %v6504_v11 = vadd.f32 %v2603_v59, %v7158_v18  ;;  %v6507_v2 = vadd.f32 %v2637_v51, %v7159_v6  ;;  %v6521_v20 = vpop.eup %4629  ;;  %v6561_v1 = vld [vmem:[%s5410_s28 + $0x170] sm:$0xff]   ;;  %v6564_v47 = vld [vmem:[%s5410_s28 + $0x178] sm:$0xff]   ;;  %v3847_v18 = vld [vmem:[%s5408_s12 + $0x3c0] sm:$0xff] }
 0x1af   : > { %v2974_v27 = vadd.f32 1.0, %v4624_v38  ;;  %4645 = vrcp.f32 %v2972_v33  ;;  %v6515_v8 = vadd.f32 1.0, %v4612_v32  ;;  %v2975_v62 = vadd.f32 1.0, %v4626_v21  ;;  %7161 = vst [vmem:[#allocation30_spill] sm:$0xff] %v6521_v20  ;;  %v6527_v32 = vld [vmem:[%s5410_s28 + $0xe0] sm:$0xff]   ;;  %v6532_v37 = vpop.eup %4631  ;;  %v3848_v6 = vld [vmem:[%s5408_s12 + $0x3c8] sm:$0xff] }
 0x1b0   : > { %4647 = vrcp.f32 %v2973_v49  ;;  %v6998_v9 = vunpack.c.l.bf16 %v6496_v40  ;;  %v6523_v53 = vadd.f32 1.0, %v4614_v45  ;;  %v2976_v63 = vadd.f32 1.0, %v4628_v17  ;;  %7162 = vst [vmem:[#allocation18_spill] sm:$0xff] %v6527_v32  ;;  %v6543_v48 = vpop.eup %4633 }
 0x1b1   : > { %4649 = vrcp.f32 %v2974_v27  ;;  %v7000_v3 = vunpack.c.h.bf16 %v6496_v40  ;;  %v7007_v25 = vunpack.c.l.bf16 %v6510_v52  ;;  %7164 = vst [vmem:[#allocation47_spill] sm:$0xff] %v6543_v48  ;;  %v6999_v51 = vunpack.c.l.bf16 %v6527_v32 }
 0x1b2   : > { %4651 = vrcp.f32 %v2975_v62  ;;  %v7003_v5 = vunpack.c.h.bf16 %v6527_v32  ;;  %v7006_v17 = vunpack.c.l.bf16 %v6549_v7  ;;  %v3107_v12 = vmul.f32 %v3847_v18, %v6338_v26 }
 0x1b3   : > { %4653 = vrcp.f32 %v2976_v63  ;;  %v6554_v59 = vpop.eup %4635  ;;  %v3108_v62 = vmul.f32 %v3848_v6, %v6338_v26  ;;  %v3109_v49 = vmul.f32 %v3849_v35, %v6338_v26  ;;  %v7170_v60 = vunpack.c.h.bf16 %v6549_v7 }
 0x1b4   : > { %7167 = vst [vmem:[#allocation50_spill] sm:$0xff] %v6554_v59  ;;  %v6566_v28 = vpop.eup %4637  ;;  %v7174_v7 = vunpack.c.l.bf16 %v6513_v22  ;;  %v7180_v50 = vunpack.c.h.bf16 %v6561_v1  ;;  %vm3369_vm2 = vcmask (!%p3897_p3), 16400   ;;  %vm3411_vm3 = vcmask (!%p3897_p3), 17408  }
 0x1b5   : > { %7168 = vst [vmem:[#allocation51_spill] sm:$0xff] %v6566_v28  ;;  %v4640_v27 = vpop.eup %4639 }
 0x1b6   : > { %v4642_v10 = vpop.eup %4641  ;;  %v2977_v33 = vadd.f32 1.0, %v4640_v27 }
 0x1b7   : > { %v2978_v58 = vadd.f32 1.0, %v4642_v10 }
 0x1b8   : > { %v4644_v45 = vpop.eup %4643  ;;  %4655 = vrcp.f32 %v2977_v33 }
 0x1b9   : > { %v4646_v63 = vpop.eup %4645  ;;  %v3011_v39 = vmul.f32 %v4644_v45, %v6998_v9  ;;  %v3045_v27 = vmul.f32 %v4644_v45, %v6999_v51  ;;  %4657 = vrcp.f32 %v2978_v58  ;;  %v3079_v33 = vmul.f32 %v4644_v45, %v7006_v17 }
 0x1ba   : > { %v4648_v21 = vpop.eup %4647  ;;  %v3012_v10 = vmul.f32 %v4646_v63, %v7000_v3  ;;  %v3046_v18 = vmul.f32 %v4646_v63, %v7003_v5  ;;  %v7169_v51 = vunpack.c.l.bf16 %v6530_v42  ;;  %v3080_v58 = vmul.f32 %v4646_v63, %v7170_v60 }
 0x1bb   : > { %v4650_v6 = vpop.eup %4649  ;;  %v3013_v9 = vmul.f32 %v4648_v21, %v7007_v25  ;;  %v7171_v3 = vunpack.c.l.bf16 %v6552_v41  ;;  %v7172_v5 = vunpack.c.h.bf16 %v6510_v52  ;;  %v7173_v17 = vunpack.c.h.bf16 %v6530_v42  ;;  %v3853_v42 = vld [vmem:[%s5408_s12 + $0x3f0] sm:$0xff] }
 0x1bc   : > { %v3047_v35 = vmul.f32 %v4648_v21, %v7169_v51  ;;  %v4652_v24 = vpop.eup %4651  ;;  %v3019_v45 = vadd.f32 %v3012_v10, %v3011_v39  ;;  %v3053_v40 = vadd.f32 %v3046_v18, %v3045_v27  ;;  %v7175_v60 = vunpack.c.l.bf16 %v6538_v16  ;;  %v3852_v10 = vld [vmem:[%s5408_s12 + $0x3e8] sm:$0xff] }
 0x1bd   : > { %v3081_v38 = vmul.f32 %v4648_v21, %v7171_v3  ;;  %v3014_v32 = vmul.f32 %v4650_v6, %v7172_v5  ;;  %v3048_v25 = vmul.f32 %v4650_v6, %v7173_v17  ;;  %v4654_v51 = vpop.eup %4653  ;;  %v3015_v28 = vmul.f32 %v4652_v24, %v7174_v7  ;;  %v3854_v7 = vld [vmem:[%s5408_s12 + $0x3f8] sm:$0xff] }
 0x1be   : > { %v3049_v63 = vmul.f32 %v4652_v24, %v7175_v60  ;;  %v7176_v3 = vunpack.c.h.bf16 %v6552_v41  ;;  %v7177_v5 = vunpack.c.l.bf16 %v6561_v1  ;;  %v7178_v17 = vunpack.c.h.bf16 %v6513_v22 }
 0x1bf   : > { %v3020_v18 = vadd.f32 %v3019_v45, %v3013_v9  ;;  %v7179_v52 = vunpack.c.h.bf16 %v6538_v16  ;;  %v3054_v20 = vadd.f32 %v3053_v40, %v3047_v35  ;;  %v3084_v60 = vmul.f32 %v4654_v51, %v7180_v50 }
 0x1c0   : > { %v3082_v21 = vmul.f32 %v4650_v6, %v7176_v3  ;;  %v3083_v39 = vmul.f32 %v4652_v24, %v7177_v5  ;;  %v3016_v27 = vmul.f32 %v4654_v51, %v7178_v17  ;;  %v3087_v48 = vadd.f32 %v3080_v58, %v3079_v33 }
 0x1c1   : > { %v3050_v59 = vmul.f32 %v4654_v51, %v7179_v52  ;;  %v3110_v6 = vmul.f32 %v3850_v0, %v6338_v26  ;;  %v3111_v3 = vmul.f32 %v3851_v56, %v6338_v26  ;;  %v3021_v24 = vadd.f32 %v3020_v18, %v3014_v32 }
 0x1c2   : > { %v3055_v5 = vadd.f32 %v3054_v20, %v3048_v25  ;;  %v3112_v41 = vmul.f32 %v3852_v10, %v6338_v26  ;;  %v3113_v9 = vmul.f32 %v3853_v42, %v6338_v26  ;;  %v3088_v45 = vadd.f32 %v3087_v48, %v3081_v38  ;;  %v4656_v32 = vpop.eup %4655  ;;  %v3859_v10 = vld [vmem:[%s5408_s12 + $0x4d8] sm:$0xff] }
 0x1c3   : > { %v3114_v52 = vmul.f32 %v3854_v7, %v6338_v26  ;;  %v3115_v40 = vadd.f32 %v3107_v12, %v5420_v54  ;;  %v3116_v35 = vadd.f32 %v3108_v62, %v5420_v54  ;;  %v3022_v50 = vadd.f32 %v3021_v24, %v3015_v28  ;;  %v3856_v12 = vld [vmem:[%s5408_s12 + $0x4c0] sm:$0xff]  ;;  %v4658_v38 = vpop.eup %4657 }
 0x1c4   : > { %v3056_v0 = vadd.f32 %v3055_v5, %v3049_v63  ;;  %v3117_v56 = vadd.f32 %v3109_v49, %v5420_v54  ;;  %v3118_v20 = vadd.f32 %v3110_v6, %v5420_v54  ;;  %v3089_v25 = vadd.f32 %v3088_v45, %v3082_v21  ;;  %v3857_v63 = vld [vmem:[%s5408_s12 + $0x4c8] sm:$0xff]  ;;  %v3858_v21 = vld [vmem:[%s5408_s12 + $0x4d0] sm:$0xff]  ;;  %v3860_v5 = vld [vmem:[%s5408_s12 + $0x4e0] sm:$0xff] }
 0x1c5   : > { %v3119_v42 = vadd.f32 %v3111_v3, %v5420_v54  ;;  %v3120_v26 = vadd.f32 %v3112_v41, %v5420_v54  ;;  %v3121_v48 = vadd.f32 %v3113_v9, %v5420_v54  ;;  %v7181_v28 = vunpack.c.l.bf16 %v6519_v46 }
 0x1c6   : > { %v3023_v33 = vadd.f32 %v3022_v50, %v3016_v27  ;;  %v7182_v49 = vunpack.c.l.bf16 %v6541_v23  ;;  %v3057_v51 = vadd.f32 %v3056_v0, %v3050_v59  ;;  %v7183_v41 = vunpack.c.h.bf16 %v6519_v46  ;;  %v3861_v0 = vld [vmem:[%s5408_s12 + $0x4e8] sm:$0xff] }
 0x1c7   : > { %v3017_v62 = vmul.f32 %v4656_v32, %v7181_v28  ;;  %v7184_v18 = vunpack.c.h.bf16 %v6541_v23  ;;  %v7185_v6 = vunpack.c.l.bf16 %v6564_v47  ;;  %v7186_v27 = vunpack.c.h.bf16 %v6564_v47  ;;  %v3862_v28 = vld [vmem:[%s5408_s12 + $0x4f0] sm:$0xff] }
 0x1c8   : > { %v3051_v58 = vmul.f32 %v4656_v32, %v7182_v49  ;;  %v3018_v17 = vmul.f32 %v4658_v38, %v7183_v41  ;;  %v3090_v50 = vadd.f32 %v3089_v25, %v3083_v39  ;;  %v3122_v59 = vadd.f32 %v3114_v52, %v5420_v54  ;;  %v3863_v49 = vld [vmem:[%s5408_s12 + $0x4f8] sm:$0xff] }
 0x1c9   : > { %v3052_v7 = vmul.f32 %v4658_v38, %v7184_v18  ;;  %v3085_v3 = vmul.f32 %v4656_v32, %v7185_v6  ;;  %v3086_v24 = vmul.f32 %v4658_v38, %v7186_v27  ;;  %v3024_v9 = vadd.f32 %v3023_v33, %v3017_v62  ;;  %v3868_v6 = vld [vmem:[%s5408_s12 + $0x5d8] sm:$0xff]  ;;  %v3869_v27 = vld [vmem:[%s5408_s12 + $0x5e0] sm:$0xff] }
 0x1ca   : > { %v3058_v45 = vadd.f32 %v3057_v51, %v3051_v58  ;;  %v3133_v41 = vmul.f32 %v3856_v12, %v6382_v55  ;;  %v3134_v18 = vmul.f32 %v3857_v63, %v6382_v55  ;;  %v3135_v32 = vmul.f32 %v3858_v21, %v6382_v55  ;;  %v3865_v51 = vld [vmem:[%s5408_s12 + $0x5c0] sm:$0xff]  ;;  %v3866_v63 = vld [vmem:[%s5408_s12 + $0x5c8] sm:$0xff] }
 0x1cb   : > { %v3136_v38 = vmul.f32 %v3859_v10, %v6382_v55  ;;  %v3025_v62 = vadd.f32 %v3024_v9, %v3018_v17  ;;  %v3091_v25 = vadd.f32 %v3090_v50, %v3084_v60  ;;  %v3137_v54 = vmul.f32 %v3860_v5, %v6382_v55 }
 0x1cc   : > { %v3059_v39 = vadd.f32 %v3058_v45, %v3052_v7  ;;  %v3138_v52 = vmul.f32 %v3861_v0, %v6382_v55  ;;  %v3139_v33 = vmul.f32 %v3862_v28, %v6382_v55  ;;  %v3140_v12 = vmul.f32 %v3863_v49, %v6382_v55  ;;  %v3867_v7 = vld [vmem:[%s5408_s12 + $0x5d0] sm:$0xff]  ;;  %v3870_v0 = vld [vmem:[%s5408_s12 + $0x5e8] sm:$0xff]  ;;  %v3872_v28 = vld [vmem:[%s5408_s12 + $0x5f8] sm:$0xff] }
 0x1cd   : > { %v3141_v58 = vadd.f32 %v3133_v41, %v3115_v40  ;;  %v3027_v21 = vadd.f32 %v3025_v62, %v6501_v57  ;;  %v3092_v17 = vadd.f32 %v3091_v25, %v3085_v3  ;;  %v3142_v60 = vadd.f32 %v3134_v18, %v3116_v35  ;;  %v3871_v55 = vld [vmem:[%s5408_s12 + $0x5f0] sm:$0xff] }
 0x1ce   : > { %v3061_v10 = vadd.f32 %v3059_v39, %v6504_v11  ;;  %v3143_v5 = vadd.f32 %v3135_v32, %v3117_v56  ;;  %v3144_v9 = vadd.f32 %v3136_v38, %v3118_v20  ;;  %v3145_v45 = vadd.f32 %v3137_v54, %v3119_v42 }
 0x1cf   : > { %v3146_v50 = vadd.f32 %v3138_v52, %v3120_v26  ;;  %3028 = vst [vmem:[#allocation2] sm:$0xff] %v3027_v21  ;;  %v3093_v40 = vadd.f32 %v3092_v17, %v3086_v24  ;;  %v3147_v49 = vadd.f32 %v3139_v33, %v3121_v48  ;;  %v3148_v41 = vadd.f32 %v3140_v12, %v3122_v59 }
 0x1d0   : > { %3062 = vst [vmem:[#allocation2 + $0x8] sm:$0xff] %v3061_v10  ;;  %v3159_v57 = vmul.f32 %v3865_v51, %v6394_v34  ;;  %v3160_v11 = vmul.f32 %v3866_v63, %v6394_v34  ;;  %v3161_v35 = vmul.f32 %v3867_v7, %v6394_v34  ;;  %v3162_v3 = vmul.f32 %v3868_v6, %v6394_v34 }
 0x1d1   : > { %v3163_v56 = vmul.f32 %v3869_v27, %v6394_v34  ;;  %v3095_v20 = vadd.f32 %v3093_v40, %v6507_v2  ;;  %v3164_v42 = vmul.f32 %v3870_v0, %v6394_v34  ;;  %v3165_v26 = vmul.f32 %v3871_v55, %v6394_v34 }
 0x1d2   : > { %v3166_v24 = vmul.f32 %v3872_v28, %v6394_v34  ;;  %v3167_v48 = vadd.f32 %v3159_v57, %v3141_v58  ;;  %v3168_v59 = vadd.f32 %v3160_v11, %v3142_v60  ;;  %v3169_v18 = vadd.f32 %v3161_v35, %v3143_v5  ;;  %v7187_v58 = vld [vmem:[#allocation31_spill] sm:$0xff]  ;;  %v7194_v5 = vld [vmem:[#allocation37_spill] sm:$0xff] }
 0x1d3   : > { %v3170_v32 = vadd.f32 %v3162_v3, %v3144_v9  ;;  %v2370_v38 = vadd.f32 %v6493_v19, %v6476_v15  ;;  %4659 = vrcp.f32 %v6515_v8  ;;  %3096 = vst [vmem:[#allocation2 + $0x10] sm:$0xff] %v3095_v20  ;;  %v3171_v62 = vadd.f32 %v3163_v56, %v3145_v45  ;;  %v7189_v19 = vld [vmem:[#allocation34_spill] sm:$0xff]  ;;  %v7197_v45 = vld [vmem:[#allocation47_spill] sm:$0xff]  ;;  %v7204_v35 = vld [vmem:[#allocation45_spill] sm:$0xff] }
 0x1d4   : > { %v3172_v39 = vadd.f32 %v3164_v42, %v3146_v50  ;;  %v3173_v25 = vadd.f32 %v3165_v26, %v3147_v49  ;;  %v3873_v2 = vmul.f32 -1.442695, %v3167_v48  ;;  %v3874_v54 = vmul.f32 -1.442695, %v3168_v59  ;;  %v7198_v50 = vld [vmem:[#allocation21_spill] sm:$0xff]  ;;  %v7202_v57 = vld [vmem:[#allocation27_spill] sm:$0xff] }
 0x1d5   : > { %v3875_v52 = vmul.f32 -1.442695, %v3169_v18  ;;  %v2337_v33 = vadd.f32 %v6498_v4, %v6481_v44  ;;  %4661 = vrcp.f32 %v6523_v53  ;;  %v3174_v34 = vadd.f32 %v3166_v24, %v3148_v41  ;;  %v7192_v53 = vld [vmem:[#allocation44_spill] sm:$0xff]  ;;  %v7205_v56 = vld [vmem:[#allocation35_spill] sm:$0xff]  ;;  %v7207_v26 = vld [vmem:[#allocation29_spill] sm:$0xff] }
 0x1d6   : > { %v3876_v12 = vmul.f32 -1.442695, %v3170_v32  ;;  %v7188_v51 = vunpack.c.l.bf16 %v7187_v58  ;;  %v7190_v8 = vunpack.c.l.bf16 %v7189_v19  ;;  %4663 = vpow2.f32 %v3873_v2  ;;  %v7208_v18 = vld [vmem:[#allocation32_spill] sm:$0xff] }
 0x1d7   : > { %v3877_v21 = vmul.f32 -1.442695, %v3171_v62  ;;  %v2371_v10 = vadd.f32 %v2370_v38, %v6486_v31  ;;  %v2403_v17 = vadd.f32 %v6464_v13, %v6456_v61  ;;  %4665 = vpow2.f32 %v3874_v54  ;;  %v7210_v62 = vld [vmem:[#allocation30_spill] sm:$0xff] }
 0x1d8   : > { %v2365_v15 = vmul.f32 %v6221_v30, %v7188_v51  ;;  %v2397_v63 = vmul.f32 %v6159_v29, %v7190_v8  ;;  %v3878_v44 = vmul.f32 -1.442695, %v3172_v39  ;;  %v7191_v4 = vunpack.c.h.bf16 %v5817_v14  ;;  %v7213_v54 = vld [vmem:[#allocation50_spill] sm:$0xff] }
 0x1d9   : > { %v7193_v7 = vunpack.c.h.bf16 %v7189_v19  ;;  %4667 = vpow2.f32 %v3875_v52  ;;  %v3879_v27 = vmul.f32 -1.442695, %v3173_v25  ;;  %v2338_v29 = vadd.f32 %v2337_v33, %v6491_v43  ;;  %v7211_v25 = vld [vmem:[#allocation28_spill] sm:$0xff]  ;;  %v7217_v19 = vld [vmem:[#allocation46_spill] sm:$0xff] }
 0x1da   : > { %v2332_v60 = vmul.f32 %v7192_v53, %v7191_v4  ;;  %v7195_v9 = vunpack.c.l.bf16 %v7194_v5  ;;  %4669 = vpow2.f32 %v3876_v12  ;;  %v3880_v61 = vmul.f32 -1.442695, %v3174_v34  ;;  %v7214_v34 = vld [vmem:[#allocation16_spill] sm:$0xff] }
 0x1db   : > { %v2398_v6 = vmul.f32 %v6172_v36, %v7193_v7  ;;  %v7196_v13 = vunpack.c.h.bf16 %v7194_v5  ;;  %v7199_v0 = vunpack.c.l.bf16 %v7198_v50  ;;  %v7200_v36 = vunpack.c.h.bf16 %v7198_v50  ;;  %v7220_v7 = vld [vmem:[#allocation39_spill] sm:$0xff] }
 0x1dc   : > { %v2783_v31 = vmul.f32 %v6532_v37, %v7195_v9  ;;  %4671 = vpow2.f32 %v3877_v21  ;;  %v7201_v43 = vunpack.c.h.bf16 %v7187_v58  ;;  %v2372_v49 = vadd.f32 %v2371_v10, %v2365_v15 }
 0x1dd   : > { %v2784_v14 = vmul.f32 %v7197_v45, %v7196_v13  ;;  %v2817_v55 = vmul.f32 %v6532_v37, %v7199_v0  ;;  %v2818_v28 = vmul.f32 %v7197_v45, %v7200_v36  ;;  %v2404_v41 = vadd.f32 %v2403_v17, %v2397_v63  ;;  %v6731_v48 = vpop.eup %4659 }
 0x1de   : > { %v2366_v40 = vmul.f32 %v7192_v53, %v7201_v43  ;;  %4673 = vpow2.f32 %v3878_v44  ;;  %v7203_v11 = vunpack.c.l.bf16 %v7202_v57  ;;  %v7206_v20 = vunpack.c.l.bf16 %v7205_v56 }
 0x1df   : > { %v2749_v24 = vadd.f32 1.0, %v7207_v26  ;;  %4675 = vpow2.f32 %v3879_v27  ;;  %v2339_v59 = vadd.f32 %v2338_v29, %v2332_v60  ;;  %v7209_v32 = vunpack.c.l.bf16 %v7208_v18  ;;  %v6743_v51 = vpop.eup %4661 }
 0x1e0   : > { %v2333_v3 = vmul.f32 %v7204_v35, %v7203_v11  ;;  %v2399_v42 = vmul.f32 %v6221_v30, %v7206_v20  ;;  %v2750_v39 = vadd.f32 1.0, %v7210_v62  ;;  %4677 = vpow2.f32 %v3880_v61  ;;  %v4664_v44 = vpop.eup %4663 }
 0x1e1   : > { %v2367_v38 = vmul.f32 %v7204_v35, %v7209_v32  ;;  %v7212_v2 = vunpack.c.l.bf16 %v7211_v25  ;;  %v2791_v33 = vadd.f32 %v2784_v14, %v2783_v31  ;;  %v7215_v30 = vunpack.c.l.bf16 %v7214_v34  ;;  %v4666_v31 = vpop.eup %4665  ;;  %v7230_v32 = vld [vmem:[#allocation22_spill] sm:$0xff] }
 0x1e2   : > { %v2825_v58 = vadd.f32 %v2818_v28, %v2817_v55  ;;  %v7216_v15 = vunpack.c.h.bf16 %v7202_v57  ;;  %v2373_v63 = vadd.f32 %v2372_v49, %v2366_v40  ;;  %v7218_v21 = vunpack.c.h.bf16 %v7205_v56  ;;  %v7226_v57 = vld [vmem:[#allocation41_spill] sm:$0xff] }
 0x1e3   : > { %v2785_v52 = vmul.f32 %v7213_v54, %v7212_v2  ;;  %v2819_v12 = vmul.f32 %v7213_v54, %v7215_v30  ;;  %v2405_v17 = vadd.f32 %v2404_v41, %v2398_v6  ;;  %v7219_v4 = vunpack.c.h.bf16 %v7208_v18  ;;  %v7224_v6 = vld [vmem:[#allocation51_spill] sm:$0xff]  ;;  %v4668_v50 = vpop.eup %4667 }
 0x1e4   : > { %v2334_v8 = vmul.f32 %v7217_v19, %v7216_v15  ;;  %v2400_v10 = vmul.f32 %v7192_v53, %v7218_v21  ;;  %4679 = vrcp.f32 %v2749_v24  ;;  %v7221_v27 = vunpack.c.l.bf16 %v7220_v7  ;;  %v4670_v43 = vpop.eup %4669  ;;  %v7228_v24 = vld [vmem:[#allocation19_spill] sm:$0xff] }
 0x1e5   : > { %v2368_v60 = vmul.f32 %v7217_v19, %v7219_v4  ;;  %v7222_v5 = vunpack.c.h.bf16 %v7220_v7  ;;  %v2340_v61 = vadd.f32 %v2339_v59, %v2333_v3  ;;  %4681 = vrcp.f32 %v2750_v39  ;;  %v1954_v15 = vld [vmem:[#allocation2 + $0x28] sm:$0xff]  ;;  %v7235_v7 = vld [vmem:[#allocation36_spill] sm:$0xff] }
 0x1e6   : > { %v2851_v29 = vmul.f32 %v6532_v37, %v7221_v27  ;;  %v7223_v53 = vunpack.c.h.bf16 %v7211_v25  ;;  %v3199_v14 = vadd.f32 1.0, %v4664_v44  ;;  %v2792_v0 = vadd.f32 %v2791_v33, %v2785_v52  ;;  %v4672_v41 = vpop.eup %4671  ;;  %v7232_v33 = vld [vmem:[#allocation25_spill] sm:$0xff] }
 0x1e7   : > { %v2852_v9 = vmul.f32 %v7197_v45, %v7222_v5  ;;  %v7225_v55 = vunpack.c.h.bf16 %v7214_v34  ;;  %v2826_v28 = vadd.f32 %v2825_v58, %v2819_v12  ;;  %v3200_v37 = vadd.f32 1.0, %v4666_v31  ;;  %v7233_v34 = vld [vmem:[#allocation23_spill] sm:$0xff] }
 0x1e8   : > { %v2786_v13 = vmul.f32 %v7224_v6, %v7223_v53  ;;  %v2374_v40 = vadd.f32 %v2373_v63, %v2367_v38  ;;  %v2406_v49 = vadd.f32 %v2405_v17, %v2399_v42  ;;  %v3201_v45 = vadd.f32 1.0, %v4668_v50  ;;  %v4674_v26 = vpop.eup %4673 }
 0x1e9   : > { %v2820_v36 = vmul.f32 %v7224_v6, %v7225_v55  ;;  %4683 = vrcp.f32 %v3199_v14  ;;  %v7227_v11 = vunpack.c.l.bf16 %v7226_v57  ;;  %v2859_v56 = vadd.f32 %v2852_v9, %v2851_v29  ;;  %v4676_v39 = vpop.eup %4675  ;;  %v7241_v55 = vld [vmem:[#allocation42_spill] sm:$0xff] }
 0x1ea   : > { %v3202_v20 = vadd.f32 1.0, %v4670_v43  ;;  %4685 = vrcp.f32 %v3200_v37  ;;  %v7229_v59 = vunpack.c.l.bf16 %v7228_v24  ;;  %v7231_v62 = vunpack.c.l.bf16 %v7230_v32 }
 0x1eb   : > { %v2853_v3 = vmul.f32 %v7213_v54, %v7227_v11  ;;  %v3203_v42 = vadd.f32 1.0, %v4672_v41  ;;  %4687 = vrcp.f32 %v3201_v45  ;;  %v2793_v25 = vadd.f32 %v2792_v0, %v2786_v13  ;;  %v4678_v54 = vpop.eup %4677  ;;  %v7244_v41 = vld [vmem:[#allocation38_spill] sm:$0xff] }
 0x1ec   : > { %v2787_v18 = vmul.f32 %v6731_v48, %v7229_v59  ;;  %v2821_v38 = vmul.f32 %v6731_v48, %v7231_v62  ;;  %v2827_v2 = vadd.f32 %v2826_v28, %v2820_v36  ;;  %v3204_v52 = vadd.f32 1.0, %v4674_v26  ;;  %v7248_v59 = vld [vmem:[#allocation33_spill] sm:$0xff]  ;;  %v7250_v62 = vld [vmem:[#allocation18_spill] sm:$0xff] }
 0x1ed   : > { %4689 = vrcp.f32 %v3202_v20  ;;  %v1953_v30 = vadd.f32 %v7233_v34, %v7232_v33  ;;  %v2341_v12 = vadd.f32 %v2340_v61, %v2334_v8  ;;  %v3205_v58 = vadd.f32 1.0, %v4676_v39 }
 0x1ee   : > { %4691 = vrcp.f32 %v3203_v42  ;;  %v7234_v63 = vunpack.c.h.bf16 %v7226_v57  ;;  %v2860_v17 = vadd.f32 %v2859_v56, %v2853_v3  ;;  %v3206_v44 = vadd.f32 1.0, %v4678_v54  ;;  %v4680_v31 = vpop.eup %4679  ;;  %v7246_v3 = vld [vmem:[#allocation40_spill] sm:$0xff] }
 0x1ef   : > { %4693 = vrcp.f32 %v3204_v52  ;;  %v2375_v4 = vadd.f32 %v2374_v40, %v2368_v60  ;;  %v7236_v27 = vunpack.c.l.bf16 %v7235_v7  ;;  %v2407_v5 = vadd.f32 %v2406_v49, %v2400_v10  ;;  %v4682_v14 = vpop.eup %4681  ;;  %v7240_v10 = vld [vmem:[#allocation17_spill] sm:$0xff]  ;;  %v7243_v40 = vld [vmem:[#allocation26_spill] sm:$0xff] }
 0x1f0   : > { %v2854_v21 = vmul.f32 %v7224_v6, %v7234_v63  ;;  %v7237_v9 = vunpack.c.h.bf16 %v7228_v24  ;;  %v2794_v61 = vadd.f32 %v2793_v25, %v2787_v18  ;;  %v7238_v53 = vunpack.c.h.bf16 %v7230_v32 }
 0x1f1   : > { %v2401_v29 = vmul.f32 %v7204_v35, %v7236_v27  ;;  %v2828_v6 = vadd.f32 %v2827_v2, %v2821_v38  ;;  %4695 = vrcp.f32 %v3205_v58  ;;  %v6789_v50 = vadd.f32 %v1954_v15, %v1953_v30 }
 0x1f2   : > { %v2788_v8 = vmul.f32 %v6743_v51, %v7237_v9  ;;  %v2822_v13 = vmul.f32 %v6743_v51, %v7238_v53  ;;  %v7239_v60 = vunpack.c.h.bf16 %v7235_v7  ;;  %v6795_v0 = vadd.f32 %v2341_v12, %v7240_v10  ;;  %v7263_v10 = vld [vmem:[#allocation48_spill] sm:$0xff] }
 0x1f3   : > { %v7242_v36 = vunpack.c.l.bf16 %v7241_v55  ;;  %v2861_v37 = vadd.f32 %v2860_v17, %v2854_v21  ;;  %4697 = vrcp.f32 %v3206_v44  ;;  %v4684_v43 = vpop.eup %4683  ;;  %v2377_v49 = vadd.f32 %v2375_v4, %v7243_v40  ;;  %v7257_v21 = vld [vmem:[#allocation24_spill] sm:$0xff] }
 0x1f4   : > { %v2402_v35 = vmul.f32 %v7217_v19, %v7239_v60  ;;  %v2408_v45 = vadd.f32 %v2407_v5, %v2401_v29  ;;  %v7245_v57 = vunpack.c.l.bf16 %v7244_v41  ;;  %v7247_v56 = vunpack.c.l.bf16 %v7246_v3  ;;  %v4686_v19 = vpop.eup %4685  ;;  %v7259_v4 = vld [vmem:[#allocation20_spill] sm:$0xff] }
 0x1f5   : > { %v2855_v28 = vmul.f32 %v6731_v48, %v7242_v36  ;;  %v2795_v26 = vadd.f32 %v2794_v61, %v2788_v8  ;;  %v2829_v24 = vadd.f32 %v2828_v6, %v2822_v13  ;;  %v7249_v18 = vunpack.c.l.bf16 %v7248_v59  ;;  %v4688_v42 = vpop.eup %4687 }
 0x1f6   : > { %v2789_v11 = vmul.f32 %v4680_v31, %v7245_v57  ;;  %v2823_v20 = vmul.f32 %v4680_v31, %v7247_v56  ;;  %v7251_v48 = vunpack.c.l.bf16 %v7250_v62  ;;  %v7252_v39 = vunpack.c.h.bf16 %v7244_v41 }
 0x1f7   : > { %v3239_v32 = vmul.f32 %v4684_v43, %v7249_v18  ;;  %v7253_v2 = vunpack.c.h.bf16 %v7241_v55  ;;  %v7254_v54 = vunpack.c.h.bf16 %v7248_v59  ;;  %v7255_v34 = vunpack.c.h.bf16 %v7250_v62  ;;  %v4690_v12 = vpop.eup %4689  ;;  %v7268_v62 = vld [vmem:[#allocation43_spill] sm:$0xff] }
 0x1f8   : > { %v3273_v38 = vmul.f32 %v4684_v43, %v7251_v48  ;;  %v2790_v25 = vmul.f32 %v4682_v14, %v7252_v39  ;;  %v7256_v58 = vunpack.c.h.bf16 %v7246_v3  ;;  %v2862_v63 = vadd.f32 %v2861_v37, %v2855_v28  ;;  %v4692_v29 = vpop.eup %4691 }
 0x1f9   : > { %v2856_v52 = vmul.f32 %v6743_v51, %v7253_v2  ;;  %v3240_v33 = vmul.f32 %v4686_v19, %v7254_v54  ;;  %v3274_v30 = vmul.f32 %v4686_v19, %v7255_v34  ;;  %v7258_v17 = vunpack.c.l.bf16 %v7257_v21  ;;  %v4694_v13 = vpop.eup %4693 }
 0x1fa   : > { %v2824_v15 = vmul.f32 %v4682_v14, %v7256_v58  ;;  %v7260_v7 = vunpack.c.l.bf16 %v7259_v4  ;;  %v7261_v51 = vunpack.c.h.bf16 %v7257_v21  ;;  %v7262_v8 = vunpack.c.h.bf16 %v7259_v4 }
 0x1fb   : > { %v3241_v44 = vmul.f32 %v4688_v42, %v7258_v17  ;;  %v3247_v9 = vadd.f32 %v3240_v33, %v3239_v32  ;;  %v3281_v53 = vadd.f32 %v3274_v30, %v3273_v38  ;;  %v2796_v6 = vadd.f32 %v2795_v26, %v2789_v11  ;;  %v4696_v18 = vpop.eup %4695  ;;  %v7270_v26 = vld [vmem:[#allocation49_spill] sm:$0xff] }
 0x1fc   : > { %v3275_v27 = vmul.f32 %v4688_v42, %v7260_v7  ;;  %v3242_v5 = vmul.f32 %v4690_v12, %v7261_v51  ;;  %v3276_v61 = vmul.f32 %v4690_v12, %v7262_v8  ;;  %v2830_v60 = vadd.f32 %v2829_v24, %v2823_v20 }
 0x1fd   : > { %v7264_v55 = vunpack.c.l.bf16 %v7263_v10  ;;  %v7265_v28 = vunpack.c.h.bf16 %v7263_v10  ;;  %v7266_v40 = vunpack.c.l.bf16 %v6513_v22  ;;  %v3248_v57 = vadd.f32 %v3247_v9, %v3241_v44  ;;  %v4698_v34 = vpop.eup %4697 }
 0x1fe   : > { %v7267_v3 = vunpack.c.l.bf16 %v6538_v16  ;;  %v3282_v59 = vadd.f32 %v3281_v53, %v3275_v27  ;;  %v2409_v32 = vadd.f32 %v2408_v45, %v2402_v35  ;;  %v7269_v48 = vunpack.c.l.bf16 %v7268_v62 }
 0x1ff   : > { %v3307_v36 = vmul.f32 %v4684_v43, %v7264_v55  ;;  %v3308_v37 = vmul.f32 %v4686_v19, %v7265_v28  ;;  %v3243_v41 = vmul.f32 %v4692_v29, %v7266_v40  ;;  %v2863_v20 = vadd.f32 %v2862_v63, %v2856_v52 }
 0x200   : > { %v3277_v56 = vmul.f32 %v4692_v29, %v7267_v3  ;;  %v2857_v11 = vmul.f32 %v4680_v31, %v7269_v48  ;;  %v7271_v24 = vunpack.c.l.bf16 %v7270_v26  ;;  %v7272_v38 = vunpack.c.h.bf16 %v6513_v22  ;;  %v3357_v48 = vld [vmem:[#allocation2 + $0x10] sm:$0xff] (!%p3897_p3) }
 0x201   : > { %v3249_v39 = vadd.f32 %v3248_v57, %v3242_v5  ;;  %v7273_v2 = vunpack.c.h.bf16 %v6538_v16  ;;  %v3283_v33 = vadd.f32 %v3282_v59, %v3276_v61  ;;  %v2797_v30 = vadd.f32 %v2796_v6, %v2790_v25 }
 0x202   : > { %v3309_v43 = vmul.f32 %v4688_v42, %v7271_v24  ;;  %v3244_v19 = vmul.f32 %v4694_v13, %v7272_v38  ;;  %v2831_v58 = vadd.f32 %v2830_v60, %v2824_v15  ;;  %v7274_v35 = vunpack.c.h.bf16 %v7270_v26 }
 0x203   : > { %v3278_v54 = vmul.f32 %v4694_v13, %v7273_v2  ;;  %v3315_v21 = vadd.f32 %v3308_v37, %v3307_v36  ;;  %v7275_v31 = vunpack.c.l.bf16 %v6519_v46  ;;  %v3250_v63 = vadd.f32 %v3249_v39, %v3243_v41 }
 0x204   : > { %v3310_v45 = vmul.f32 %v4690_v12, %v7274_v35  ;;  %v7276_v42 = vunpack.c.l.bf16 %v6541_v23  ;;  %v3284_v17 = vadd.f32 %v3283_v33, %v3277_v56  ;;  %v7277_v44 = vunpack.c.h.bf16 %v7268_v62 }
 0x205   : > { %v3245_v52 = vmul.f32 %v4696_v18, %v7275_v31  ;;  %v2864_v4 = vadd.f32 %v2863_v20, %v2857_v11  ;;  %v7278_v7 = vunpack.c.l.bf16 %v6561_v1  ;;  %v3316_v15 = vadd.f32 %v3315_v21, %v3309_v43 }
 0x206   : > { %v3279_v22 = vmul.f32 %v4696_v18, %v7276_v42  ;;  %v2858_v16 = vmul.f32 %v4682_v14, %v7277_v44  ;;  %v7279_v27 = vunpack.c.h.bf16 %v6519_v46  ;;  %v3251_v51 = vadd.f32 %v3250_v63, %v3244_v19 }
 0x207   : > { %v3311_v25 = vmul.f32 %v4692_v29, %v7278_v7  ;;  %v7280_v5 = vunpack.c.h.bf16 %v6541_v23  ;;  %v3285_v8 = vadd.f32 %v3284_v17, %v3278_v54  ;;  %v7281_v61 = vunpack.c.h.bf16 %v6561_v1 }
 0x208   : > { %v3246_v12 = vmul.f32 %v4698_v34, %v7279_v27  ;;  %v3317_v6 = vadd.f32 %v3316_v15, %v3310_v45  ;;  %v2799_v60 = vadd.f32 %v2797_v30, %v6795_v0  ;;  %v2833_v14 = vadd.f32 %v2831_v58, %v2377_v49 }
 0x209   : > { %v3280_v9 = vmul.f32 %v4698_v34, %v7280_v5  ;;  %v3312_v53 = vmul.f32 %v4694_v13, %v7281_v61  ;;  %v3252_v10 = vadd.f32 %v3251_v51, %v3245_v52  ;;  %v3286_v55 = vadd.f32 %v3285_v8, %v3279_v22 }
 0x20a   : > { %v2411_v29 = vadd.f32 %v2409_v32, %v6789_v50  ;;  %v2865_v36 = vadd.f32 %v2864_v4, %v2858_v16  ;;  %v7282_v46 = vunpack.c.l.bf16 %v6564_v47  ;;  %v3318_v37 = vadd.f32 %v3317_v6, %v3311_v25  ;;  %v3343_v50 = vld [vmem:[#allocation2 + $0x8] sm:$0xff] (!%p3897_p3) }
 0x20b   : > { %v3253_v40 = vadd.f32 %v3252_v10, %v3246_v12  ;;  %v3287_v23 = vadd.f32 %v3286_v55, %v3280_v9  ;;  %v7283_v41 = vunpack.c.h.bf16 %v6564_v47  ;;  %3344 = vadd.xlane.f32.xlu1 (!%p3897_p3), %v3343_v50  ;;  %v3353_v17 = vstv (!%p3897_p3), %s6867_s29 }
 0x20c   : > { %v3313_v28 = vmul.f32 %v4696_v18, %v7282_v46  ;;  %v3319_v1 = vadd.f32 %v3318_v37, %v3312_v53  ;;  %v2867_v56 = vadd.f32 %v2865_v36, %v2411_v29  ;;  %v3329_v18 = vld [vmem:[#allocation2] sm:$0xff] (!%p3897_p3)  ;;  %v3339_v44 = vstv (!%p3897_p3), %s6869_s30 }
 0x20d   : > { %v3314_v57 = vmul.f32 %v4698_v34, %v7283_v41  ;;  %v3255_v13 = vadd.f32 %v3253_v40, %v2799_v60  ;;  %v3289_v3 = vadd.f32 %v3287_v23, %v2833_v14  ;;  %3330 = vadd.xlane.f32.xlu0 (!%p3897_p3), %v3329_v18  ;;  %v3407_v37 = vstv (!%p3897_p3), %s3901_s6 }
 0x20e   : > { %v3320_v0 = vadd.f32 %v3319_v1, %v3313_v28  ;;  %3328 = sbr.rel (%p3897_p3) target bundleno = 1019 (0x3fb), region = 135 }
 0x20f   : > { %3256 = vst [vmem:[#allocation2 + $0x18] sm:$0xff] %v3255_v13  ;;  %3290 = vst [vmem:[#allocation2 + $0x20] sm:$0xff] %v3289_v3 }
 0x210   : > { %v3321_v49 = vadd.f32 %v3320_v0, %v3314_v57 }
 0x212   : > { %v3323_v59 = vadd.f32 %v3321_v49, %v2867_v56 }
 0x214   : > { %3324 = vst [vmem:[#allocation2 + $0x28] sm:$0xff] %v3323_v59 }
 0x216   : > { %v3384_v32 = vld [vmem:[#allocation2 + $0x20] sm:$0xff]  ;;  %v3371_v47 = vld [vmem:[#allocation2 + $0x18] sm:$0xff] }
 0x217   : > { %3385 = vadd.xlane.f32.xlu1 %v3384_v32  ;;  %3372 = vadd.xlane.f32.xlu0 %v3371_v47 }
 0x21b   : > { %v3397_v62 = vld [vmem:[#allocation2 + $0x28] sm:$0xff]  ;;  %3358 = vadd.xlane.f32.xlu0 %v3357_v48 }
 0x21c   : > { %3398 = vadd.xlane.f32.xlu1 %v3397_v62 }
 0x298   : > { %v3345_v11 = vpop.xlane.xlu1 %3344 }
 0x299   : > { %v3346_v26 = vrot.slane %v3345_v11, 4 }
 0x29a   : > { %v3331_v20 = vpop.xlane.xlu0 %3330 }
 0x29b   : > { %v3332_v24 = vrot.slane %v3331_v20, 4  ;;  %v3347_v43 = vadd.f32 %v3346_v26, %v3345_v11 }
 0x29d   : > { %v3333_v38 = vadd.f32 %v3332_v24, %v3331_v20  ;;  %v3348_v2 = vrot.slane %v3347_v43, 2 }
 0x29f   : > { %v3334_v54 = vrot.slane %v3333_v38, 2  ;;  %v3349_v30 = vadd.f32 %v3348_v2, %v3347_v43 }
 0x2a1   : > { %v3335_v58 = vadd.f32 %v3334_v54, %v3333_v38  ;;  %v3350_v52 = vrot.slane %v3349_v30, 1 }
 0x2a3   : > { %v3336_v63 = vrot.slane %v3335_v58, 1  ;;  %v3351_v7 = vadd.f32 %v3350_v52, %v3349_v30 }
 0x2a4   : > { %v3386_v19 = vpop.xlane.xlu1 %3385  ;;  %v3373_v39 = vpop.xlane.xlu0 %3372 }
 0x2a5   : > { %v3387_v33 = vrot.slane %v3386_v19, 4  ;;  %v3374_v34 = vrot.slane %v3373_v39, 4  ;;  %v3337_v25 = vadd.f32 %v3336_v63, %v3335_v58  ;;  %v3354_v5 = vadd.f32 %v3353_v17, %v3351_v7 }
 0x2a7   : > { %v3388_v35 = vadd.f32 %v3387_v33, %v3386_v19  ;;  %v3375_v45 = vadd.f32 %v3374_v34, %v3373_v39  ;;  %v3340_v9 = vadd.f32 %v3339_v44, %v3337_v25 }
 0x2a8   : > { %v3359_v31 = vpop.xlane.xlu0 %3358 }
 0x2a9   : > { %v3399_v21 = vpop.xlane.xlu1 %3398  ;;  %v3389_v42 = vrot.slane %v3388_v35, 2  ;;  %v3376_v22 = vrot.slane %v3375_v45, 2  ;;  %v3360_v4 = vrot.slane %v3359_v31, 4  ;;  %3342 = vst.msk [vmem:[#allocation3] sm:$0x1] %vm3341_vm0, %v3340_v9 }
 0x2aa   : > { %v3400_v16 = vrot.slane %v3399_v21, 4  ;;  %3356 = vst.msk [vmem:[#allocation3] sm:$0x1] %vm3355_vm1, %v3354_v5 }
 0x2ab   : > { %v3390_v15 = vadd.f32 %v3389_v42, %v3388_v35  ;;  %v3377_v27 = vadd.f32 %v3376_v22, %v3375_v45  ;;  %v3361_v51 = vadd.f32 %v3360_v4, %v3359_v31 }
 0x2ac   : > { %v3401_v12 = vadd.f32 %v3400_v16, %v3399_v21 }
 0x2ad   : > { %v3391_v8 = vrot.slane %v3390_v15, 1  ;;  %v3378_v61 = vrot.slane %v3377_v27, 1  ;;  %v3362_v6 = vrot.slane %v3361_v51, 2 }
 0x2ae   : > { %v3402_v53 = vrot.slane %v3401_v12, 2 }
 0x2af   : > { %v3392_v60 = vadd.f32 %v3391_v8, %v3390_v15  ;;  %v3379_v14 = vadd.f32 %v3378_v61, %v3377_v27  ;;  %v3363_v55 = vadd.f32 %v3362_v6, %v3361_v51 }
 0x2b0   : > { %v3403_v10 = vadd.f32 %v3402_v53, %v3401_v12 }
 0x2b1   : > { %v3395_v29 = vadd.f32 %v3392_v60, %v3353_v17  ;;  %v3382_v36 = vadd.f32 %v3379_v14, %v3339_v44  ;;  %v3364_v28 = vrot.slane %v3363_v55, 1 }
 0x2b2   : > { %v3404_v46 = vrot.slane %v3403_v10, 1 }
 0x2b3   : > { %3383 = vst.msk [vmem:[#allocation3 + $0x1] sm:$0x1] %vm3341_vm0, %v3382_v36  ;;  %v3365_v23 = vadd.f32 %v3364_v28, %v3363_v55 }
 0x2b4   : > { %3396 = vst.msk [vmem:[#allocation3 + $0x1] sm:$0x1] %vm3355_vm1, %v3395_v29  ;;  %v3405_v40 = vadd.f32 %v3404_v46, %v3403_v10 }
 0x2b5   : > { %v3368_v57 = vadd.f32 %v3407_v37, %v3365_v23 }
 0x2b6   : > { %v3408_v41 = vadd.f32 %v3407_v37, %v3405_v40 }
 0x2b7   : > { %3370 = vst.msk [vmem:[#allocation3] sm:$0x1] %vm3369_vm2, %v3368_v57 }
 0x2b8   : > { %3409 = vst.msk [vmem:[#allocation3 + $0x1] sm:$0x1] %vm3369_vm2, %v3408_v41 }
 0x2bf   : > { %v3410_v1 = vld [vmem:[#allocation3] sm:$0x3] }
 0x2c0   : > { %v3412_v13 = vsel %vm3411_vm3, %v3410_v1, -inf }
 0x2c1   : > { %3413 = vmax.xlane.f32.xlu0 %v3412_v13 }
 0x34e   : > { %v3414_v3 = vpop.xlane.xlu0 %3413 }
 0x34f   : > { %v3415_v56 = vsub.f32 %v3410_v1, %v3414_v3 }
 0x351   : > { %v3416_v0 = vmul.f32 1.442695, %v3415_v56 }
 0x353   : > { %4699 = vpow2.f32 %v3416_v0 }
 0x35d   : > { %v4700_v49 = vpop.eup %4699 }
 0x35e   : > { %v3418_v59 = vsel %vm3411_vm3, %v4700_v49, 0.0 }
 0x35f   : > { %3419 = vadd.xlane.f32.xlu1 %v3418_v59 }
 0x3ec   : > { %v3420_v50 = vpop.xlane.xlu1 %3419 }
 0x3ed   : > { %4701 = vrcp.f32 %v3420_v50 }
 0x3f7   : > { %v4702_v18 = vpop.eup %4701 }
 0x3f8   : > { %v3422_v32 = vmul.f32 %v4702_v18, %v4700_v49 }
 0x3fa   : > { %3423 = vst.msk [vmem:[#allocation12] sm:$0x3] %vm3411_vm3, %v3422_v32 }
 0x3fb PF: > { %p4413_p5 = scmp.eq.s32.totalorder %s4848_s1, 1  ;;  %s4798_s7 = smov [#allocation12]  }
 0x3fc   : > { %s3431_s8 = sshll.u32 %s4798_s7, 4  ;;  %s3432_s8 = int_to_ptr.vmem [resolvable:$true] %s3431_s8 }
 0x3fd   : > { %s4733_s9 = scalar_lea.vmem %s3432_s8, 32  ;;  %p4740_p0 = scmp.lt.s32.totalorder %s3432_s8, %s3432_s8 }
 0x3fe   : > { %p4734_p9 = scmp.ne.s32.totalorder %s3432_s8, %s4733_s9  ;;  %p4741_p1 = scmp.lt.s32.totalorder %s4733_s9, %s4733_s9 }
 0x400   : > { %p4735_p11 = pnand %p4734_p9, %p4413_p5  ;;  %p4742_p4 = por %p4741_p1, %p4740_p0 }
 0x402   : > { %p4736_p13 = pneg %p4735_p11 }
 0x404   : > { %p4743_p6 = pnand %p4742_p4, %p4736_p13 }
 0x406   : > { %4746 = shalt.err (!%p4743_p6)
}
 0x407   : > { %s4747_s10 = scalar_lea.hbm %s6915_s5, 32 }
 0x408   : > { %p4748_p7 = scmp.ne.s32.totalorder %s6915_s5, %s4747_s10  ;;  %p4753_p12 = scmp.lt.u32.totalorder %s4747_s10, %s6915_s5 }
 0x40a   : > { %p4749_p8 = pnand %p4748_p7, %p4413_p5 }
 0x40c   : > { %p4750_p10 = pneg %p4749_p8 }
 0x40e   : > { %p4755_p2 = pnand %p4753_p12, %p4750_p10 }
 0x410   : > { %4758 = shalt.err (!%p4755_p2)
}
 0x411   : > { %4399 = dma.vmem_to_hbm [thread:$0]  (%p4413_p5), %s3432_s8, 32, %s6915_s5, [#allocation6]  }
 0x412   : > { %4780 = dma.done.wait (%p4413_p5), [#allocation6], 32  }
 0x413   : > { %4782 = vsyncadd (%p4413_p5), [#allocation6], 4294967264 }
 0x414 PF: > { %p16_p3 = scmp.ge.s32.totalorder %s4851_s23, 4   ;;  %s7284_s20 = smov %s4789_s21 }
 0x415   : > { %s7285_s21 = smov %s4861_s26  ;;  %s7286_s22 = smov %s4851_s23 }
 0x416   :  { %18 = sbr.rel (!%p16_p3) target bundleno = 6 (0x6), region = 183 }
 0x41d   :  { %3444 = vsyncpa [#allocation6], 1 }
 0x41e   :  { %3446 = vsyncpa [#allocation6 + $0x1], 1 }
 0x41f   :  { %3447 = vsyncpa [#allocation7], 1 }
 0x420   :  { %3449 = vsyncpa [#allocation7 + $0x1], 1 }
 0x421   :  { %3450 = vsyncpa [#allocation9], 1 }

</bundles_post_ra>
